<compile_context>
chip_gen: v5e
topology: v5e:2x2
jax: 0.10.0
libtpu: 0.0.40
codegen_flags: <defaults>
</compile_context>

<pallas_src>
import functools

import jax
import jax.numpy as jnp
from jax.experimental import pallas as pl
from jax.experimental.pallas import tpu as pltpu


def rnn_kernel(T, TB, CT, x_ref, wih0_ref, wihr_ref, whh_ref, b_ref,
               wfc_ref, bfc_ref, out_ref, buf_ref, h_ref):
    # x_ref   : (T_pad*TB, I_pad) bf16  -- this batch tile, time-major rows
    #                                      (row = t*TB + b_local)
    # wih0_ref: (I_pad, H_pad)     bf16 -- layer-0 input weights, transposed
    # wihr_ref: (max(L-1,1), H_pad, H_pad) bf16 -- input weights layers 1..L-1
    # whh_ref : (L, H_pad, H_pad)  bf16 -- recurrent weights, transposed
    # b_ref   : (L, 1, H_pad)      f32  -- combined bias b_ih + b_hh
    # wfc_ref : (H_pad, O_pad) bf16, bfc_ref: (1, O_pad) f32
    # buf_ref : (T_pad*TB, H_pad)  bf16 VMEM scratch -- hoisted projection of
    #           the current layer, overwritten in place with its outputs.
    # h_ref   : (TB, H_pad)        f32  VMEM scratch -- running hidden state.
    L = whh_ref.shape[0]
    rows = buf_ref.shape[0]             # T_pad * TB
    CR = CT * TB                        # rows per projection chunk
    n_chunks = rows // CR
    HALF = TB // 2                      # two independent recurrence chains
    f32 = jnp.float32

    # ---- Layer 0: hoisted input projection, one MXU matmul per time chunk --
    def proj0(c, carry):
        r0 = pl.multiple_of(c * CR, CR)
        p = jnp.dot(x_ref[pl.ds(r0, CR), :], wih0_ref[...],
                    preferred_element_type=f32)
        buf_ref[pl.ds(r0, CR), :] = (p + b_ref[0]).astype(buf_ref.dtype)
        return carry

    jax.lax.fori_loop(0, n_chunks, proj0, 0)

    for l in range(L):                                  # static layer loop
        if l > 0:
            # Hoisted projection of the previous layer's outputs, chunked so
            # the live dot result is one chunk (no hidden full-size temp).
            def projl(c, carry, l=l):
                r0 = pl.multiple_of(c * CR, CR)
                p = jnp.dot(buf_ref[pl.ds(r0, CR), :], wihr_ref[l - 1],
                            preferred_element_type=f32)
                buf_ref[pl.ds(r0, CR), :] = (p + b_ref[l]).astype(buf_ref.dtype)
                return carry

            jax.lax.fori_loop(0, n_chunks, projl, 0)

        h_ref[...] = jnp.zeros_like(h_ref)              # h0 = 0 (matches ref)
        last_layer = (l == L - 1)                       # static

        # Serial recurrence.  Two independent batch chains per step so the
        # scheduler can overlap the second vmatmul with the first result's
        # drain latency (MRF on v5e/v6e).
        def step(t, carry, l=l, last_layer=last_layer):
            r0 = pl.multiple_of(t * TB, TB)
            r1 = pl.multiple_of(t * TB + HALF, HALF)
            pa = buf_ref[pl.ds(r0, HALF), :].astype(f32)
            pb = buf_ref[pl.ds(r1, HALF), :].astype(f32)
            ha = jnp.tanh(pa + jnp.dot(
                h_ref[pl.ds(0, HALF), :].astype(jnp.bfloat16), whh_ref[l],
                preferred_element_type=f32))
            hb = jnp.tanh(pb + jnp.dot(
                h_ref[pl.ds(HALF, HALF), :].astype(jnp.bfloat16), whh_ref[l],
                preferred_element_type=f32))
            h_ref[pl.ds(0, HALF), :] = ha
            h_ref[pl.ds(HALF, HALF), :] = hb
            if not last_layer:                          # top layer: outputs unused
                buf_ref[pl.ds(r0, HALF), :] = ha.astype(buf_ref.dtype)
                buf_ref[pl.ds(r1, HALF), :] = hb.astype(buf_ref.dtype)
            return carry

        jax.lax.fori_loop(0, T, step, 0, unroll=min(T, 8))

    # ---- FC head on the final hidden state of the top layer ----------------
    out_ref[...] = (jnp.dot(h_ref[...].astype(jnp.bfloat16), wfc_ref[...],
                            preferred_element_type=f32) + bfc_ref[...])


def _round_up(v, m):
    return ((v + m - 1) // m) * m


def rnn_forward(x, w_ih, w_hh, b_ih, b_hh, w_fc, b_fc, *, chunk_t=64):
    """x: (B, T, num_inputs) batch-first, like the PyTorch module."""
    B, T, I = x.shape
    L = len(w_ih)
    H = w_hh[0].shape[0]
    O = w_fc.shape[0]

    LANE = 128
    TB = 32                              # batch tile: 2 chains x 16 bf16-packed rows
    I_pad = _round_up(I, LANE)
    H_pad = _round_up(H, LANE)
    O_pad = _round_up(O, LANE)
    B_pad = _round_up(B, TB)
    n_bt = B_pad // TB
    CT = min(chunk_t, T)                 # timesteps per projection chunk
    T_pad = _round_up(T, CT)

    # ---- pack & pad parameters (matmul operands bf16, biases f32) ----------
    def pad2(w, r, c):
        return jnp.pad(w, ((0, r - w.shape[0]), (0, c - w.shape[1])))

    wih0_t = pad2(w_ih[0].T, I_pad, H_pad).astype(jnp.bfloat16)
    if L > 1:
        wihr_t = jnp.stack([pad2(w.T, H_pad, H_pad) for w in w_ih[1:]]
                           ).astype(jnp.bfloat16)
    else:
        wihr_t = jnp.zeros((1, H_pad, H_pad), jnp.bfloat16)   # dummy, never read
    whh_t = jnp.stack([pad2(w.T, H_pad, H_pad) for w in w_hh]).astype(jnp.bfloat16)
    b_comb = jnp.stack([jnp.pad(bi + bh, (0, H_pad - H))
                        for bi, bh in zip(b_ih, b_hh)])[:, None, :].astype(jnp.float32)
    wfc_t = pad2(w_fc.T, H_pad, O_pad).astype(jnp.bfloat16)
    bfc_2d = jnp.pad(b_fc, (0, O_pad - O))[None, :].astype(jnp.float32)

    # ---- batch-tile-major, time-major-within-tile bf16 input layout --------
    # Inside tile j, row index = t * TB + b_local -> aligned per-step slices.
    xp = jnp.pad(x.astype(jnp.bfloat16),
                 ((0, B_pad - B), (0, T_pad - T), (0, I_pad - I)))
    xp = xp.reshape(n_bt, TB, T_pad, I_pad).transpose(0, 2, 1, 3)
    x2d = xp.reshape(n_bt * T_pad * TB, I_pad)

    # ---- VMEM budget: per-generation limit with headroom --------------------
    footprint = (2 * 2 * T_pad * TB * I_pad                       # x tile (dbl-buf)
                 + 2 * T_pad * TB * H_pad                         # seq buffer
                 + 4 * TB * H_pad                                 # hidden state
                 + 2 * (I_pad * H_pad
                        + (max(L - 1, 1) + L) * H_pad * H_pad
                        + H_pad * O_pad)                          # bf16 weights
                 + 4 * (L * H_pad + O_pad)                        # biases
                 + 2 * 4 * TB * O_pad)                            # out tile (dbl-buf)
    try:
        vmem_cap = int(pltpu.get_tpu_info().vmem_capacity_bytes)
    except Exception:
        vmem_cap = 64 << 20
    vmem_limit = int(min(max(2 * footprint + (4 << 20), 32 << 20),
                         int(0.85 * vmem_cap)))

    out_pad = pl.pallas_call(
        functools.partial(rnn_kernel, T, TB, CT),
        out_shape=jax.ShapeDtypeStruct((B_pad, O_pad), jnp.float32),
        grid=(n_bt,),
        in_specs=[
            pl.BlockSpec((T_pad * TB, I_pad), lambda j: (j, 0)),   # x batch tile
            pl.BlockSpec((I_pad, H_pad), lambda j: (0, 0)),        # W_ih layer 0
            pl.BlockSpec(wihr_t.shape, lambda j: (0, 0, 0)),       # W_ih layers 1..
            pl.BlockSpec(whh_t.shape, lambda j: (0, 0, 0)),        # W_hh
            pl.BlockSpec(b_comb.shape, lambda j: (0, 0, 0)),       # b_ih + b_hh
            pl.BlockSpec((H_pad, O_pad), lambda j: (0, 0)),        # W_fc
            pl.BlockSpec((1, O_pad), lambda j: (0, 0)),            # b_fc
        ],
        out_specs=pl.BlockSpec((TB, O_pad), lambda j: (j, 0)),
        scratch_shapes=[
            pltpu.VMEM((T_pad * TB, H_pad), jnp.bfloat16),   # sequence / proj buffer
            pltpu.VMEM((TB, H_pad), jnp.float32),            # hidden state (f32)
        ],
        compiler_params=pltpu.CompilerParams(
            dimension_semantics=("parallel",),               # 2 TCs on v7x
            vmem_limit_bytes=vmem_limit),
    )(x2d, wih0_t, wihr_t, whh_t, b_comb, wfc_t, bfc_2d)
    return out_pad[:B, :O]


def init_params(key, num_inputs, num_hiddens, num_layers, num_outputs):
    """Deterministic synthetic params, PyTorch-style U(-1/sqrt(H), 1/sqrt(H))."""
    ks = jax.random.split(key, 4 * num_layers + 2)
    scale = 1.0 / float(num_hiddens) ** 0.5
    w_ih, w_hh, b_ih, b_hh = [], [], [], []
    idx = 0
    for l in range(num_layers):
        in_dim = num_inputs if l == 0 else num_hiddens
        w_ih.append(jax.random.uniform(ks[idx], (num_hiddens, in_dim),
                                       jnp.float32, -scale, scale)); idx += 1
        w_hh.append(jax.random.uniform(ks[idx], (num_hiddens, num_hiddens),
                                       jnp.float32, -scale, scale)); idx += 1
        b_ih.append(jax.random.uniform(ks[idx], (num_hiddens,),
                                       jnp.float32, -scale, scale)); idx += 1
        b_hh.append(jax.random.uniform(ks[idx], (num_hiddens,),
                                       jnp.float32, -scale, scale)); idx += 1
    w_fc = jax.random.uniform(ks[idx], (num_outputs, num_hiddens),
                              jnp.float32, -scale, scale); idx += 1
    b_fc = jax.random.uniform(ks[idx], (num_outputs,),
                              jnp.float32, -scale, scale)
    return w_ih, w_hh, b_ih, b_hh, w_fc, b_fc


def rnn_ref(x, w_ih, w_hh, b_ih, b_hh, w_fc, b_fc):
    """Pure-JAX f32 reference matching torch.nn.RNN(batch_first=True) + Linear."""
    B, T, _ = x.shape
    L = len(w_ih)
    H = w_hh[0].shape[0]
    seq = x.astype(jnp.float32)
    for l in range(L):
        h = jnp.zeros((B, H), jnp.float32)
        outs = []
        for t in range(T):
            h = jnp.tanh(seq[:, t, :] @ w_ih[l].T + b_ih[l]
                         + h @ w_hh[l].T + b_hh[l])
            outs.append(h)
        seq = jnp.stack(outs, axis=1)
    return seq[:, -1, :] @ w_fc.T + b_fc


if __name__ == "__main__":
    num_inputs, num_hiddens, num_layers, num_outputs = 16, 32, 2, 10
    B, T = 2, 8

    key = jax.random.PRNGKey(0)
    k_x, k_p = jax.random.split(key)
    x = jax.random.normal(k_x, (B, T, num_inputs), jnp.float32)

    w_ih, w_hh, b_ih, b_hh, w_fc, b_fc = init_params(
        k_p, num_inputs, num_hiddens, num_layers, num_outputs)

    out = rnn_forward(x, w_ih, w_hh, b_ih, b_hh, w_fc, b_fc)
    out = jax.block_until_ready(out)

    ref = rnn_ref(x, w_ih, w_hh, b_ih, b_hh, w_fc, b_fc)
    assert out.shape == (B, num_outputs)
    # bf16 matmul operands (f32 accumulate / f32 hidden state) -> ~1e-2 drift.
    assert jnp.allclose(out, ref, atol=3e-2, rtol=3e-2), "mismatch vs reference"

    print("KERNEL_OK")
</pallas_src>

<mosaic_0001>
module attributes {stable_mosaic.version = 11 : i64} {
  func.func @rnn_kernel(%arg0: i32, %arg1: memref<256x128xbf16, #tpu.memory_space<vmem>>, %arg2: memref<128x128xbf16, #tpu.memory_space<vmem>>, %arg3: memref<1x128x128xbf16, #tpu.memory_space<vmem>>, %arg4: memref<2x128x128xbf16, #tpu.memory_space<vmem>>, %arg5: memref<2x1x128xf32, #tpu.memory_space<vmem>>, %arg6: memref<128x128xbf16, #tpu.memory_space<vmem>>, %arg7: memref<1x128xf32, #tpu.memory_space<vmem>>, %arg8: memref<32x128xf32, #tpu.memory_space<vmem>>, %arg9: memref<256x128xbf16, #tpu.memory_space<vmem>>, %arg10: memref<32x128xf32, #tpu.memory_space<vmem>>) attributes {dimension_semantics = [#tpu.dimension_semantics<parallel>], iteration_bounds = array<i64: 1>, scalar_prefetch = 0 : i64, scratch_operands = 2 : i64, tpu.core_type = #tpu.core_type<tc>, window_params = [{transform_indices = @transform_0, window_bounds = array<i64: 256, 128>}, {pipeline_mode = #tpu.pipeline_mode<synchronous>, transform_indices = @transform_1, window_bounds = array<i64: 128, 128>}, {pipeline_mode = #tpu.pipeline_mode<synchronous>, transform_indices = @transform_2, window_bounds = array<i64: 1, 128, 128>}, {pipeline_mode = #tpu.pipeline_mode<synchronous>, transform_indices = @transform_3, window_bounds = array<i64: 2, 128, 128>}, {pipeline_mode = #tpu.pipeline_mode<synchronous>, transform_indices = @transform_4, window_bounds = array<i64: 2, 1, 128>}, {pipeline_mode = #tpu.pipeline_mode<synchronous>, transform_indices = @transform_5, window_bounds = array<i64: 128, 128>}, {pipeline_mode = #tpu.pipeline_mode<synchronous>, transform_indices = @transform_6, window_bounds = array<i64: 1, 128>}, {transform_indices = @transform_7, window_bounds = array<i64: 32, 128>}]} {
    %c0_i32 = arith.constant 0 : i32
    %c256_i32 = arith.constant 256 : i32
    %0 = arith.muli %c0_i32, %c256_i32 : i32
    %1 = tpu.assume_multiple %0, 256 : i32
    %2 = arith.index_cast %1 : i32 to index
    %c0 = arith.constant 0 : index
    %3 = vector.load %arg1[%2, %c0] : memref<256x128xbf16, #tpu.memory_space<vmem>>, vector<256x128xbf16>
    %c0_0 = arith.constant 0 : index
    %c0_1 = arith.constant 0 : index
    %4 = vector.load %arg2[%c0_0, %c0_1] : memref<128x128xbf16, #tpu.memory_space<vmem>>, vector<128x128xbf16>
    %cst = arith.constant dense<0.000000e+00> : vector<256x128xf32>
    %5 = tpu.matmul %3, %4, %cst {dimension_numbers = #tpu.dot_dimension_numbers<[1], [0], [0], [1], [0, 0, 1, 1], [], []>} : vector<256x128xbf16>, vector<128x128xbf16>, vector<256x128xf32> -> vector<256x128xf32>
    %c0_2 = arith.constant 0 : index
    %c0_3 = arith.constant 0 : index
    %c0_4 = arith.constant 0 : index
    %6 = vector.load %arg5[%c0_2, %c0_3, %c0_4] : memref<2x1x128xf32, #tpu.memory_space<vmem>>, vector<1x1x128xf32>
    %7 = vector.shape_cast %6 : vector<1x1x128xf32> to vector<1x128xf32>
    %8 = vector.broadcast %7 : vector<1x128xf32> to vector<256x128xf32>
    %9 = arith.addf %5, %8 : vector<256x128xf32>
    %10 = arith.truncf %9 : vector<256x128xf32> to vector<256x128xbf16>
    %11 = arith.index_cast %1 : i32 to index
    %c0_5 = arith.constant 0 : index
    %12 = vector.load %arg9[%11, %c0_5] : memref<256x128xbf16, #tpu.memory_space<vmem>>, vector<256x128xbf16>
    tpu.vector_store %arg9[%11, %c0_5], %10 {strides = array<i32>} : memref<256x128xbf16, #tpu.memory_space<vmem>>, vector<256x128xbf16>,
    %c1_i32 = arith.constant 1 : i32
    %cst_6 = arith.constant 0.000000e+00 : f32
    %13 = vector.broadcast %cst_6 : f32 to vector<32x128xf32>
    %c0_7 = arith.constant 0 : index
    %c0_8 = arith.constant 0 : index
    %14 = vector.load %arg10[%c0_7, %c0_8] : memref<32x128xf32, #tpu.memory_space<vmem>>, vector<32x128xf32>
    tpu.vector_store %arg10[%c0_7, %c0_8], %13 {strides = array<i32>} : memref<32x128xf32, #tpu.memory_space<vmem>>, vector<32x128xf32>,
    %c0_i32_9 = arith.constant 0 : i32
    %c32_i32 = arith.constant 32 : i32
    %15 = arith.muli %c0_i32_9, %c32_i32 : i32
    %16 = tpu.assume_multiple %15, 32 : i32
    %c32_i32_10 = arith.constant 32 : i32
    %17 = arith.muli %c0_i32_9, %c32_i32_10 : i32
    %c16_i32 = arith.constant 16 : i32
    %18 = arith.addi %17, %c16_i32 : i32
    %19 = tpu.assume_multiple %18, 16 : i32
    %20 = arith.index_cast %16 : i32 to index
    %c0_11 = arith.constant 0 : index
    %21 = vector.load %arg9[%20, %c0_11] : memref<256x128xbf16, #tpu.memory_space<vmem>>, vector<16x128xbf16>
    %22 = arith.extf %21 : vector<16x128xbf16> to vector<16x128xf32>
    %23 = arith.index_cast %19 : i32 to index
    %c0_12 = arith.constant 0 : index
    %24 = vector.load %arg9[%23, %c0_12] : memref<256x128xbf16, #tpu.memory_space<vmem>>, vector<16x128xbf16>
    %25 = arith.extf %24 : vector<16x128xbf16> to vector<16x128xf32>
    %c0_13 = arith.constant 0 : index
    %c0_14 = arith.constant 0 : index
    %26 = vector.load %arg10[%c0_13, %c0_14] : memref<32x128xf32, #tpu.memory_space<vmem>>, vector<16x128xf32>
    %27 = arith.truncf %26 : vector<16x128xf32> to vector<16x128xbf16>
    %c0_15 = arith.constant 0 : index
    %c0_16 = arith.constant 0 : index
    %c0_17 = arith.constant 0 : index
    %28 = vector.load %arg4[%c0_15, %c0_16, %c0_17] : memref<2x128x128xbf16, #tpu.memory_space<vmem>>, vector<1x128x128xbf16>
    %29 = vector.shape_cast %28 : vector<1x128x128xbf16> to vector<128x128xbf16>
    %cst_18 = arith.constant dense<0.000000e+00> : vector<16x128xf32>
    %30 = tpu.matmul %27, %29, %cst_18 {dimension_numbers = #tpu.dot_dimension_numbers<[1], [0], [0], [1], [0, 0, 1, 1], [], []>} : vector<16x128xbf16>, vector<128x128xbf16>, vector<16x128xf32> -> vector<16x128xf32>
    %31 = arith.addf %22, %30 : vector<16x128xf32>
    %32 = math.tanh %31 : vector<16x128xf32>
    %c16 = arith.constant 16 : index
    %c0_19 = arith.constant 0 : index
    %33 = vector.load %arg10[%c16, %c0_19] : memref<32x128xf32, #tpu.memory_space<vmem>>, vector<16x128xf32>
    %34 = arith.truncf %33 : vector<16x128xf32> to vector<16x128xbf16>
    %c0_20 = arith.constant 0 : index
    %c0_21 = arith.constant 0 : index
    %c0_22 = arith.constant 0 : index
    %35 = vector.load %arg4[%c0_20, %c0_21, %c0_22] : memref<2x128x128xbf16, #tpu.memory_space<vmem>>, vector<1x128x128xbf16>
    %36 = vector.shape_cast %35 : vector<1x128x128xbf16> to vector<128x128xbf16>
    %cst_23 = arith.constant dense<0.000000e+00> : vector<16x128xf32>
    %37 = tpu.matmul %34, %36, %cst_23 {dimension_numbers = #tpu.dot_dimension_numbers<[1], [0], [0], [1], [0, 0, 1, 1], [], []>} : vector<16x128xbf16>, vector<128x128xbf16>, vector<16x128xf32> -> vector<16x128xf32>
    %38 = arith.addf %25, %37 : vector<16x128xf32>
    %39 = math.tanh %38 : vector<16x128xf32>
    %c0_24 = arith.constant 0 : index
    %c0_25 = arith.constant 0 : index
    %40 = vector.load %arg10[%c0_24, %c0_25] : memref<32x128xf32, #tpu.memory_space<vmem>>, vector<16x128xf32>
    tpu.vector_store %arg10[%c0_24, %c0_25], %32 {strides = array<i32>} : memref<32x128xf32, #tpu.memory_space<vmem>>, vector<16x128xf32>,
    %c16_26 = arith.constant 16 : index
    %c0_27 = arith.constant 0 : index
    %41 = vector.load %arg10[%c16_26, %c0_27] : memref<32x128xf32, #tpu.memory_space<vmem>>, vector<16x128xf32>
    tpu.vector_store %arg10[%c16_26, %c0_27], %39 {strides = array<i32>} : memref<32x128xf32, #tpu.memory_space<vmem>>, vector<16x128xf32>,
    %42 = arith.truncf %32 : vector<16x128xf32> to vector<16x128xbf16>
    %43 = arith.index_cast %16 : i32 to index
    %c0_28 = arith.constant 0 : index
    %44 = vector.load %arg9[%43, %c0_28] : memref<256x128xbf16, #tpu.memory_space<vmem>>, vector<16x128xbf16>
    tpu.vector_store %arg9[%43, %c0_28], %42 {strides = array<i32>} : memref<256x128xbf16, #tpu.memory_space<vmem>>, vector<16x128xbf16>,
    %45 = arith.truncf %39 : vector<16x128xf32> to vector<16x128xbf16>
    %46 = arith.index_cast %19 : i32 to index
    %c0_29 = arith.constant 0 : index
    %47 = vector.load %arg9[%46, %c0_29] : memref<256x128xbf16, #tpu.memory_space<vmem>>, vector<16x128xbf16>
    tpu.vector_store %arg9[%46, %c0_29], %45 {strides = array<i32>} : memref<256x128xbf16, #tpu.memory_space<vmem>>, vector<16x128xbf16>,
    %c1_i32_30 = arith.constant 1 : i32
    %c32_i32_31 = arith.constant 32 : i32
    %48 = arith.muli %c1_i32_30, %c32_i32_31 : i32
    %49 = tpu.assume_multiple %48, 32 : i32
    %c32_i32_32 = arith.constant 32 : i32
    %50 = arith.muli %c1_i32_30, %c32_i32_32 : i32
    %c16_i32_33 = arith.constant 16 : i32
    %51 = arith.addi %50, %c16_i32_33 : i32
    %52 = tpu.assume_multiple %51, 16 : i32
    %53 = arith.index_cast %49 : i32 to index
    %c0_34 = arith.constant 0 : index
    %54 = vector.load %arg9[%53, %c0_34] : memref<256x128xbf16, #tpu.memory_space<vmem>>, vector<16x128xbf16>
    %55 = arith.extf %54 : vector<16x128xbf16> to vector<16x128xf32>
    %56 = arith.index_cast %52 : i32 to index
    %c0_35 = arith.constant 0 : index
    %57 = vector.load %arg9[%56, %c0_35] : memref<256x128xbf16, #tpu.memory_space<vmem>>, vector<16x128xbf16>
    %58 = arith.extf %57 : vector<16x128xbf16> to vector<16x128xf32>
    %c0_36 = arith.constant 0 : index
    %c0_37 = arith.constant 0 : index
    %59 = vector.load %arg10[%c0_36, %c0_37] : memref<32x128xf32, #tpu.memory_space<vmem>>, vector<16x128xf32>
    %60 = arith.truncf %59 : vector<16x128xf32> to vector<16x128xbf16>
    %c0_38 = arith.constant 0 : index
    %c0_39 = arith.constant 0 : index
    %c0_40 = arith.constant 0 : index
    %61 = vector.load %arg4[%c0_38, %c0_39, %c0_40] : memref<2x128x128xbf16, #tpu.memory_space<vmem>>, vector<1x128x128xbf16>
    %62 = vector.shape_cast %61 : vector<1x128x128xbf16> to vector<128x128xbf16>
    %cst_41 = arith.constant dense<0.000000e+00> : vector<16x128xf32>
    %63 = tpu.matmul %60, %62, %cst_41 {dimension_numbers = #tpu.dot_dimension_numbers<[1], [0], [0], [1], [0, 0, 1, 1], [], []>} : vector<16x128xbf16>, vector<128x128xbf16>, vector<16x128xf32> -> vector<16x128xf32>
    %64 = arith.addf %55, %63 : vector<16x128xf32>
    %65 = math.tanh %64 : vector<16x128xf32>
    %c16_42 = arith.constant 16 : index
    %c0_43 = arith.constant 0 : index
    %66 = vector.load %arg10[%c16_42, %c0_43] : memref<32x128xf32, #tpu.memory_space<vmem>>, vector<16x128xf32>
    %67 = arith.truncf %66 : vector<16x128xf32> to vector<16x128xbf16>
    %c0_44 = arith.constant 0 : index
    %c0_45 = arith.constant 0 : index
    %c0_46 = arith.constant 0 : index
    %68 = vector.load %arg4[%c0_44, %c0_45, %c0_46] : memref<2x128x128xbf16, #tpu.memory_space<vmem>>, vector<1x128x128xbf16>
    %69 = vector.shape_cast %68 : vector<1x128x128xbf16> to vector<128x128xbf16>
    %cst_47 = arith.constant dense<0.000000e+00> : vector<16x128xf32>
    %70 = tpu.matmul %67, %69, %cst_47 {dimension_numbers = #tpu.dot_dimension_numbers<[1], [0], [0], [1], [0, 0, 1, 1], [], []>} : vector<16x128xbf16>, vector<128x128xbf16>, vector<16x128xf32> -> vector<16x128xf32>
    %71 = arith.addf %58, %70 : vector<16x128xf32>
    %72 = math.tanh %71 : vector<16x128xf32>
    %c0_48 = arith.constant 0 : index
    %c0_49 = arith.constant 0 : index
    %73 = vector.load %arg10[%c0_48, %c0_49] : memref<32x128xf32, #tpu.memory_space<vmem>>, vector<16x128xf32>
    tpu.vector_store %arg10[%c0_48, %c0_49], %65 {strides = array<i32>} : memref<32x128xf32, #tpu.memory_space<vmem>>, vector<16x128xf32>,
    %c16_50 = arith.constant 16 : index
    %c0_51 = arith.constant 0 : index
    %74 = vector.load %arg10[%c16_50, %c0_51] : memref<32x128xf32, #tpu.memory_space<vmem>>, vector<16x128xf32>
    tpu.vector_store %arg10[%c16_50, %c0_51], %72 {strides = array<i32>} : memref<32x128xf32, #tpu.memory_space<vmem>>, vector<16x128xf32>,
    %75 = arith.truncf %65 : vector<16x128xf32> to vector<16x128xbf16>
    %76 = arith.index_cast %49 : i32 to index
    %c0_52 = arith.constant 0 : index
    %77 = vector.load %arg9[%76, %c0_52] : memref<256x128xbf16, #tpu.memory_space<vmem>>, vector<16x128xbf16>
    tpu.vector_store %arg9[%76, %c0_52], %75 {strides = array<i32>} : memref<256x128xbf16, #tpu.memory_space<vmem>>, vector<16x128xbf16>,
    %78 = arith.truncf %72 : vector<16x128xf32> to vector<16x128xbf16>
    %79 = arith.index_cast %52 : i32 to index
    %c0_53 = arith.constant 0 : index
    %80 = vector.load %arg9[%79, %c0_53] : memref<256x128xbf16, #tpu.memory_space<vmem>>, vector<16x128xbf16>
    tpu.vector_store %arg9[%79, %c0_53], %78 {strides = array<i32>} : memref<256x128xbf16, #tpu.memory_space<vmem>>, vector<16x128xbf16>,
    %c2_i32 = arith.constant 2 : i32
    %c32_i32_54 = arith.constant 32 : i32
    %81 = arith.muli %c2_i32, %c32_i32_54 : i32
    %82 = tpu.assume_multiple %81, 32 : i32
    %c32_i32_55 = arith.constant 32 : i32
    %83 = arith.muli %c2_i32, %c32_i32_55 : i32
    %c16_i32_56 = arith.constant 16 : i32
    %84 = arith.addi %83, %c16_i32_56 : i32
    %85 = tpu.assume_multiple %84, 16 : i32
    %86 = arith.index_cast %82 : i32 to index
    %c0_57 = arith.constant 0 : index
    %87 = vector.load %arg9[%86, %c0_57] : memref<256x128xbf16, #tpu.memory_space<vmem>>, vector<16x128xbf16>
    %88 = arith.extf %87 : vector<16x128xbf16> to vector<16x128xf32>
    %89 = arith.index_cast %85 : i32 to index
    %c0_58 = arith.constant 0 : index
    %90 = vector.load %arg9[%89, %c0_58] : memref<256x128xbf16, #tpu.memory_space<vmem>>, vector<16x128xbf16>
    %91 = arith.extf %90 : vector<16x128xbf16> to vector<16x128xf32>
    %c0_59 = arith.constant 0 : index
    %c0_60 = arith.constant 0 : index
    %92 = vector.load %arg10[%c0_59, %c0_60] : memref<32x128xf32, #tpu.memory_space<vmem>>, vector<16x128xf32>
    %93 = arith.truncf %92 : vector<16x128xf32> to vector<16x128xbf16>
    %c0_61 = arith.constant 0 : index
    %c0_62 = arith.constant 0 : index
    %c0_63 = arith.constant 0 : index
    %94 = vector.load %arg4[%c0_61, %c0_62, %c0_63] : memref<2x128x128xbf16, #tpu.memory_space<vmem>>, vector<1x128x128xbf16>
    %95 = vector.shape_cast %94 : vector<1x128x128xbf16> to vector<128x128xbf16>
    %cst_64 = arith.constant dense<0.000000e+00> : vector<16x128xf32>
    %96 = tpu.matmul %93, %95, %cst_64 {dimension_numbers = #tpu.dot_dimension_numbers<[1], [0], [0], [1], [0, 0, 1, 1], [], []>} : vector<16x128xbf16>, vector<128x128xbf16>, vector<16x128xf32> -> vector<16x128xf32>
    %97 = arith.addf %88, %96 : vector<16x128xf32>
    %98 = math.tanh %97 : vector<16x128xf32>
    %c16_65 = arith.constant 16 : index
    %c0_66 = arith.constant 0 : index
    %99 = vector.load %arg10[%c16_65, %c0_66] : memref<32x128xf32, #tpu.memory_space<vmem>>, vector<16x128xf32>
    %100 = arith.truncf %99 : vector<16x128xf32> to vector<16x128xbf16>
    %c0_67 = arith.constant 0 : index
    %c0_68 = arith.constant 0 : index
    %c0_69 = arith.constant 0 : index
    %101 = vector.load %arg4[%c0_67, %c0_68, %c0_69] : memref<2x128x128xbf16, #tpu.memory_space<vmem>>, vector<1x128x128xbf16>
    %102 = vector.shape_cast %101 : vector<1x128x128xbf16> to vector<128x128xbf16>
    %cst_70 = arith.constant dense<0.000000e+00> : vector<16x128xf32>
    %103 = tpu.matmul %100, %102, %cst_70 {dimension_numbers = #tpu.dot_dimension_numbers<[1], [0], [0], [1], [0, 0, 1, 1], [], []>} : vector<16x128xbf16>, vector<128x128xbf16>, vector<16x128xf32> -> vector<16x128xf32>
    %104 = arith.addf %91, %103 : vector<16x128xf32>
    %105 = math.tanh %104 : vector<16x128xf32>
    %c0_71 = arith.constant 0 : index
    %c0_72 = arith.constant 0 : index
    %106 = vector.load %arg10[%c0_71, %c0_72] : memref<32x128xf32, #tpu.memory_space<vmem>>, vector<16x128xf32>
    tpu.vector_store %arg10[%c0_71, %c0_72], %98 {strides = array<i32>} : memref<32x128xf32, #tpu.memory_space<vmem>>, vector<16x128xf32>,
    %c16_73 = arith.constant 16 : index
    %c0_74 = arith.constant 0 : index
    %107 = vector.load %arg10[%c16_73, %c0_74] : memref<32x128xf32, #tpu.memory_space<vmem>>, vector<16x128xf32>
    tpu.vector_store %arg10[%c16_73, %c0_74], %105 {strides = array<i32>} : memref<32x128xf32, #tpu.memory_space<vmem>>, vector<16x128xf32>,
    %108 = arith.truncf %98 : vector<16x128xf32> to vector<16x128xbf16>
    %109 = arith.index_cast %82 : i32 to index
    %c0_75 = arith.constant 0 : index
    %110 = vector.load %arg9[%109, %c0_75] : memref<256x128xbf16, #tpu.memory_space<vmem>>, vector<16x128xbf16>
    tpu.vector_store %arg9[%109, %c0_75], %108 {strides = array<i32>} : memref<256x128xbf16, #tpu.memory_space<vmem>>, vector<16x128xbf16>,
    %111 = arith.truncf %105 : vector<16x128xf32> to vector<16x128xbf16>
    %112 = arith.index_cast %85 : i32 to index
    %c0_76 = arith.constant 0 : index
    %113 = vector.load %arg9[%112, %c0_76] : memref<256x128xbf16, #tpu.memory_space<vmem>>, vector<16x128xbf16>
    tpu.vector_store %arg9[%112, %c0_76], %111 {strides = array<i32>} : memref<256x128xbf16, #tpu.memory_space<vmem>>, vector<16x128xbf16>,
    %c3_i32 = arith.constant 3 : i32
    %c32_i32_77 = arith.constant 32 : i32
    %114 = arith.muli %c3_i32, %c32_i32_77 : i32
    %115 = tpu.assume_multiple %114, 32 : i32
    %c32_i32_78 = arith.constant 32 : i32
    %116 = arith.muli %c3_i32, %c32_i32_78 : i32
    %c16_i32_79 = arith.constant 16 : i32
    %117 = arith.addi %116, %c16_i32_79 : i32
    %118 = tpu.assume_multiple %117, 16 : i32
    %119 = arith.index_cast %115 : i32 to index
    %c0_80 = arith.constant 0 : index
    %120 = vector.load %arg9[%119, %c0_80] : memref<256x128xbf16, #tpu.memory_space<vmem>>, vector<16x128xbf16>
    %121 = arith.extf %120 : vector<16x128xbf16> to vector<16x128xf32>
    %122 = arith.index_cast %118 : i32 to index
    %c0_81 = arith.constant 0 : index
    %123 = vector.load %arg9[%122, %c0_81] : memref<256x128xbf16, #tpu.memory_space<vmem>>, vector<16x128xbf16>
    %124 = arith.extf %123 : vector<16x128xbf16> to vector<16x128xf32>
    %c0_82 = arith.constant 0 : index
    %c0_83 = arith.constant 0 : index
    %125 = vector.load %arg10[%c0_82, %c0_83] : memref<32x128xf32, #tpu.memory_space<vmem>>, vector<16x128xf32>
    %126 = arith.truncf %125 : vector<16x128xf32> to vector<16x128xbf16>
    %c0_84 = arith.constant 0 : index
    %c0_85 = arith.constant 0 : index
    %c0_86 = arith.constant 0 : index
    %127 = vector.load %arg4[%c0_84, %c0_85, %c0_86] : memref<2x128x128xbf16, #tpu.memory_space<vmem>>, vector<1x128x128xbf16>
    %128 = vector.shape_cast %127 : vector<1x128x128xbf16> to vector<128x128xbf16>
    %cst_87 = arith.constant dense<0.000000e+00> : vector<16x128xf32>
    %129 = tpu.matmul %126, %128, %cst_87 {dimension_numbers = #tpu.dot_dimension_numbers<[1], [0], [0], [1], [0, 0, 1, 1], [], []>} : vector<16x128xbf16>, vector<128x128xbf16>, vector<16x128xf32> -> vector<16x128xf32>
    %130 = arith.addf %121, %129 : vector<16x128xf32>
    %131 = math.tanh %130 : vector<16x128xf32>
    %c16_88 = arith.constant 16 : index
    %c0_89 = arith.constant 0 : index
    %132 = vector.load %arg10[%c16_88, %c0_89] : memref<32x128xf32, #tpu.memory_space<vmem>>, vector<16x128xf32>
    %133 = arith.truncf %132 : vector<16x128xf32> to vector<16x128xbf16>
    %c0_90 = arith.constant 0 : index
    %c0_91 = arith.constant 0 : index
    %c0_92 = arith.constant 0 : index
    %134 = vector.load %arg4[%c0_90, %c0_91, %c0_92] : memref<2x128x128xbf16, #tpu.memory_space<vmem>>, vector<1x128x128xbf16>
    %135 = vector.shape_cast %134 : vector<1x128x128xbf16> to vector<128x128xbf16>
    %cst_93 = arith.constant dense<0.000000e+00> : vector<16x128xf32>
    %136 = tpu.matmul %133, %135, %cst_93 {dimension_numbers = #tpu.dot_dimension_numbers<[1], [0], [0], [1], [0, 0, 1, 1], [], []>} : vector<16x128xbf16>, vector<128x128xbf16>, vector<16x128xf32> -> vector<16x128xf32>
    %137 = arith.addf %124, %136 : vector<16x128xf32>
    %138 = math.tanh %137 : vector<16x128xf32>
    %c0_94 = arith.constant 0 : index
    %c0_95 = arith.constant 0 : index
    %139 = vector.load %arg10[%c0_94, %c0_95] : memref<32x128xf32, #tpu.memory_space<vmem>>, vector<16x128xf32>
    tpu.vector_store %arg10[%c0_94, %c0_95], %131 {strides = array<i32>} : memref<32x128xf32, #tpu.memory_space<vmem>>, vector<16x128xf32>,
    %c16_96 = arith.constant 16 : index
    %c0_97 = arith.constant 0 : index
    %140 = vector.load %arg10[%c16_96, %c0_97] : memref<32x128xf32, #tpu.memory_space<vmem>>, vector<16x128xf32>
    tpu.vector_store %arg10[%c16_96, %c0_97], %138 {strides = array<i32>} : memref<32x128xf32, #tpu.memory_space<vmem>>, vector<16x128xf32>,
    %141 = arith.truncf %131 : vector<16x128xf32> to vector<16x128xbf16>
    %142 = arith.index_cast %115 : i32 to index
    %c0_98 = arith.constant 0 : index
    %143 = vector.load %arg9[%142, %c0_98] : memref<256x128xbf16, #tpu.memory_space<vmem>>, vector<16x128xbf16>
    tpu.vector_store %arg9[%142, %c0_98], %141 {strides = array<i32>} : memref<256x128xbf16, #tpu.memory_space<vmem>>, vector<16x128xbf16>,
    %144 = arith.truncf %138 : vector<16x128xf32> to vector<16x128xbf16>
    %145 = arith.index_cast %118 : i32 to index
    %c0_99 = arith.constant 0 : index
    %146 = vector.load %arg9[%145, %c0_99] : memref<256x128xbf16, #tpu.memory_space<vmem>>, vector<16x128xbf16>
    tpu.vector_store %arg9[%145, %c0_99], %144 {strides = array<i32>} : memref<256x128xbf16, #tpu.memory_space<vmem>>, vector<16x128xbf16>,
    %c4_i32 = arith.constant 4 : i32
    %c32_i32_100 = arith.constant 32 : i32
    %147 = arith.muli %c4_i32, %c32_i32_100 : i32
    %148 = tpu.assume_multiple %147, 32 : i32
    %c32_i32_101 = arith.constant 32 : i32
    %149 = arith.muli %c4_i32, %c32_i32_101 : i32
    %c16_i32_102 = arith.constant 16 : i32
    %150 = arith.addi %149, %c16_i32_102 : i32
    %151 = tpu.assume_multiple %150, 16 : i32
    %152 = arith.index_cast %148 : i32 to index
    %c0_103 = arith.constant 0 : index
    %153 = vector.load %arg9[%152, %c0_103] : memref<256x128xbf16, #tpu.memory_space<vmem>>, vector<16x128xbf16>
    %154 = arith.extf %153 : vector<16x128xbf16> to vector<16x128xf32>
    %155 = arith.index_cast %151 : i32 to index
    %c0_104 = arith.constant 0 : index
    %156 = vector.load %arg9[%155, %c0_104] : memref<256x128xbf16, #tpu.memory_space<vmem>>, vector<16x128xbf16>
    %157 = arith.extf %156 : vector<16x128xbf16> to vector<16x128xf32>
    %c0_105 = arith.constant 0 : index
    %c0_106 = arith.constant 0 : index
    %158 = vector.load %arg10[%c0_105, %c0_106] : memref<32x128xf32, #tpu.memory_space<vmem>>, vector<16x128xf32>
    %159 = arith.truncf %158 : vector<16x128xf32> to vector<16x128xbf16>
    %c0_107 = arith.constant 0 : index
    %c0_108 = arith.constant 0 : index
    %c0_109 = arith.constant 0 : index
    %160 = vector.load %arg4[%c0_107, %c0_108, %c0_109] : memref<2x128x128xbf16, #tpu.memory_space<vmem>>, vector<1x128x128xbf16>
    %161 = vector.shape_cast %160 : vector<1x128x128xbf16> to vector<128x128xbf16>
    %cst_110 = arith.constant dense<0.000000e+00> : vector<16x128xf32>
    %162 = tpu.matmul %159, %161, %cst_110 {dimension_numbers = #tpu.dot_dimension_numbers<[1], [0], [0], [1], [0, 0, 1, 1], [], []>} : vector<16x128xbf16>, vector<128x128xbf16>, vector<16x128xf32> -> vector<16x128xf32>
    %163 = arith.addf %154, %162 : vector<16x128xf32>
    %164 = math.tanh %163 : vector<16x128xf32>
    %c16_111 = arith.constant 16 : index
    %c0_112 = arith.constant 0 : index
    %165 = vector.load %arg10[%c16_111, %c0_112] : memref<32x128xf32, #tpu.memory_space<vmem>>, vector<16x128xf32>
    %166 = arith.truncf %165 : vector<16x128xf32> to vector<16x128xbf16>
    %c0_113 = arith.constant 0 : index
    %c0_114 = arith.constant 0 : index
    %c0_115 = arith.constant 0 : index
    %167 = vector.load %arg4[%c0_113, %c0_114, %c0_115] : memref<2x128x128xbf16, #tpu.memory_space<vmem>>, vector<1x128x128xbf16>
    %168 = vector.shape_cast %167 : vector<1x128x128xbf16> to vector<128x128xbf16>
    %cst_116 = arith.constant dense<0.000000e+00> : vector<16x128xf32>
    %169 = tpu.matmul %166, %168, %cst_116 {dimension_numbers = #tpu.dot_dimension_numbers<[1], [0], [0], [1], [0, 0, 1, 1], [], []>} : vector<16x128xbf16>, vector<128x128xbf16>, vector<16x128xf32> -> vector<16x128xf32>
    %170 = arith.addf %157, %169 : vector<16x128xf32>
    %171 = math.tanh %170 : vector<16x128xf32>
    %c0_117 = arith.constant 0 : index
    %c0_118 = arith.constant 0 : index
    %172 = vector.load %arg10[%c0_117, %c0_118] : memref<32x128xf32, #tpu.memory_space<vmem>>, vector<16x128xf32>
    tpu.vector_store %arg10[%c0_117, %c0_118], %164 {strides = array<i32>} : memref<32x128xf32, #tpu.memory_space<vmem>>, vector<16x128xf32>,
    %c16_119 = arith.constant 16 : index
    %c0_120 = arith.constant 0 : index
    %173 = vector.load %arg10[%c16_119, %c0_120] : memref<32x128xf32, #tpu.memory_space<vmem>>, vector<16x128xf32>
    tpu.vector_store %arg10[%c16_119, %c0_120], %171 {strides = array<i32>} : memref<32x128xf32, #tpu.memory_space<vmem>>, vector<16x128xf32>,
    %174 = arith.truncf %164 : vector<16x128xf32> to vector<16x128xbf16>
    %175 = arith.index_cast %148 : i32 to index
    %c0_121 = arith.constant 0 : index
    %176 = vector.load %arg9[%175, %c0_121] : memref<256x128xbf16, #tpu.memory_space<vmem>>, vector<16x128xbf16>
    tpu.vector_store %arg9[%175, %c0_121], %174 {strides = array<i32>} : memref<256x128xbf16, #tpu.memory_space<vmem>>, vector<16x128xbf16>,
    %177 = arith.truncf %171 : vector<16x128xf32> to vector<16x128xbf16>
    %178 = arith.index_cast %151 : i32 to index
    %c0_122 = arith.constant 0 : index
    %179 = vector.load %arg9[%178, %c0_122] : memref<256x128xbf16, #tpu.memory_space<vmem>>, vector<16x128xbf16>
    tpu.vector_store %arg9[%178, %c0_122], %177 {strides = array<i32>} : memref<256x128xbf16, #tpu.memory_space<vmem>>, vector<16x128xbf16>,
    %c5_i32 = arith.constant 5 : i32
    %c32_i32_123 = arith.constant 32 : i32
    %180 = arith.muli %c5_i32, %c32_i32_123 : i32
    %181 = tpu.assume_multiple %180, 32 : i32
    %c32_i32_124 = arith.constant 32 : i32
    %182 = arith.muli %c5_i32, %c32_i32_124 : i32
    %c16_i32_125 = arith.constant 16 : i32
    %183 = arith.addi %182, %c16_i32_125 : i32
    %184 = tpu.assume_multiple %183, 16 : i32
    %185 = arith.index_cast %181 : i32 to index
    %c0_126 = arith.constant 0 : index
    %186 = vector.load %arg9[%185, %c0_126] : memref<256x128xbf16, #tpu.memory_space<vmem>>, vector<16x128xbf16>
    %187 = arith.extf %186 : vector<16x128xbf16> to vector<16x128xf32>
    %188 = arith.index_cast %184 : i32 to index
    %c0_127 = arith.constant 0 : index
    %189 = vector.load %arg9[%188, %c0_127] : memref<256x128xbf16, #tpu.memory_space<vmem>>, vector<16x128xbf16>
    %190 = arith.extf %189 : vector<16x128xbf16> to vector<16x128xf32>
    %c0_128 = arith.constant 0 : index
    %c0_129 = arith.constant 0 : index
    %191 = vector.load %arg10[%c0_128, %c0_129] : memref<32x128xf32, #tpu.memory_space<vmem>>, vector<16x128xf32>
    %192 = arith.truncf %191 : vector<16x128xf32> to vector<16x128xbf16>
    %c0_130 = arith.constant 0 : index
    %c0_131 = arith.constant 0 : index
    %c0_132 = arith.constant 0 : index
    %193 = vector.load %arg4[%c0_130, %c0_131, %c0_132] : memref<2x128x128xbf16, #tpu.memory_space<vmem>>, vector<1x128x128xbf16>
    %194 = vector.shape_cast %193 : vector<1x128x128xbf16> to vector<128x128xbf16>
    %cst_133 = arith.constant dense<0.000000e+00> : vector<16x128xf32>
    %195 = tpu.matmul %192, %194, %cst_133 {dimension_numbers = #tpu.dot_dimension_numbers<[1], [0], [0], [1], [0, 0, 1, 1], [], []>} : vector<16x128xbf16>, vector<128x128xbf16>, vector<16x128xf32> -> vector<16x128xf32>
    %196 = arith.addf %187, %195 : vector<16x128xf32>
    %197 = math.tanh %196 : vector<16x128xf32>
    %c16_134 = arith.constant 16 : index
    %c0_135 = arith.constant 0 : index
    %198 = vector.load %arg10[%c16_134, %c0_135] : memref<32x128xf32, #tpu.memory_space<vmem>>, vector<16x128xf32>
    %199 = arith.truncf %198 : vector<16x128xf32> to vector<16x128xbf16>
    %c0_136 = arith.constant 0 : index
    %c0_137 = arith.constant 0 : index
    %c0_138 = arith.constant 0 : index
    %200 = vector.load %arg4[%c0_136, %c0_137, %c0_138] : memref<2x128x128xbf16, #tpu.memory_space<vmem>>, vector<1x128x128xbf16>
    %201 = vector.shape_cast %200 : vector<1x128x128xbf16> to vector<128x128xbf16>
    %cst_139 = arith.constant dense<0.000000e+00> : vector<16x128xf32>
    %202 = tpu.matmul %199, %201, %cst_139 {dimension_numbers = #tpu.dot_dimension_numbers<[1], [0], [0], [1], [0, 0, 1, 1], [], []>} : vector<16x128xbf16>, vector<128x128xbf16>, vector<16x128xf32> -> vector<16x128xf32>
    %203 = arith.addf %190, %202 : vector<16x128xf32>
    %204 = math.tanh %203 : vector<16x128xf32>
    %c0_140 = arith.constant 0 : index
    %c0_141 = arith.constant 0 : index
    %205 = vector.load %arg10[%c0_140, %c0_141] : memref<32x128xf32, #tpu.memory_space<vmem>>, vector<16x128xf32>
    tpu.vector_store %arg10[%c0_140, %c0_141], %197 {strides = array<i32>} : memref<32x128xf32, #tpu.memory_space<vmem>>, vector<16x128xf32>,
    %c16_142 = arith.constant 16 : index
    %c0_143 = arith.constant 0 : index
    %206 = vector.load %arg10[%c16_142, %c0_143] : memref<32x128xf32, #tpu.memory_space<vmem>>, vector<16x128xf32>
    tpu.vector_store %arg10[%c16_142, %c0_143], %204 {strides = array<i32>} : memref<32x128xf32, #tpu.memory_space<vmem>>, vector<16x128xf32>,
    %207 = arith.truncf %197 : vector<16x128xf32> to vector<16x128xbf16>
    %208 = arith.index_cast %181 : i32 to index
    %c0_144 = arith.constant 0 : index
    %209 = vector.load %arg9[%208, %c0_144] : memref<256x128xbf16, #tpu.memory_space<vmem>>, vector<16x128xbf16>
    tpu.vector_store %arg9[%208, %c0_144], %207 {strides = array<i32>} : memref<256x128xbf16, #tpu.memory_space<vmem>>, vector<16x128xbf16>,
    %210 = arith.truncf %204 : vector<16x128xf32> to vector<16x128xbf16>
    %211 = arith.index_cast %184 : i32 to index
    %c0_145 = arith.constant 0 : index
    %212 = vector.load %arg9[%211, %c0_145] : memref<256x128xbf16, #tpu.memory_space<vmem>>, vector<16x128xbf16>
    tpu.vector_store %arg9[%211, %c0_145], %210 {strides = array<i32>} : memref<256x128xbf16, #tpu.memory_space<vmem>>, vector<16x128xbf16>,
    %c6_i32 = arith.constant 6 : i32
    %c32_i32_146 = arith.constant 32 : i32
    %213 = arith.muli %c6_i32, %c32_i32_146 : i32
    %214 = tpu.assume_multiple %213, 32 : i32
    %c32_i32_147 = arith.constant 32 : i32
    %215 = arith.muli %c6_i32, %c32_i32_147 : i32
    %c16_i32_148 = arith.constant 16 : i32
    %216 = arith.addi %215, %c16_i32_148 : i32
    %217 = tpu.assume_multiple %216, 16 : i32
    %218 = arith.index_cast %214 : i32 to index
    %c0_149 = arith.constant 0 : index
    %219 = vector.load %arg9[%218, %c0_149] : memref<256x128xbf16, #tpu.memory_space<vmem>>, vector<16x128xbf16>
    %220 = arith.extf %219 : vector<16x128xbf16> to vector<16x128xf32>
    %221 = arith.index_cast %217 : i32 to index
    %c0_150 = arith.constant 0 : index
    %222 = vector.load %arg9[%221, %c0_150] : memref<256x128xbf16, #tpu.memory_space<vmem>>, vector<16x128xbf16>
    %223 = arith.extf %222 : vector<16x128xbf16> to vector<16x128xf32>
    %c0_151 = arith.constant 0 : index
    %c0_152 = arith.constant 0 : index
    %224 = vector.load %arg10[%c0_151, %c0_152] : memref<32x128xf32, #tpu.memory_space<vmem>>, vector<16x128xf32>
    %225 = arith.truncf %224 : vector<16x128xf32> to vector<16x128xbf16>
    %c0_153 = arith.constant 0 : index
    %c0_154 = arith.constant 0 : index
    %c0_155 = arith.constant 0 : index
    %226 = vector.load %arg4[%c0_153, %c0_154, %c0_155] : memref<2x128x128xbf16, #tpu.memory_space<vmem>>, vector<1x128x128xbf16>
    %227 = vector.shape_cast %226 : vector<1x128x128xbf16> to vector<128x128xbf16>
    %cst_156 = arith.constant dense<0.000000e+00> : vector<16x128xf32>
    %228 = tpu.matmul %225, %227, %cst_156 {dimension_numbers = #tpu.dot_dimension_numbers<[1], [0], [0], [1], [0, 0, 1, 1], [], []>} : vector<16x128xbf16>, vector<128x128xbf16>, vector<16x128xf32> -> vector<16x128xf32>
    %229 = arith.addf %220, %228 : vector<16x128xf32>
    %230 = math.tanh %229 : vector<16x128xf32>
    %c16_157 = arith.constant 16 : index
    %c0_158 = arith.constant 0 : index
    %231 = vector.load %arg10[%c16_157, %c0_158] : memref<32x128xf32, #tpu.memory_space<vmem>>, vector<16x128xf32>
    %232 = arith.truncf %231 : vector<16x128xf32> to vector<16x128xbf16>
    %c0_159 = arith.constant 0 : index
    %c0_160 = arith.constant 0 : index
    %c0_161 = arith.constant 0 : index
    %233 = vector.load %arg4[%c0_159, %c0_160, %c0_161] : memref<2x128x128xbf16, #tpu.memory_space<vmem>>, vector<1x128x128xbf16>
    %234 = vector.shape_cast %233 : vector<1x128x128xbf16> to vector<128x128xbf16>
    %cst_162 = arith.constant dense<0.000000e+00> : vector<16x128xf32>
    %235 = tpu.matmul %232, %234, %cst_162 {dimension_numbers = #tpu.dot_dimension_numbers<[1], [0], [0], [1], [0, 0, 1, 1], [], []>} : vector<16x128xbf16>, vector<128x128xbf16>, vector<16x128xf32> -> vector<16x128xf32>
    %236 = arith.addf %223, %235 : vector<16x128xf32>
    %237 = math.tanh %236 : vector<16x128xf32>
    %c0_163 = arith.constant 0 : index
    %c0_164 = arith.constant 0 : index
    %238 = vector.load %arg10[%c0_163, %c0_164] : memref<32x128xf32, #tpu.memory_space<vmem>>, vector<16x128xf32>
    tpu.vector_store %arg10[%c0_163, %c0_164], %230 {strides = array<i32>} : memref<32x128xf32, #tpu.memory_space<vmem>>, vector<16x128xf32>,
    %c16_165 = arith.constant 16 : index
    %c0_166 = arith.constant 0 : index
    %239 = vector.load %arg10[%c16_165, %c0_166] : memref<32x128xf32, #tpu.memory_space<vmem>>, vector<16x128xf32>
    tpu.vector_store %arg10[%c16_165, %c0_166], %237 {strides = array<i32>} : memref<32x128xf32, #tpu.memory_space<vmem>>, vector<16x128xf32>,
    %240 = arith.truncf %230 : vector<16x128xf32> to vector<16x128xbf16>
    %241 = arith.index_cast %214 : i32 to index
    %c0_167 = arith.constant 0 : index
    %242 = vector.load %arg9[%241, %c0_167] : memref<256x128xbf16, #tpu.memory_space<vmem>>, vector<16x128xbf16>
    tpu.vector_store %arg9[%241, %c0_167], %240 {strides = array<i32>} : memref<256x128xbf16, #tpu.memory_space<vmem>>, vector<16x128xbf16>,
    %243 = arith.truncf %237 : vector<16x128xf32> to vector<16x128xbf16>
    %244 = arith.index_cast %217 : i32 to index
    %c0_168 = arith.constant 0 : index
    %245 = vector.load %arg9[%244, %c0_168] : memref<256x128xbf16, #tpu.memory_space<vmem>>, vector<16x128xbf16>
    tpu.vector_store %arg9[%244, %c0_168], %243 {strides = array<i32>} : memref<256x128xbf16, #tpu.memory_space<vmem>>, vector<16x128xbf16>,
    %c7_i32 = arith.constant 7 : i32
    %c32_i32_169 = arith.constant 32 : i32
    %246 = arith.muli %c7_i32, %c32_i32_169 : i32
    %247 = tpu.assume_multiple %246, 32 : i32
    %c32_i32_170 = arith.constant 32 : i32
    %248 = arith.muli %c7_i32, %c32_i32_170 : i32
    %c16_i32_171 = arith.constant 16 : i32
    %249 = arith.addi %248, %c16_i32_171 : i32
    %250 = tpu.assume_multiple %249, 16 : i32
    %251 = arith.index_cast %247 : i32 to index
    %c0_172 = arith.constant 0 : index
    %252 = vector.load %arg9[%251, %c0_172] : memref<256x128xbf16, #tpu.memory_space<vmem>>, vector<16x128xbf16>
    %253 = arith.extf %252 : vector<16x128xbf16> to vector<16x128xf32>
    %254 = arith.index_cast %250 : i32 to index
    %c0_173 = arith.constant 0 : index
    %255 = vector.load %arg9[%254, %c0_173] : memref<256x128xbf16, #tpu.memory_space<vmem>>, vector<16x128xbf16>
    %256 = arith.extf %255 : vector<16x128xbf16> to vector<16x128xf32>
    %c0_174 = arith.constant 0 : index
    %c0_175 = arith.constant 0 : index
    %257 = vector.load %arg10[%c0_174, %c0_175] : memref<32x128xf32, #tpu.memory_space<vmem>>, vector<16x128xf32>
    %258 = arith.truncf %257 : vector<16x128xf32> to vector<16x128xbf16>
    %c0_176 = arith.constant 0 : index
    %c0_177 = arith.constant 0 : index
    %c0_178 = arith.constant 0 : index
    %259 = vector.load %arg4[%c0_176, %c0_177, %c0_178] : memref<2x128x128xbf16, #tpu.memory_space<vmem>>, vector<1x128x128xbf16>
    %260 = vector.shape_cast %259 : vector<1x128x128xbf16> to vector<128x128xbf16>
    %cst_179 = arith.constant dense<0.000000e+00> : vector<16x128xf32>
    %261 = tpu.matmul %258, %260, %cst_179 {dimension_numbers = #tpu.dot_dimension_numbers<[1], [0], [0], [1], [0, 0, 1, 1], [], []>} : vector<16x128xbf16>, vector<128x128xbf16>, vector<16x128xf32> -> vector<16x128xf32>
    %262 = arith.addf %253, %261 : vector<16x128xf32>
    %263 = math.tanh %262 : vector<16x128xf32>
    %c16_180 = arith.constant 16 : index
    %c0_181 = arith.constant 0 : index
    %264 = vector.load %arg10[%c16_180, %c0_181] : memref<32x128xf32, #tpu.memory_space<vmem>>, vector<16x128xf32>
    %265 = arith.truncf %264 : vector<16x128xf32> to vector<16x128xbf16>
    %c0_182 = arith.constant 0 : index
    %c0_183 = arith.constant 0 : index
    %c0_184 = arith.constant 0 : index
    %266 = vector.load %arg4[%c0_182, %c0_183, %c0_184] : memref<2x128x128xbf16, #tpu.memory_space<vmem>>, vector<1x128x128xbf16>
    %267 = vector.shape_cast %266 : vector<1x128x128xbf16> to vector<128x128xbf16>
    %cst_185 = arith.constant dense<0.000000e+00> : vector<16x128xf32>
    %268 = tpu.matmul %265, %267, %cst_185 {dimension_numbers = #tpu.dot_dimension_numbers<[1], [0], [0], [1], [0, 0, 1, 1], [], []>} : vector<16x128xbf16>, vector<128x128xbf16>, vector<16x128xf32> -> vector<16x128xf32>
    %269 = arith.addf %256, %268 : vector<16x128xf32>
    %270 = math.tanh %269 : vector<16x128xf32>
    %c0_186 = arith.constant 0 : index
    %c0_187 = arith.constant 0 : index
    %271 = vector.load %arg10[%c0_186, %c0_187] : memref<32x128xf32, #tpu.memory_space<vmem>>, vector<16x128xf32>
    tpu.vector_store %arg10[%c0_186, %c0_187], %263 {strides = array<i32>} : memref<32x128xf32, #tpu.memory_space<vmem>>, vector<16x128xf32>,
    %c16_188 = arith.constant 16 : index
    %c0_189 = arith.constant 0 : index
    %272 = vector.load %arg10[%c16_188, %c0_189] : memref<32x128xf32, #tpu.memory_space<vmem>>, vector<16x128xf32>
    tpu.vector_store %arg10[%c16_188, %c0_189], %270 {strides = array<i32>} : memref<32x128xf32, #tpu.memory_space<vmem>>, vector<16x128xf32>,
    %273 = arith.truncf %263 : vector<16x128xf32> to vector<16x128xbf16>
    %274 = arith.index_cast %247 : i32 to index
    %c0_190 = arith.constant 0 : index
    %275 = vector.load %arg9[%274, %c0_190] : memref<256x128xbf16, #tpu.memory_space<vmem>>, vector<16x128xbf16>
    tpu.vector_store %arg9[%274, %c0_190], %273 {strides = array<i32>} : memref<256x128xbf16, #tpu.memory_space<vmem>>, vector<16x128xbf16>,
    %276 = arith.truncf %270 : vector<16x128xf32> to vector<16x128xbf16>
    %277 = arith.index_cast %250 : i32 to index
    %c0_191 = arith.constant 0 : index
    %278 = vector.load %arg9[%277, %c0_191] : memref<256x128xbf16, #tpu.memory_space<vmem>>, vector<16x128xbf16>
    tpu.vector_store %arg9[%277, %c0_191], %276 {strides = array<i32>} : memref<256x128xbf16, #tpu.memory_space<vmem>>, vector<16x128xbf16>,
    %c8_i32 = arith.constant 8 : i32
    %c0_i32_192 = arith.constant 0 : i32
    %c256_i32_193 = arith.constant 256 : i32
    %279 = arith.muli %c0_i32_192, %c256_i32_193 : i32
    %280 = tpu.assume_multiple %279, 256 : i32
    %281 = arith.index_cast %280 : i32 to index
    %c0_194 = arith.constant 0 : index
    %282 = vector.load %arg9[%281, %c0_194] : memref<256x128xbf16, #tpu.memory_space<vmem>>, vector<256x128xbf16>
    %c0_195 = arith.constant 0 : index
    %c0_196 = arith.constant 0 : index
    %c0_197 = arith.constant 0 : index
    %283 = vector.load %arg3[%c0_195, %c0_196, %c0_197] : memref<1x128x128xbf16, #tpu.memory_space<vmem>>, vector<1x128x128xbf16>
    %284 = vector.shape_cast %283 : vector<1x128x128xbf16> to vector<128x128xbf16>
    %cst_198 = arith.constant dense<0.000000e+00> : vector<256x128xf32>
    %285 = tpu.matmul %282, %284, %cst_198 {dimension_numbers = #tpu.dot_dimension_numbers<[1], [0], [0], [1], [0, 0, 1, 1], [], []>} : vector<256x128xbf16>, vector<128x128xbf16>, vector<256x128xf32> -> vector<256x128xf32>
    %c1 = arith.constant 1 : index
    %c0_199 = arith.constant 0 : index
    %c0_200 = arith.constant 0 : index
    %286 = vector.load %arg5[%c1, %c0_199, %c0_200] : memref<2x1x128xf32, #tpu.memory_space<vmem>>, vector<1x1x128xf32>
    %287 = vector.shape_cast %286 : vector<1x1x128xf32> to vector<1x128xf32>
    %288 = vector.broadcast %287 : vector<1x128xf32> to vector<256x128xf32>
    %289 = arith.addf %285, %288 : vector<256x128xf32>
    %290 = arith.truncf %289 : vector<256x128xf32> to vector<256x128xbf16>
    %291 = arith.index_cast %280 : i32 to index
    %c0_201 = arith.constant 0 : index
    %292 = vector.load %arg9[%291, %c0_201] : memref<256x128xbf16, #tpu.memory_space<vmem>>, vector<256x128xbf16>
    tpu.vector_store %arg9[%291, %c0_201], %290 {strides = array<i32>} : memref<256x128xbf16, #tpu.memory_space<vmem>>, vector<256x128xbf16>,
    %c1_i32_202 = arith.constant 1 : i32
    %cst_203 = arith.constant 0.000000e+00 : f32
    %293 = vector.broadcast %cst_203 : f32 to vector<32x128xf32>
    %c0_204 = arith.constant 0 : index
    %c0_205 = arith.constant 0 : index
    %294 = vector.load %arg10[%c0_204, %c0_205] : memref<32x128xf32, #tpu.memory_space<vmem>>, vector<32x128xf32>
    tpu.vector_store %arg10[%c0_204, %c0_205], %293 {strides = array<i32>} : memref<32x128xf32, #tpu.memory_space<vmem>>, vector<32x128xf32>,
    %c0_i32_206 = arith.constant 0 : i32
    %c32_i32_207 = arith.constant 32 : i32
    %295 = arith.muli %c0_i32_206, %c32_i32_207 : i32
    %296 = tpu.assume_multiple %295, 32 : i32
    %c32_i32_208 = arith.constant 32 : i32
    %297 = arith.muli %c0_i32_206, %c32_i32_208 : i32
    %c16_i32_209 = arith.constant 16 : i32
    %298 = arith.addi %297, %c16_i32_209 : i32
    %299 = tpu.assume_multiple %298, 16 : i32
    %300 = arith.index_cast %296 : i32 to index
    %c0_210 = arith.constant 0 : index
    %301 = vector.load %arg9[%300, %c0_210] : memref<256x128xbf16, #tpu.memory_space<vmem>>, vector<16x128xbf16>
    %302 = arith.extf %301 : vector<16x128xbf16> to vector<16x128xf32>
    %303 = arith.index_cast %299 : i32 to index
    %c0_211 = arith.constant 0 : index
    %304 = vector.load %arg9[%303, %c0_211] : memref<256x128xbf16, #tpu.memory_space<vmem>>, vector<16x128xbf16>
    %305 = arith.extf %304 : vector<16x128xbf16> to vector<16x128xf32>
    %c0_212 = arith.constant 0 : index
    %c0_213 = arith.constant 0 : index
    %306 = vector.load %arg10[%c0_212, %c0_213] : memref<32x128xf32, #tpu.memory_space<vmem>>, vector<16x128xf32>
    %307 = arith.truncf %306 : vector<16x128xf32> to vector<16x128xbf16>
    %c1_214 = arith.constant 1 : index
    %c0_215 = arith.constant 0 : index
    %c0_216 = arith.constant 0 : index
    %308 = vector.load %arg4[%c1_214, %c0_215, %c0_216] : memref<2x128x128xbf16, #tpu.memory_space<vmem>>, vector<1x128x128xbf16>
    %309 = vector.shape_cast %308 : vector<1x128x128xbf16> to vector<128x128xbf16>
    %cst_217 = arith.constant dense<0.000000e+00> : vector<16x128xf32>
    %310 = tpu.matmul %307, %309, %cst_217 {dimension_numbers = #tpu.dot_dimension_numbers<[1], [0], [0], [1], [0, 0, 1, 1], [], []>} : vector<16x128xbf16>, vector<128x128xbf16>, vector<16x128xf32> -> vector<16x128xf32>
    %311 = arith.addf %302, %310 : vector<16x128xf32>
    %312 = math.tanh %311 : vector<16x128xf32>
    %c16_218 = arith.constant 16 : index
    %c0_219 = arith.constant 0 : index
    %313 = vector.load %arg10[%c16_218, %c0_219] : memref<32x128xf32, #tpu.memory_space<vmem>>, vector<16x128xf32>
    %314 = arith.truncf %313 : vector<16x128xf32> to vector<16x128xbf16>
    %c1_220 = arith.constant 1 : index
    %c0_221 = arith.constant 0 : index
    %c0_222 = arith.constant 0 : index
    %315 = vector.load %arg4[%c1_220, %c0_221, %c0_222] : memref<2x128x128xbf16, #tpu.memory_space<vmem>>, vector<1x128x128xbf16>
    %316 = vector.shape_cast %315 : vector<1x128x128xbf16> to vector<128x128xbf16>
    %cst_223 = arith.constant dense<0.000000e+00> : vector<16x128xf32>
    %317 = tpu.matmul %314, %316, %cst_223 {dimension_numbers = #tpu.dot_dimension_numbers<[1], [0], [0], [1], [0, 0, 1, 1], [], []>} : vector<16x128xbf16>, vector<128x128xbf16>, vector<16x128xf32> -> vector<16x128xf32>
    %318 = arith.addf %305, %317 : vector<16x128xf32>
    %319 = math.tanh %318 : vector<16x128xf32>
    %c0_224 = arith.constant 0 : index
    %c0_225 = arith.constant 0 : index
    %320 = vector.load %arg10[%c0_224, %c0_225] : memref<32x128xf32, #tpu.memory_space<vmem>>, vector<16x128xf32>
    tpu.vector_store %arg10[%c0_224, %c0_225], %312 {strides = array<i32>} : memref<32x128xf32, #tpu.memory_space<vmem>>, vector<16x128xf32>,
    %c16_226 = arith.constant 16 : index
    %c0_227 = arith.constant 0 : index
    %321 = vector.load %arg10[%c16_226, %c0_227] : memref<32x128xf32, #tpu.memory_space<vmem>>, vector<16x128xf32>
    tpu.vector_store %arg10[%c16_226, %c0_227], %319 {strides = array<i32>} : memref<32x128xf32, #tpu.memory_space<vmem>>, vector<16x128xf32>,
    %c1_i32_228 = arith.constant 1 : i32
    %c32_i32_229 = arith.constant 32 : i32
    %322 = arith.muli %c1_i32_228, %c32_i32_229 : i32
    %323 = tpu.assume_multiple %322, 32 : i32
    %c32_i32_230 = arith.constant 32 : i32
    %324 = arith.muli %c1_i32_228, %c32_i32_230 : i32
    %c16_i32_231 = arith.constant 16 : i32
    %325 = arith.addi %324, %c16_i32_231 : i32
    %326 = tpu.assume_multiple %325, 16 : i32
    %327 = arith.index_cast %323 : i32 to index
    %c0_232 = arith.constant 0 : index
    %328 = vector.load %arg9[%327, %c0_232] : memref<256x128xbf16, #tpu.memory_space<vmem>>, vector<16x128xbf16>
    %329 = arith.extf %328 : vector<16x128xbf16> to vector<16x128xf32>
    %330 = arith.index_cast %326 : i32 to index
    %c0_233 = arith.constant 0 : index
    %331 = vector.load %arg9[%330, %c0_233] : memref<256x128xbf16, #tpu.memory_space<vmem>>, vector<16x128xbf16>
    %332 = arith.extf %331 : vector<16x128xbf16> to vector<16x128xf32>
    %c0_234 = arith.constant 0 : index
    %c0_235 = arith.constant 0 : index
    %333 = vector.load %arg10[%c0_234, %c0_235] : memref<32x128xf32, #tpu.memory_space<vmem>>, vector<16x128xf32>
    %334 = arith.truncf %333 : vector<16x128xf32> to vector<16x128xbf16>
    %c1_236 = arith.constant 1 : index
    %c0_237 = arith.constant 0 : index
    %c0_238 = arith.constant 0 : index
    %335 = vector.load %arg4[%c1_236, %c0_237, %c0_238] : memref<2x128x128xbf16, #tpu.memory_space<vmem>>, vector<1x128x128xbf16>
    %336 = vector.shape_cast %335 : vector<1x128x128xbf16> to vector<128x128xbf16>
    %cst_239 = arith.constant dense<0.000000e+00> : vector<16x128xf32>
    %337 = tpu.matmul %334, %336, %cst_239 {dimension_numbers = #tpu.dot_dimension_numbers<[1], [0], [0], [1], [0, 0, 1, 1], [], []>} : vector<16x128xbf16>, vector<128x128xbf16>, vector<16x128xf32> -> vector<16x128xf32>
    %338 = arith.addf %329, %337 : vector<16x128xf32>
    %339 = math.tanh %338 : vector<16x128xf32>
    %c16_240 = arith.constant 16 : index
    %c0_241 = arith.constant 0 : index
    %340 = vector.load %arg10[%c16_240, %c0_241] : memref<32x128xf32, #tpu.memory_space<vmem>>, vector<16x128xf32>
    %341 = arith.truncf %340 : vector<16x128xf32> to vector<16x128xbf16>
    %c1_242 = arith.constant 1 : index
    %c0_243 = arith.constant 0 : index
    %c0_244 = arith.constant 0 : index
    %342 = vector.load %arg4[%c1_242, %c0_243, %c0_244] : memref<2x128x128xbf16, #tpu.memory_space<vmem>>, vector<1x128x128xbf16>
    %343 = vector.shape_cast %342 : vector<1x128x128xbf16> to vector<128x128xbf16>
    %cst_245 = arith.constant dense<0.000000e+00> : vector<16x128xf32>
    %344 = tpu.matmul %341, %343, %cst_245 {dimension_numbers = #tpu.dot_dimension_numbers<[1], [0], [0], [1], [0, 0, 1, 1], [], []>} : vector<16x128xbf16>, vector<128x128xbf16>, vector<16x128xf32> -> vector<16x128xf32>
    %345 = arith.addf %332, %344 : vector<16x128xf32>
    %346 = math.tanh %345 : vector<16x128xf32>
    %c0_246 = arith.constant 0 : index
    %c0_247 = arith.constant 0 : index
    %347 = vector.load %arg10[%c0_246, %c0_247] : memref<32x128xf32, #tpu.memory_space<vmem>>, vector<16x128xf32>
    tpu.vector_store %arg10[%c0_246, %c0_247], %339 {strides = array<i32>} : memref<32x128xf32, #tpu.memory_space<vmem>>, vector<16x128xf32>,
    %c16_248 = arith.constant 16 : index
    %c0_249 = arith.constant 0 : index
    %348 = vector.load %arg10[%c16_248, %c0_249] : memref<32x128xf32, #tpu.memory_space<vmem>>, vector<16x128xf32>
    tpu.vector_store %arg10[%c16_248, %c0_249], %346 {strides = array<i32>} : memref<32x128xf32, #tpu.memory_space<vmem>>, vector<16x128xf32>,
    %c2_i32_250 = arith.constant 2 : i32
    %c32_i32_251 = arith.constant 32 : i32
    %349 = arith.muli %c2_i32_250, %c32_i32_251 : i32
    %350 = tpu.assume_multiple %349, 32 : i32
    %c32_i32_252 = arith.constant 32 : i32
    %351 = arith.muli %c2_i32_250, %c32_i32_252 : i32
    %c16_i32_253 = arith.constant 16 : i32
    %352 = arith.addi %351, %c16_i32_253 : i32
    %353 = tpu.assume_multiple %352, 16 : i32
    %354 = arith.index_cast %350 : i32 to index
    %c0_254 = arith.constant 0 : index
    %355 = vector.load %arg9[%354, %c0_254] : memref<256x128xbf16, #tpu.memory_space<vmem>>, vector<16x128xbf16>
    %356 = arith.extf %355 : vector<16x128xbf16> to vector<16x128xf32>
    %357 = arith.index_cast %353 : i32 to index
    %c0_255 = arith.constant 0 : index
    %358 = vector.load %arg9[%357, %c0_255] : memref<256x128xbf16, #tpu.memory_space<vmem>>, vector<16x128xbf16>
    %359 = arith.extf %358 : vector<16x128xbf16> to vector<16x128xf32>
    %c0_256 = arith.constant 0 : index
    %c0_257 = arith.constant 0 : index
    %360 = vector.load %arg10[%c0_256, %c0_257] : memref<32x128xf32, #tpu.memory_space<vmem>>, vector<16x128xf32>
    %361 = arith.truncf %360 : vector<16x128xf32> to vector<16x128xbf16>
    %c1_258 = arith.constant 1 : index
    %c0_259 = arith.constant 0 : index
    %c0_260 = arith.constant 0 : index
    %362 = vector.load %arg4[%c1_258, %c0_259, %c0_260] : memref<2x128x128xbf16, #tpu.memory_space<vmem>>, vector<1x128x128xbf16>
    %363 = vector.shape_cast %362 : vector<1x128x128xbf16> to vector<128x128xbf16>
    %cst_261 = arith.constant dense<0.000000e+00> : vector<16x128xf32>
    %364 = tpu.matmul %361, %363, %cst_261 {dimension_numbers = #tpu.dot_dimension_numbers<[1], [0], [0], [1], [0, 0, 1, 1], [], []>} : vector<16x128xbf16>, vector<128x128xbf16>, vector<16x128xf32> -> vector<16x128xf32>
    %365 = arith.addf %356, %364 : vector<16x128xf32>
    %366 = math.tanh %365 : vector<16x128xf32>
    %c16_262 = arith.constant 16 : index
    %c0_263 = arith.constant 0 : index
    %367 = vector.load %arg10[%c16_262, %c0_263] : memref<32x128xf32, #tpu.memory_space<vmem>>, vector<16x128xf32>
    %368 = arith.truncf %367 : vector<16x128xf32> to vector<16x128xbf16>
    %c1_264 = arith.constant 1 : index
    %c0_265 = arith.constant 0 : index
    %c0_266 = arith.constant 0 : index
    %369 = vector.load %arg4[%c1_264, %c0_265, %c0_266] : memref<2x128x128xbf16, #tpu.memory_space<vmem>>, vector<1x128x128xbf16>
    %370 = vector.shape_cast %369 : vector<1x128x128xbf16> to vector<128x128xbf16>
    %cst_267 = arith.constant dense<0.000000e+00> : vector<16x128xf32>
    %371 = tpu.matmul %368, %370, %cst_267 {dimension_numbers = #tpu.dot_dimension_numbers<[1], [0], [0], [1], [0, 0, 1, 1], [], []>} : vector<16x128xbf16>, vector<128x128xbf16>, vector<16x128xf32> -> vector<16x128xf32>
    %372 = arith.addf %359, %371 : vector<16x128xf32>
    %373 = math.tanh %372 : vector<16x128xf32>
    %c0_268 = arith.constant 0 : index
    %c0_269 = arith.constant 0 : index
    %374 = vector.load %arg10[%c0_268, %c0_269] : memref<32x128xf32, #tpu.memory_space<vmem>>, vector<16x128xf32>
    tpu.vector_store %arg10[%c0_268, %c0_269], %366 {strides = array<i32>} : memref<32x128xf32, #tpu.memory_space<vmem>>, vector<16x128xf32>,
    %c16_270 = arith.constant 16 : index
    %c0_271 = arith.constant 0 : index
    %375 = vector.load %arg10[%c16_270, %c0_271] : memref<32x128xf32, #tpu.memory_space<vmem>>, vector<16x128xf32>
    tpu.vector_store %arg10[%c16_270, %c0_271], %373 {strides = array<i32>} : memref<32x128xf32, #tpu.memory_space<vmem>>, vector<16x128xf32>,
    %c3_i32_272 = arith.constant 3 : i32
    %c32_i32_273 = arith.constant 32 : i32
    %376 = arith.muli %c3_i32_272, %c32_i32_273 : i32
    %377 = tpu.assume_multiple %376, 32 : i32
    %c32_i32_274 = arith.constant 32 : i32
    %378 = arith.muli %c3_i32_272, %c32_i32_274 : i32
    %c16_i32_275 = arith.constant 16 : i32
    %379 = arith.addi %378, %c16_i32_275 : i32
    %380 = tpu.assume_multiple %379, 16 : i32
    %381 = arith.index_cast %377 : i32 to index
    %c0_276 = arith.constant 0 : index
    %382 = vector.load %arg9[%381, %c0_276] : memref<256x128xbf16, #tpu.memory_space<vmem>>, vector<16x128xbf16>
    %383 = arith.extf %382 : vector<16x128xbf16> to vector<16x128xf32>
    %384 = arith.index_cast %380 : i32 to index
    %c0_277 = arith.constant 0 : index
    %385 = vector.load %arg9[%384, %c0_277] : memref<256x128xbf16, #tpu.memory_space<vmem>>, vector<16x128xbf16>
    %386 = arith.extf %385 : vector<16x128xbf16> to vector<16x128xf32>
    %c0_278 = arith.constant 0 : index
    %c0_279 = arith.constant 0 : index
    %387 = vector.load %arg10[%c0_278, %c0_279] : memref<32x128xf32, #tpu.memory_space<vmem>>, vector<16x128xf32>
    %388 = arith.truncf %387 : vector<16x128xf32> to vector<16x128xbf16>
    %c1_280 = arith.constant 1 : index
    %c0_281 = arith.constant 0 : index
    %c0_282 = arith.constant 0 : index
    %389 = vector.load %arg4[%c1_280, %c0_281, %c0_282] : memref<2x128x128xbf16, #tpu.memory_space<vmem>>, vector<1x128x128xbf16>
    %390 = vector.shape_cast %389 : vector<1x128x128xbf16> to vector<128x128xbf16>
    %cst_283 = arith.constant dense<0.000000e+00> : vector<16x128xf32>
    %391 = tpu.matmul %388, %390, %cst_283 {dimension_numbers = #tpu.dot_dimension_numbers<[1], [0], [0], [1], [0, 0, 1, 1], [], []>} : vector<16x128xbf16>, vector<128x128xbf16>, vector<16x128xf32> -> vector<16x128xf32>
    %392 = arith.addf %383, %391 : vector<16x128xf32>
    %393 = math.tanh %392 : vector<16x128xf32>
    %c16_284 = arith.constant 16 : index
    %c0_285 = arith.constant 0 : index
    %394 = vector.load %arg10[%c16_284, %c0_285] : memref<32x128xf32, #tpu.memory_space<vmem>>, vector<16x128xf32>
    %395 = arith.truncf %394 : vector<16x128xf32> to vector<16x128xbf16>
    %c1_286 = arith.constant 1 : index
    %c0_287 = arith.constant 0 : index
    %c0_288 = arith.constant 0 : index
    %396 = vector.load %arg4[%c1_286, %c0_287, %c0_288] : memref<2x128x128xbf16, #tpu.memory_space<vmem>>, vector<1x128x128xbf16>
    %397 = vector.shape_cast %396 : vector<1x128x128xbf16> to vector<128x128xbf16>
    %cst_289 = arith.constant dense<0.000000e+00> : vector<16x128xf32>
    %398 = tpu.matmul %395, %397, %cst_289 {dimension_numbers = #tpu.dot_dimension_numbers<[1], [0], [0], [1], [0, 0, 1, 1], [], []>} : vector<16x128xbf16>, vector<128x128xbf16>, vector<16x128xf32> -> vector<16x128xf32>
    %399 = arith.addf %386, %398 : vector<16x128xf32>
    %400 = math.tanh %399 : vector<16x128xf32>
    %c0_290 = arith.constant 0 : index
    %c0_291 = arith.constant 0 : index
    %401 = vector.load %arg10[%c0_290, %c0_291] : memref<32x128xf32, #tpu.memory_space<vmem>>, vector<16x128xf32>
    tpu.vector_store %arg10[%c0_290, %c0_291], %393 {strides = array<i32>} : memref<32x128xf32, #tpu.memory_space<vmem>>, vector<16x128xf32>,
    %c16_292 = arith.constant 16 : index
    %c0_293 = arith.constant 0 : index
    %402 = vector.load %arg10[%c16_292, %c0_293] : memref<32x128xf32, #tpu.memory_space<vmem>>, vector<16x128xf32>
    tpu.vector_store %arg10[%c16_292, %c0_293], %400 {strides = array<i32>} : memref<32x128xf32, #tpu.memory_space<vmem>>, vector<16x128xf32>,
    %c4_i32_294 = arith.constant 4 : i32
    %c32_i32_295 = arith.constant 32 : i32
    %403 = arith.muli %c4_i32_294, %c32_i32_295 : i32
    %404 = tpu.assume_multiple %403, 32 : i32
    %c32_i32_296 = arith.constant 32 : i32
    %405 = arith.muli %c4_i32_294, %c32_i32_296 : i32
    %c16_i32_297 = arith.constant 16 : i32
    %406 = arith.addi %405, %c16_i32_297 : i32
    %407 = tpu.assume_multiple %406, 16 : i32
    %408 = arith.index_cast %404 : i32 to index
    %c0_298 = arith.constant 0 : index
    %409 = vector.load %arg9[%408, %c0_298] : memref<256x128xbf16, #tpu.memory_space<vmem>>, vector<16x128xbf16>
    %410 = arith.extf %409 : vector<16x128xbf16> to vector<16x128xf32>
    %411 = arith.index_cast %407 : i32 to index
    %c0_299 = arith.constant 0 : index
    %412 = vector.load %arg9[%411, %c0_299] : memref<256x128xbf16, #tpu.memory_space<vmem>>, vector<16x128xbf16>
    %413 = arith.extf %412 : vector<16x128xbf16> to vector<16x128xf32>
    %c0_300 = arith.constant 0 : index
    %c0_301 = arith.constant 0 : index
    %414 = vector.load %arg10[%c0_300, %c0_301] : memref<32x128xf32, #tpu.memory_space<vmem>>, vector<16x128xf32>
    %415 = arith.truncf %414 : vector<16x128xf32> to vector<16x128xbf16>
    %c1_302 = arith.constant 1 : index
    %c0_303 = arith.constant 0 : index
    %c0_304 = arith.constant 0 : index
    %416 = vector.load %arg4[%c1_302, %c0_303, %c0_304] : memref<2x128x128xbf16, #tpu.memory_space<vmem>>, vector<1x128x128xbf16>
    %417 = vector.shape_cast %416 : vector<1x128x128xbf16> to vector<128x128xbf16>
    %cst_305 = arith.constant dense<0.000000e+00> : vector<16x128xf32>
    %418 = tpu.matmul %415, %417, %cst_305 {dimension_numbers = #tpu.dot_dimension_numbers<[1], [0], [0], [1], [0, 0, 1, 1], [], []>} : vector<16x128xbf16>, vector<128x128xbf16>, vector<16x128xf32> -> vector<16x128xf32>
    %419 = arith.addf %410, %418 : vector<16x128xf32>
    %420 = math.tanh %419 : vector<16x128xf32>
    %c16_306 = arith.constant 16 : index
    %c0_307 = arith.constant 0 : index
    %421 = vector.load %arg10[%c16_306, %c0_307] : memref<32x128xf32, #tpu.memory_space<vmem>>, vector<16x128xf32>
    %422 = arith.truncf %421 : vector<16x128xf32> to vector<16x128xbf16>
    %c1_308 = arith.constant 1 : index
    %c0_309 = arith.constant 0 : index
    %c0_310 = arith.constant 0 : index
    %423 = vector.load %arg4[%c1_308, %c0_309, %c0_310] : memref<2x128x128xbf16, #tpu.memory_space<vmem>>, vector<1x128x128xbf16>
    %424 = vector.shape_cast %423 : vector<1x128x128xbf16> to vector<128x128xbf16>
    %cst_311 = arith.constant dense<0.000000e+00> : vector<16x128xf32>
    %425 = tpu.matmul %422, %424, %cst_311 {dimension_numbers = #tpu.dot_dimension_numbers<[1], [0], [0], [1], [0, 0, 1, 1], [], []>} : vector<16x128xbf16>, vector<128x128xbf16>, vector<16x128xf32> -> vector<16x128xf32>
    %426 = arith.addf %413, %425 : vector<16x128xf32>
    %427 = math.tanh %426 : vector<16x128xf32>
    %c0_312 = arith.constant 0 : index
    %c0_313 = arith.constant 0 : index
    %428 = vector.load %arg10[%c0_312, %c0_313] : memref<32x128xf32, #tpu.memory_space<vmem>>, vector<16x128xf32>
    tpu.vector_store %arg10[%c0_312, %c0_313], %420 {strides = array<i32>} : memref<32x128xf32, #tpu.memory_space<vmem>>, vector<16x128xf32>,
    %c16_314 = arith.constant 16 : index
    %c0_315 = arith.constant 0 : index
    %429 = vector.load %arg10[%c16_314, %c0_315] : memref<32x128xf32, #tpu.memory_space<vmem>>, vector<16x128xf32>
    tpu.vector_store %arg10[%c16_314, %c0_315], %427 {strides = array<i32>} : memref<32x128xf32, #tpu.memory_space<vmem>>, vector<16x128xf32>,
    %c5_i32_316 = arith.constant 5 : i32
    %c32_i32_317 = arith.constant 32 : i32
    %430 = arith.muli %c5_i32_316, %c32_i32_317 : i32
    %431 = tpu.assume_multiple %430, 32 : i32
    %c32_i32_318 = arith.constant 32 : i32
    %432 = arith.muli %c5_i32_316, %c32_i32_318 : i32
    %c16_i32_319 = arith.constant 16 : i32
    %433 = arith.addi %432, %c16_i32_319 : i32
    %434 = tpu.assume_multiple %433, 16 : i32
    %435 = arith.index_cast %431 : i32 to index
    %c0_320 = arith.constant 0 : index
    %436 = vector.load %arg9[%435, %c0_320] : memref<256x128xbf16, #tpu.memory_space<vmem>>, vector<16x128xbf16>
    %437 = arith.extf %436 : vector<16x128xbf16> to vector<16x128xf32>
    %438 = arith.index_cast %434 : i32 to index
    %c0_321 = arith.constant 0 : index
    %439 = vector.load %arg9[%438, %c0_321] : memref<256x128xbf16, #tpu.memory_space<vmem>>, vector<16x128xbf16>
    %440 = arith.extf %439 : vector<16x128xbf16> to vector<16x128xf32>
    %c0_322 = arith.constant 0 : index
    %c0_323 = arith.constant 0 : index
    %441 = vector.load %arg10[%c0_322, %c0_323] : memref<32x128xf32, #tpu.memory_space<vmem>>, vector<16x128xf32>
    %442 = arith.truncf %441 : vector<16x128xf32> to vector<16x128xbf16>
    %c1_324 = arith.constant 1 : index
    %c0_325 = arith.constant 0 : index
    %c0_326 = arith.constant 0 : index
    %443 = vector.load %arg4[%c1_324, %c0_325, %c0_326] : memref<2x128x128xbf16, #tpu.memory_space<vmem>>, vector<1x128x128xbf16>
    %444 = vector.shape_cast %443 : vector<1x128x128xbf16> to vector<128x128xbf16>
    %cst_327 = arith.constant dense<0.000000e+00> : vector<16x128xf32>
    %445 = tpu.matmul %442, %444, %cst_327 {dimension_numbers = #tpu.dot_dimension_numbers<[1], [0], [0], [1], [0, 0, 1, 1], [], []>} : vector<16x128xbf16>, vector<128x128xbf16>, vector<16x128xf32> -> vector<16x128xf32>
    %446 = arith.addf %437, %445 : vector<16x128xf32>
    %447 = math.tanh %446 : vector<16x128xf32>
    %c16_328 = arith.constant 16 : index
    %c0_329 = arith.constant 0 : index
    %448 = vector.load %arg10[%c16_328, %c0_329] : memref<32x128xf32, #tpu.memory_space<vmem>>, vector<16x128xf32>
    %449 = arith.truncf %448 : vector<16x128xf32> to vector<16x128xbf16>
    %c1_330 = arith.constant 1 : index
    %c0_331 = arith.constant 0 : index
    %c0_332 = arith.constant 0 : index
    %450 = vector.load %arg4[%c1_330, %c0_331, %c0_332] : memref<2x128x128xbf16, #tpu.memory_space<vmem>>, vector<1x128x128xbf16>
    %451 = vector.shape_cast %450 : vector<1x128x128xbf16> to vector<128x128xbf16>
    %cst_333 = arith.constant dense<0.000000e+00> : vector<16x128xf32>
    %452 = tpu.matmul %449, %451, %cst_333 {dimension_numbers = #tpu.dot_dimension_numbers<[1], [0], [0], [1], [0, 0, 1, 1], [], []>} : vector<16x128xbf16>, vector<128x128xbf16>, vector<16x128xf32> -> vector<16x128xf32>
    %453 = arith.addf %440, %452 : vector<16x128xf32>
    %454 = math.tanh %453 : vector<16x128xf32>
    %c0_334 = arith.constant 0 : index
    %c0_335 = arith.constant 0 : index
    %455 = vector.load %arg10[%c0_334, %c0_335] : memref<32x128xf32, #tpu.memory_space<vmem>>, vector<16x128xf32>
    tpu.vector_store %arg10[%c0_334, %c0_335], %447 {strides = array<i32>} : memref<32x128xf32, #tpu.memory_space<vmem>>, vector<16x128xf32>,
    %c16_336 = arith.constant 16 : index
    %c0_337 = arith.constant 0 : index
    %456 = vector.load %arg10[%c16_336, %c0_337] : memref<32x128xf32, #tpu.memory_space<vmem>>, vector<16x128xf32>
    tpu.vector_store %arg10[%c16_336, %c0_337], %454 {strides = array<i32>} : memref<32x128xf32, #tpu.memory_space<vmem>>, vector<16x128xf32>,
    %c6_i32_338 = arith.constant 6 : i32
    %c32_i32_339 = arith.constant 32 : i32
    %457 = arith.muli %c6_i32_338, %c32_i32_339 : i32
    %458 = tpu.assume_multiple %457, 32 : i32
    %c32_i32_340 = arith.constant 32 : i32
    %459 = arith.muli %c6_i32_338, %c32_i32_340 : i32
    %c16_i32_341 = arith.constant 16 : i32
    %460 = arith.addi %459, %c16_i32_341 : i32
    %461 = tpu.assume_multiple %460, 16 : i32
    %462 = arith.index_cast %458 : i32 to index
    %c0_342 = arith.constant 0 : index
    %463 = vector.load %arg9[%462, %c0_342] : memref<256x128xbf16, #tpu.memory_space<vmem>>, vector<16x128xbf16>
    %464 = arith.extf %463 : vector<16x128xbf16> to vector<16x128xf32>
    %465 = arith.index_cast %461 : i32 to index
    %c0_343 = arith.constant 0 : index
    %466 = vector.load %arg9[%465, %c0_343] : memref<256x128xbf16, #tpu.memory_space<vmem>>, vector<16x128xbf16>
    %467 = arith.extf %466 : vector<16x128xbf16> to vector<16x128xf32>
    %c0_344 = arith.constant 0 : index
    %c0_345 = arith.constant 0 : index
    %468 = vector.load %arg10[%c0_344, %c0_345] : memref<32x128xf32, #tpu.memory_space<vmem>>, vector<16x128xf32>
    %469 = arith.truncf %468 : vector<16x128xf32> to vector<16x128xbf16>
    %c1_346 = arith.constant 1 : index
    %c0_347 = arith.constant 0 : index
    %c0_348 = arith.constant 0 : index
    %470 = vector.load %arg4[%c1_346, %c0_347, %c0_348] : memref<2x128x128xbf16, #tpu.memory_space<vmem>>, vector<1x128x128xbf16>
    %471 = vector.shape_cast %470 : vector<1x128x128xbf16> to vector<128x128xbf16>
    %cst_349 = arith.constant dense<0.000000e+00> : vector<16x128xf32>
    %472 = tpu.matmul %469, %471, %cst_349 {dimension_numbers = #tpu.dot_dimension_numbers<[1], [0], [0], [1], [0, 0, 1, 1], [], []>} : vector<16x128xbf16>, vector<128x128xbf16>, vector<16x128xf32> -> vector<16x128xf32>
    %473 = arith.addf %464, %472 : vector<16x128xf32>
    %474 = math.tanh %473 : vector<16x128xf32>
    %c16_350 = arith.constant 16 : index
    %c0_351 = arith.constant 0 : index
    %475 = vector.load %arg10[%c16_350, %c0_351] : memref<32x128xf32, #tpu.memory_space<vmem>>, vector<16x128xf32>
    %476 = arith.truncf %475 : vector<16x128xf32> to vector<16x128xbf16>
    %c1_352 = arith.constant 1 : index
    %c0_353 = arith.constant 0 : index
    %c0_354 = arith.constant 0 : index
    %477 = vector.load %arg4[%c1_352, %c0_353, %c0_354] : memref<2x128x128xbf16, #tpu.memory_space<vmem>>, vector<1x128x128xbf16>
    %478 = vector.shape_cast %477 : vector<1x128x128xbf16> to vector<128x128xbf16>
    %cst_355 = arith.constant dense<0.000000e+00> : vector<16x128xf32>
    %479 = tpu.matmul %476, %478, %cst_355 {dimension_numbers = #tpu.dot_dimension_numbers<[1], [0], [0], [1], [0, 0, 1, 1], [], []>} : vector<16x128xbf16>, vector<128x128xbf16>, vector<16x128xf32> -> vector<16x128xf32>
    %480 = arith.addf %467, %479 : vector<16x128xf32>
    %481 = math.tanh %480 : vector<16x128xf32>
    %c0_356 = arith.constant 0 : index
    %c0_357 = arith.constant 0 : index
    %482 = vector.load %arg10[%c0_356, %c0_357] : memref<32x128xf32, #tpu.memory_space<vmem>>, vector<16x128xf32>
    tpu.vector_store %arg10[%c0_356, %c0_357], %474 {strides = array<i32>} : memref<32x128xf32, #tpu.memory_space<vmem>>, vector<16x128xf32>,
    %c16_358 = arith.constant 16 : index
    %c0_359 = arith.constant 0 : index
    %483 = vector.load %arg10[%c16_358, %c0_359] : memref<32x128xf32, #tpu.memory_space<vmem>>, vector<16x128xf32>
    tpu.vector_store %arg10[%c16_358, %c0_359], %481 {strides = array<i32>} : memref<32x128xf32, #tpu.memory_space<vmem>>, vector<16x128xf32>,
    %c7_i32_360 = arith.constant 7 : i32
    %c32_i32_361 = arith.constant 32 : i32
    %484 = arith.muli %c7_i32_360, %c32_i32_361 : i32
    %485 = tpu.assume_multiple %484, 32 : i32
    %c32_i32_362 = arith.constant 32 : i32
    %486 = arith.muli %c7_i32_360, %c32_i32_362 : i32
    %c16_i32_363 = arith.constant 16 : i32
    %487 = arith.addi %486, %c16_i32_363 : i32
    %488 = tpu.assume_multiple %487, 16 : i32
    %489 = arith.index_cast %485 : i32 to index
    %c0_364 = arith.constant 0 : index
    %490 = vector.load %arg9[%489, %c0_364] : memref<256x128xbf16, #tpu.memory_space<vmem>>, vector<16x128xbf16>
    %491 = arith.extf %490 : vector<16x128xbf16> to vector<16x128xf32>
    %492 = arith.index_cast %488 : i32 to index
    %c0_365 = arith.constant 0 : index
    %493 = vector.load %arg9[%492, %c0_365] : memref<256x128xbf16, #tpu.memory_space<vmem>>, vector<16x128xbf16>
    %494 = arith.extf %493 : vector<16x128xbf16> to vector<16x128xf32>
    %c0_366 = arith.constant 0 : index
    %c0_367 = arith.constant 0 : index
    %495 = vector.load %arg10[%c0_366, %c0_367] : memref<32x128xf32, #tpu.memory_space<vmem>>, vector<16x128xf32>
    %496 = arith.truncf %495 : vector<16x128xf32> to vector<16x128xbf16>
    %c1_368 = arith.constant 1 : index
    %c0_369 = arith.constant 0 : index
    %c0_370 = arith.constant 0 : index
    %497 = vector.load %arg4[%c1_368, %c0_369, %c0_370] : memref<2x128x128xbf16, #tpu.memory_space<vmem>>, vector<1x128x128xbf16>
    %498 = vector.shape_cast %497 : vector<1x128x128xbf16> to vector<128x128xbf16>
    %cst_371 = arith.constant dense<0.000000e+00> : vector<16x128xf32>
    %499 = tpu.matmul %496, %498, %cst_371 {dimension_numbers = #tpu.dot_dimension_numbers<[1], [0], [0], [1], [0, 0, 1, 1], [], []>} : vector<16x128xbf16>, vector<128x128xbf16>, vector<16x128xf32> -> vector<16x128xf32>
    %500 = arith.addf %491, %499 : vector<16x128xf32>
    %501 = math.tanh %500 : vector<16x128xf32>
    %c16_372 = arith.constant 16 : index
    %c0_373 = arith.constant 0 : index
    %502 = vector.load %arg10[%c16_372, %c0_373] : memref<32x128xf32, #tpu.memory_space<vmem>>, vector<16x128xf32>
    %503 = arith.truncf %502 : vector<16x128xf32> to vector<16x128xbf16>
    %c1_374 = arith.constant 1 : index
    %c0_375 = arith.constant 0 : index
    %c0_376 = arith.constant 0 : index
    %504 = vector.load %arg4[%c1_374, %c0_375, %c0_376] : memref<2x128x128xbf16, #tpu.memory_space<vmem>>, vector<1x128x128xbf16>
    %505 = vector.shape_cast %504 : vector<1x128x128xbf16> to vector<128x128xbf16>
    %cst_377 = arith.constant dense<0.000000e+00> : vector<16x128xf32>
    %506 = tpu.matmul %503, %505, %cst_377 {dimension_numbers = #tpu.dot_dimension_numbers<[1], [0], [0], [1], [0, 0, 1, 1], [], []>} : vector<16x128xbf16>, vector<128x128xbf16>, vector<16x128xf32> -> vector<16x128xf32>
    %507 = arith.addf %494, %506 : vector<16x128xf32>
    %508 = math.tanh %507 : vector<16x128xf32>
    %c0_378 = arith.constant 0 : index
    %c0_379 = arith.constant 0 : index
    %509 = vector.load %arg10[%c0_378, %c0_379] : memref<32x128xf32, #tpu.memory_space<vmem>>, vector<16x128xf32>
    tpu.vector_store %arg10[%c0_378, %c0_379], %501 {strides = array<i32>} : memref<32x128xf32, #tpu.memory_space<vmem>>, vector<16x128xf32>,
    %c16_380 = arith.constant 16 : index
    %c0_381 = arith.constant 0 : index
    %510 = vector.load %arg10[%c16_380, %c0_381] : memref<32x128xf32, #tpu.memory_space<vmem>>, vector<16x128xf32>
    tpu.vector_store %arg10[%c16_380, %c0_381], %508 {strides = array<i32>} : memref<32x128xf32, #tpu.memory_space<vmem>>, vector<16x128xf32>,
    %c8_i32_382 = arith.constant 8 : i32
    %c0_383 = arith.constant 0 : index
    %c0_384 = arith.constant 0 : index
    %511 = vector.load %arg10[%c0_383, %c0_384] : memref<32x128xf32, #tpu.memory_space<vmem>>, vector<32x128xf32>
    %512 = arith.truncf %511 : vector<32x128xf32> to vector<32x128xbf16>
    %c0_385 = arith.constant 0 : index
    %c0_386 = arith.constant 0 : index
    %513 = vector.load %arg6[%c0_385, %c0_386] : memref<128x128xbf16, #tpu.memory_space<vmem>>, vector<128x128xbf16>
    %cst_387 = arith.constant dense<0.000000e+00> : vector<32x128xf32>
    %514 = tpu.matmul %512, %513, %cst_387 {dimension_numbers = #tpu.dot_dimension_numbers<[1], [0], [0], [1], [0, 0, 1, 1], [], []>} : vector<32x128xbf16>, vector<128x128xbf16>, vector<32x128xf32> -> vector<32x128xf32>
    %c0_388 = arith.constant 0 : index
    %c0_389 = arith.constant 0 : index
    %515 = vector.load %arg7[%c0_388, %c0_389] : memref<1x128xf32, #tpu.memory_space<vmem>>, vector<1x128xf32>
    %516 = vector.broadcast %515 : vector<1x128xf32> to vector<32x128xf32>
    %517 = arith.addf %514, %516 : vector<32x128xf32>
    %c0_390 = arith.constant 0 : index
    %c0_391 = arith.constant 0 : index
    %518 = vector.load %arg8[%c0_390, %c0_391] : memref<32x128xf32, #tpu.memory_space<vmem>>, vector<32x128xf32>
    tpu.vector_store %arg8[%c0_390, %c0_391], %517 {strides = array<i32>} : memref<32x128xf32, #tpu.memory_space<vmem>>, vector<32x128xf32>,
    return
  }
  func.func @transform_0(%arg0: i32) -> (i32, i32) {
    %c0_i32 = arith.constant 0 : i32
    %c0_i32_0 = arith.constant 0 : i32
    return %arg0, %c0_i32 : i32, i32
  }
  func.func @transform_1(%arg0: i32) -> (i32, i32) {
    %c0_i32 = arith.constant 0 : i32
    %c0_i32_0 = arith.constant 0 : i32
    %c0_i32_1 = arith.constant 0 : i32
    return %c0_i32, %c0_i32_0 : i32, i32
  }
  func.func @transform_2(%arg0: i32) -> (i32, i32, i32) {
    %c0_i32 = arith.constant 0 : i32
    %c0_i32_0 = arith.constant 0 : i32
    %c0_i32_1 = arith.constant 0 : i32
    %c0_i32_2 = arith.constant 0 : i32
    return %c0_i32, %c0_i32_0, %c0_i32_1 : i32, i32, i32
  }
  func.func @transform_3(%arg0: i32) -> (i32, i32, i32) {
    %c0_i32 = arith.constant 0 : i32
    %c0_i32_0 = arith.constant 0 : i32
    %c0_i32_1 = arith.constant 0 : i32
    %c0_i32_2 = arith.constant 0 : i32
    return %c0_i32, %c0_i32_0, %c0_i32_1 : i32, i32, i32
  }
  func.func @transform_4(%arg0: i32) -> (i32, i32, i32) {
    %c0_i32 = arith.constant 0 : i32
    %c0_i32_0 = arith.constant 0 : i32
    %c0_i32_1 = arith.constant 0 : i32
    %c0_i32_2 = arith.constant 0 : i32
    return %c0_i32, %c0_i32_0, %c0_i32_1 : i32, i32, i32
  }
  func.func @transform_5(%arg0: i32) -> (i32, i32) {
    %c0_i32 = arith.constant 0 : i32
    %c0_i32_0 = arith.constant 0 : i32
    %c0_i32_1 = arith.constant 0 : i32
    return %c0_i32, %c0_i32_0 : i32, i32
  }
  func.func @transform_6(%arg0: i32) -> (i32, i32) {
    %c0_i32 = arith.constant 0 : i32
    %c0_i32_0 = arith.constant 0 : i32
    %c0_i32_1 = arith.constant 0 : i32
    return %c0_i32, %c0_i32_0 : i32, i32
  }
  func.func @transform_7(%arg0: i32) -> (i32, i32) {
    %c0_i32 = arith.constant 0 : i32
    %c0_i32_0 = arith.constant 0 : i32
    return %arg0, %c0_i32 : i32, i32
  }
}

</mosaic_0001>

<bundles_post_ra>
// kernel: tpu_custom_call.1
= control target key start
LH: loop header
LB: loop body
LE: loop exit
PB: predicated region body
PF: predicated region fallthrough
CT: control target
= control target key end

     0   :  { %12 = vsyncpa [#allocation5], 0  ;;  %s4800_s0 = inlined_call_operand.hbm [shape: bf16[256,128], index: 0, kind: input, shape index: {}]   ;;  %s4801_s1 = inlined_call_operand.hbm [shape: bf16[128,128], index: 1, kind: input, shape index: {}]   ;;  %s4802_s2 = inlined_call_operand.hbm [shape: bf16[1,128,128], index: 2, kind: input, shape index: {}]   ;;  %s4803_s3 = inlined_call_operand.hbm [shape: bf16[2,128,128], index: 3, kind: input, shape index: {}]   ;;  %s4804_s4 = inlined_call_operand.vmem [shape: f32[2,1,128], index: 4, kind: input, shape index: {}]   ;;  %s4805_s5 = inlined_call_operand.hbm [shape: bf16[128,128], index: 5, kind: input, shape index: {}]   ;;  %s4806_s6 = inlined_call_operand.vmem [shape: f32[1,128], index: 6, kind: input, shape index: {}]   ;;  %s4807_s7 = inlined_call_operand.hbm [shape: f32[32,128], index: 7, kind: output, shape index: {}]  }
   0x1   :  { %13 = vsyncpa [#allocation8], 0 }
   0x2   :  { %14 = vsyncpa [#allocation11], 0 }
   0x3   :  { %15 = vsyncpa [#allocation6], 0  ;;  %s33_s26 = sshll.u32 %s4801_s1, 4  ;;  %s4511_s27 = smov [#allocation7]   ;;  %s34_s26 = int_to_ptr.hbm [resolvable:$true] %s33_s26 }
   0x4   :  { %s35_s28 = sshll.u32 %s4511_s27, 4  ;;  %s59_s8 = sshll.u32 %s4803_s3, 4  ;;  %s36_s28 = int_to_ptr.vmem [resolvable:$true] %s35_s28  ;;  %s60_s8 = int_to_ptr.hbm [resolvable:$true] %s59_s8 }
   0x5   :  { %s4512_s9 = smov 64   ;;  %s4513_s10 = smov 4  }
   0x6   :  { %41 = dma.hbm_to_vmem [thread:$0]  %s34_s26, 1024, %s36_s28, [#allocation8], %s4512_s9, %s4512_s9, %s4513_s10  }
   0x7   :  { %s4514_s11 = smov [#allocation10]   ;;  %s20_s15 = sshll.u32 %s4800_s0, 4  ;;  %s21_s15 = int_to_ptr.hbm [resolvable:$true] %s20_s15 }
   0x8   :  { %s61_s12 = sshll.u32 %s4514_s11, 4  ;;  %s46_s17 = sshll.u32 %s4802_s2, 4  ;;  %s62_s12 = int_to_ptr.vmem [resolvable:$true] %s61_s12  ;;  %s47_s17 = int_to_ptr.hbm [resolvable:$true] %s46_s17 }
   0x9   :  { %67 = dma.hbm_to_vmem [thread:$0]  %s60_s8, 2048, %s62_s12, [#allocation11], %s4512_s9, %s4512_s9, %s4513_s10  }
   0xa   :  { %s4515_s18 = smov [#allocation4]   ;;  %s4516_s3 = smov [#allocation9]  }
   0xb   :  { %s22_s19 = sshll.u32 %s4515_s18, 4  ;;  %s48_s20 = sshll.u32 %s4516_s3, 4  ;;  %s23_s19 = int_to_ptr.vmem [resolvable:$true] %s22_s19  ;;  %s49_s20 = int_to_ptr.vmem [resolvable:$true] %s48_s20 }
   0xc   :  { %28 = dma.hbm_to_vmem [thread:$0]  %s21_s15, 2048, %s23_s19, [#allocation5], %s4512_s9, %s4512_s9, %s4513_s10  }
   0xd   :  { %s74_s23 = sshll.u32 %s4805_s5, 4  ;;  %s4517_s0 = smov [#allocation12]   ;;  %s75_s23 = int_to_ptr.hbm [resolvable:$true] %s74_s23 }
   0xe   :  { %54 = dma.hbm_to_vmem [thread:$0]  %s47_s17, 1024, %s49_s20, [#allocation8], %s4512_s9, %s4512_s9, %s4513_s10  }
   0xf   :  { %s76_s24 = sshll.u32 %s4517_s0, 4  ;;  %s77_s24 = int_to_ptr.vmem [resolvable:$true] %s76_s24 }
  0x10   :  { %82 = dma.hbm_to_vmem [thread:$0]  %s75_s23, 1024, %s77_s24, [#allocation11], %s4512_s9, %s4512_s9, %s4513_s10  }
  0x11   :  { %4503 = dma.done.wait [#allocation5], 2048  }
  0x12   :  { %4504 = vsyncadd [#allocation5], 4294965248 }
  0x13   :  { %4505 = dma.done.wait [#allocation8], 2048  }
  0x14   :  { %4506 = vsyncadd [#allocation8], 4294965248 }
  0x15   :  { %4507 = dma.done.wait [#allocation11], 3072  }
  0x16   :  { %4508 = vsyncadd [#allocation11], 4294964224  ;;  %v3658_v0 = vld [vmem:[#allocation7 + $0x38] sm:$0xff]  ;;  %v3657_v2 = vld [vmem:[#allocation7 + $0x30] sm:$0xff]  ;;  %v4518_v17 = vmov 0.0|0.0   ;;  %s4519_s28 = smov [#allocation13]  }
  0x17   :  { %v3666_v1 = vld [vmem:[#allocation10 + $0x38] sm:$0xff]  ;;  %301 = vmatpush.bf16.msra.mxu0 %v3658_v0  ;;  %v3665_v3 = vld [vmem:[#allocation10 + $0x30] sm:$0xff]  ;;  %v3656_v4 = vld [vmem:[#allocation7 + $0x28] sm:$0xff]  ;;  %s2881_s29 = sshll.u32 %s4519_s28, 4  ;;  %s2883_s9 = sshll.u32 %s4807_s7, 4  ;;  %s2882_s29 = int_to_ptr.vmem [resolvable:$true] %s2881_s29  ;;  %s2884_s9 = int_to_ptr.hbm [resolvable:$true] %s2883_s9 }
  0x18   :  { %534 = vmatpush.bf16.msra.mxu1 %v3666_v1  ;;  %v3664_v5 = vld [vmem:[#allocation10 + $0x28] sm:$0xff]  ;;  %v3655_v6 = vld [vmem:[#allocation7 + $0x20] sm:$0xff]  ;;  %v3654_v8 = vld [vmem:[#allocation7 + $0x18] sm:$0xff]  ;;  %s4521_s10 = smov 8  }
  0x19   :  { %v3663_v7 = vld [vmem:[#allocation10 + $0x20] sm:$0xff]  ;;  %v3662_v9 = vld [vmem:[#allocation10 + $0x18] sm:$0xff]  ;;  %v3653_v10 = vld [vmem:[#allocation7 + $0x10] sm:$0xff] }
  0x1a   :  { %v3661_v11 = vld [vmem:[#allocation10 + $0x10] sm:$0xff]  ;;  %v3652_v12 = vld [vmem:[#allocation7 + $0x8] sm:$0xff]  ;;  %v3651_v14 = vld [vmem:[#allocation7] sm:$0xff] }
  0x1b   :  { %302 = vmatpush.bf16.msra.mxu0 %v3657_v2  ;;  %v3660_v13 = vld [vmem:[#allocation10 + $0x8] sm:$0xff]  ;;  %v3659_v15 = vld [vmem:[#allocation10] sm:$0xff]  ;;  %v3637_v19 = vld [vmem:[#allocation4 + $0x10] sm:$0xff] }
  0x1c   :  { %535 = vmatpush.bf16.msra.mxu1 %v3665_v3  ;;  %v3635_v16 = vld [vmem:[#allocation4] sm:$0xff]  ;;  %v3636_v18 = vld [vmem:[#allocation4 + $0x8] sm:$0xff]  ;;  %v3638_v20 = vld [vmem:[#allocation4 + $0x18] sm:$0xff] }
  0x1d   :  { %v3639_v21 = vld [vmem:[#allocation4 + $0x20] sm:$0xff]  ;;  %v3640_v22 = vld [vmem:[#allocation4 + $0x28] sm:$0xff]  ;;  %v3674_v23 = vld [vmem:[#allocation10 + $0x38] sm:$0xff] }
  0x1e   :  { %662 = vmatpush.bf16.msra.mxu3 %v3674_v23  ;;  %v3673_v24 = vld [vmem:[#allocation10 + $0x30] sm:$0xff]  ;;  %v3672_v26 = vld [vmem:[#allocation10 + $0x28] sm:$0xff]  ;;  %v3671_v27 = vld [vmem:[#allocation10 + $0x20] sm:$0xff] }
  0x1f   :  { %303 = vmatpush.bf16.msra.mxu0 %v3656_v4  ;;  %v3641_v25 = vld [vmem:[#allocation4 + $0x30] sm:$0xff]  ;;  %v3670_v28 = vld [vmem:[#allocation10 + $0x18] sm:$0xff]  ;;  %v3668_v31 = vld [vmem:[#allocation10 + $0x8] sm:$0xff] }
  0x20   :  { %536 = vmatpush.bf16.msra.mxu1 %v3664_v5  ;;  %v3669_v29 = vld [vmem:[#allocation10 + $0x10] sm:$0xff]  ;;  %v3642_v30 = vld [vmem:[#allocation4 + $0x38] sm:$0xff]  ;;  %v3667_v32 = vld [vmem:[#allocation10] sm:$0xff] }
  0x21   :  { %v3643_v33 = vld [vmem:[#allocation4 + $0x40] sm:$0xff]  ;;  %v3644_v45 = vld [vmem:[#allocation4 + $0x48] sm:$0xff]  ;;  %v3645_v55 = vld [vmem:[#allocation4 + $0x50] sm:$0xff] }
  0x22   :  { %663 = vmatpush.bf16.msra.mxu3 %v3673_v24  ;;  %v4581_v36 = vld [vmem:[%s4804_s4] ss:$0 sm:$0xff]  ;;  %v3646_v61 = vld [vmem:[#allocation4 + $0x58] sm:$0xff] }
  0x23   :  { %304 = vmatpush.bf16.msra.mxu0 %v3655_v6 }
  0x24   :  { %537 = vmatpush.bf16.msra.mxu1 %v3663_v7 }
  0x26   :  { %664 = vmatpush.bf16.msra.mxu3 %v3672_v26 }
  0x27   :  { %305 = vmatpush.bf16.msra.mxu0 %v3654_v8 }
  0x28   :  { %538 = vmatpush.bf16.msra.mxu1 %v3662_v9 }
  0x2a   :  { %665 = vmatpush.bf16.msra.mxu3 %v3671_v27 }
  0x2b   :  { %306 = vmatpush.bf16.msra.mxu0 %v3653_v10 }
  0x2c   :  { %539 = vmatpush.bf16.msra.mxu1 %v3661_v11 }
  0x2e   :  { %666 = vmatpush.bf16.msra.mxu3 %v3670_v28 }
  0x2f   :  { %307 = vmatpush.bf16.msra.mxu0 %v3652_v12  ;;  %v3649_v12 = vld [vmem:[#allocation4 + $0x70] sm:$0xff] }
  0x30   :  { %540 = vmatpush.bf16.msra.mxu1 %v3660_v13 }
  0x32   :  { %667 = vmatpush.bf16.msra.mxu3 %v3669_v29 }
  0x33   :  { %308 = vmatpush.bf16.msra.mxu0 %v3651_v14 }
  0x34   :  { %541 = vmatpush.bf16.msra.mxu1 %v3659_v15 }
  0x36   :  { %309 = vmatmul.bf16.vlgmr.msra.gmra.mxu0 %v3635_v16  ;;  %668 = vmatpush.bf16.msra.mxu3 %v3668_v31 }
  0x37   :  { %555 = vmatpush.bf16.msrb.mxu0 %v3666_v1  ;;  %542 = vmatmul.bf16.vlgmr.msra.gmra.mxu1 %v4518_v17 }
  0x38   :  { %683 = vmatpush.bf16.msrb.mxu1 %v3674_v23 }
  0x3a   :  { %669 = vmatpush.bf16.msra.mxu3 %v3667_v32 }
  0x3b   :  { %556 = vmatpush.bf16.msrb.mxu0 %v3665_v3  ;;  %v3647_v3 = vld [vmem:[#allocation4 + $0x60] sm:$0xff] }
  0x3c   :  { %684 = vmatpush.bf16.msrb.mxu1 %v3673_v24  ;;  %v3678_v24 = vld [vmem:[#allocation10 + $0x18] sm:$0xff] }
  0x3f   :  { %557 = vmatpush.bf16.msrb.mxu0 %v3664_v5 }
  0x40   :  { %685 = vmatpush.bf16.msrb.mxu1 %v3672_v26 }
  0x43   :  { %558 = vmatpush.bf16.msrb.mxu0 %v3663_v7 }
  0x44   :  { %686 = vmatpush.bf16.msrb.mxu1 %v3671_v27  ;;  %v3676_v27 = vld [vmem:[#allocation10 + $0x8] sm:$0xff] }
  0x46   :  { %314 = vmatmul.bf16.gmra.mxu0 %v3636_v18  ;;  %v3682_v18 = vld [vmem:[#allocation10 + $0x38] sm:$0xff] }
  0x47   :  { %559 = vmatpush.bf16.msrb.mxu0 %v3662_v9  ;;  %v3648_v9 = vld [vmem:[#allocation4 + $0x68] sm:$0xff]  ;;  %790 = vmatpush.bf16.msra.mxu2 %v3682_v18 }
  0x48   :  { %687 = vmatpush.bf16.msrb.mxu1 %v3670_v28  ;;  %811 = vmatpush.bf16.msrb.mxu3 %v3682_v18  ;;  %v3675_v28 = vld [vmem:[#allocation10] sm:$0xff] }
  0x4b   :  { %560 = vmatpush.bf16.msrb.mxu0 %v3661_v11 }
  0x4c   :  { %688 = vmatpush.bf16.msrb.mxu1 %v3669_v29 }
  0x4f   :  { %561 = vmatpush.bf16.msrb.mxu0 %v3660_v13 }
  0x50   :  { %689 = vmatpush.bf16.msrb.mxu1 %v3668_v31 }
  0x53   :  { %562 = vmatpush.bf16.msrb.mxu0 %v3659_v15  ;;  %v3650_v15 = vld [vmem:[#allocation4 + $0x78] sm:$0xff] }
  0x54   :  { %690 = vmatpush.bf16.msrb.mxu1 %v3667_v32 }
  0x56   :  { %319 = vmatmul.bf16.gmra.mxu0 %v3637_v19  ;;  %v3681_v19 = vld [vmem:[#allocation10 + $0x30] sm:$0xff] }
  0x57   :  { %791 = vmatpush.bf16.msra.mxu2 %v3681_v19  ;;  %812 = vmatpush.bf16.msrb.mxu3 %v3681_v19 }
  0x66   :  { %324 = vmatmul.bf16.gmra.mxu0 %v3638_v20 }
  0x76   :  { %329 = vmatmul.bf16.gmra.mxu0 %v3639_v21  ;;  %v3680_v21 = vld [vmem:[#allocation10 + $0x28] sm:$0xff] }
  0x77   :  { %792 = vmatpush.bf16.msra.mxu2 %v3680_v21  ;;  %813 = vmatpush.bf16.msrb.mxu3 %v3680_v21  ;;  %v3688_v21 = vld [vmem:[#allocation10 + $0x28] sm:$0xff] }
  0x86   :  { %334 = vmatmul.bf16.gmra.mxu0 %v3640_v22  ;;  %v3679_v22 = vld [vmem:[#allocation10 + $0x20] sm:$0xff] }
  0x87   :  { %793 = vmatpush.bf16.msra.mxu2 %v3679_v22  ;;  %814 = vmatpush.bf16.msrb.mxu3 %v3679_v22 }
  0x8b   :  { %794 = vmatpush.bf16.msra.mxu2 %v3678_v24  ;;  %815 = vmatpush.bf16.msrb.mxu3 %v3678_v24 }
  0x96   :  { %339 = vmatmul.bf16.gmra.mxu0 %v3641_v25  ;;  %v3677_v25 = vld [vmem:[#allocation10 + $0x10] sm:$0xff] }
  0x97   :  { %795 = vmatpush.bf16.msra.mxu2 %v3677_v25  ;;  %816 = vmatpush.bf16.msrb.mxu3 %v3677_v25 }
  0x9b   :  { %796 = vmatpush.bf16.msra.mxu2 %v3676_v27  ;;  %817 = vmatpush.bf16.msrb.mxu3 %v3676_v27 }
  0x9f   :  { %797 = vmatpush.bf16.msra.mxu2 %v3675_v28  ;;  %818 = vmatpush.bf16.msrb.mxu3 %v3675_v28 }
  0xa6   :  { %344 = vmatmul.bf16.gmra.mxu0 %v3642_v30 }
  0xb3   :  { %v310_v34 = vpop.f32.mrf.mxu0 }
  0xb4   :  { %v543_v35 = vpop.f32.mrf.mxu1  ;;  %v311_v38 = vadd.f32 %v4581_v36, %v310_v34 }
  0xb6   :  { %349 = vmatmul.bf16.gmra.mxu0 %v3643_v33 }
  0xbb   :  { %v312_v37 = vpop.f32.mrf.mxu0 }
  0xbc   :  { %v313_v39 = vadd.f32 %v4581_v36, %v312_v37  ;;  %v545_v41 = vpop.f32.mrf.mxu1 }
  0xbe   :  { %v3822_v40 = vpack.c.bf16 %v313_v39, %v311_v38 }
  0xc0   :  { %v3901_v42 = vunpack.c.l.bf16 %v3822_v40  ;;  %v3902_v43 = vunpack.c.h.bf16 %v3822_v40 }
  0xc2   :  { %v548_v44 = vadd.f32 %v3901_v42, %v543_v35  ;;  %v549_v46 = vadd.f32 %v3902_v43, %v545_v41 }
  0xc3   :  { %v315_v47 = vpop.f32.mrf.mxu0 }
  0xc4   :  { %4231 = vtanh.f32 %v548_v44  ;;  %v316_v51 = vadd.f32 %v4581_v36, %v315_v47 }
  0xc5   :  { %4233 = vtanh.f32 %v549_v46 }
  0xc6   :  { %354 = vmatmul.bf16.gmra.mxu0 %v3644_v45 }
  0xca   :  { %v4232_v48 = vpop.eup %4231 }
  0xcb   :  { %v4234_v49 = vpop.eup %4233  ;;  %v317_v50 = vpop.f32.mrf.mxu0 }
  0xcc   :  { %v318_v52 = vadd.f32 %v4581_v36, %v317_v50  ;;  %v3910_v53 = vpack.c.bf16 %v4234_v49, %v4232_v48 }
  0xce   :  { %v4587_v54 = vpack.c.bf16 %v318_v52, %v316_v51  ;;  %3911 = vst [vmem:[#allocation2 + $0x30] sm:$0xff] %v3910_v53   ;;  %670 = vmatmul.bf16.vlgmr.msra.gmra.mxu3 %v3910_v53 }
  0xd0   :  { %v3905_v25 = vunpack.c.l.bf16 %v4587_v54  ;;  %v3906_v28 = vunpack.c.h.bf16 %v4587_v54  ;;  %v3683_v54 = vld [vmem:[#allocation10] sm:$0xff] }
  0xd3   :  { %v320_v56 = vpop.f32.mrf.mxu0 }
  0xd4   :  { %v321_v58 = vadd.f32 %v4581_v36, %v320_v56 }
  0xd6   :  { %359 = vmatmul.bf16.gmra.mxu0 %v3645_v55 }
  0xdb   :  { %v322_v57 = vpop.f32.mrf.mxu0 }
  0xdc   :  { %v323_v59 = vadd.f32 %v4581_v36, %v322_v57 }
  0xde   :  { %v4591_v60 = vpack.c.bf16 %v323_v59, %v321_v58 }
  0xe0   :  { %v3919_v37 = vunpack.c.l.bf16 %v4591_v60  ;;  %v3920_v39 = vunpack.c.h.bf16 %v4591_v60 }
  0xe3   :  { %v325_v62 = vpop.f32.mrf.mxu0 }
  0xe4   :  { %v326_v0 = vadd.f32 %v4581_v36, %v325_v62 }
  0xe6   :  { %364 = vmatmul.bf16.gmra.mxu0 %v3646_v61 }
  0xeb   :  { %v327_v63 = vpop.f32.mrf.mxu0 }
  0xec   :  { %v328_v1 = vadd.f32 %v4581_v36, %v327_v63 }
  0xee   :  { %v4595_v2 = vpack.c.bf16 %v328_v1, %v326_v0 }
  0xf3   :  { %v330_v4 = vpop.f32.mrf.mxu0 }
  0xf4   :  { %v331_v6 = vadd.f32 %v4581_v36, %v330_v4 }
  0xf6   :  { %369 = vmatmul.bf16.gmra.mxu0 %v3647_v3 }
  0xfb   :  { %v332_v5 = vpop.f32.mrf.mxu0 }
  0xfc   :  { %v333_v7 = vadd.f32 %v4581_v36, %v332_v5 }
  0xfe   :  { %v4599_v8 = vpack.c.bf16 %v333_v7, %v331_v6 }
 0x103   :  { %v4601_v10 = vpop.f32.mrf.mxu0 }
 0x106   :  { %374 = vmatmul.bf16.gmra.mxu0 %v3648_v9  ;;  %v3690_v9 = vld [vmem:[#allocation10 + $0x38] sm:$0xff] }
 0x107   :  { %918 = vmatpush.bf16.msra.mxu1 %v3690_v9  ;;  %939 = vmatpush.bf16.msrb.mxu2 %v3690_v9 }
 0x10b   :  { %v4603_v11 = vpop.f32.mrf.mxu0 }
 0x113   :  { %v4605_v13 = vpop.f32.mrf.mxu0 }
 0x114   :  { %v341_v9 = vadd.f32 %v4581_v36, %v4605_v13  ;;  %v3704_v13 = vld [vmem:[#allocation10 + $0x28] sm:$0xff] }
 0x116   :  { %379 = vmatmul.bf16.gmra.mxu0 %v3649_v12  ;;  %v3689_v12 = vld [vmem:[#allocation10 + $0x30] sm:$0xff] }
 0x117   :  { %919 = vmatpush.bf16.msra.mxu1 %v3689_v12  ;;  %940 = vmatpush.bf16.msrb.mxu2 %v3689_v12 }
 0x11b   :  { %v4607_v14 = vpop.f32.mrf.mxu0  ;;  %920 = vmatpush.bf16.msra.mxu1 %v3688_v21  ;;  %941 = vmatpush.bf16.msrb.mxu2 %v3688_v21 }
 0x123   :  { %v4609_v16 = vpop.f32.mrf.mxu0 }
 0x126   :  { %384 = vmatmul.bf16.gmra.mxu0 %v3650_v15 }
 0x12b   :  { %v4611_v20 = vpop.f32.mrf.mxu0 }
 0x133   :  { %v4613_v23 = vpop.f32.mrf.mxu0 }
 0x136   :  { %563 = vmatmul.bf16.vlgmr.msrb.gmra.mxu0 %v4518_v17 }
 0x13b   :  { %v4616_v26 = vpop.f32.mrf.mxu0 }
 0x143   :  { %v355_v29 = vpop.f32.mrf.mxu0 }
 0x144   :  { %v356_v31 = vadd.f32 %v4581_v36, %v355_v29 }
 0x14b   :  { %v357_v30 = vpop.f32.mrf.mxu0 }
 0x14c   :  { %v358_v32 = vadd.f32 %v4581_v36, %v357_v30 }
 0x14e   :  { %v4620_v33 = vpack.c.bf16 %v358_v32, %v356_v31 }
 0x151   :  { %v671_v34 = vpop.f32.mrf.mxu3 }
 0x152   :  { %v676_v38 = vadd.f32 %v3919_v37, %v671_v34  ;;  %v3686_v37 = vld [vmem:[#allocation10 + $0x18] sm:$0xff] }
 0x153   :  { %v360_v35 = vpop.f32.mrf.mxu0 }
 0x154   :  { %4235 = vtanh.f32 %v676_v38  ;;  %v361_v43 = vadd.f32 %v4581_v36, %v360_v35  ;;  %v3687_v35 = vld [vmem:[#allocation10 + $0x20] sm:$0xff]  ;;  %v3685_v38 = vld [vmem:[#allocation10 + $0x10] sm:$0xff] }
 0x155   :  { %921 = vmatpush.bf16.msra.mxu1 %v3687_v35  ;;  %942 = vmatpush.bf16.msrb.mxu2 %v3687_v35 }
 0x159   :  { %v673_v40 = vpop.f32.mrf.mxu3  ;;  %922 = vmatpush.bf16.msra.mxu1 %v3686_v37  ;;  %943 = vmatpush.bf16.msrb.mxu2 %v3686_v37 }
 0x15a   :  { %v677_v41 = vadd.f32 %v3920_v39, %v673_v40  ;;  %v4236_v46 = vpop.eup %4235  ;;  %v3684_v39 = vld [vmem:[#allocation10 + $0x8] sm:$0xff] }
 0x15b   :  { %v362_v42 = vpop.f32.mrf.mxu0 }
 0x15c   :  { %v363_v44 = vadd.f32 %v4581_v36, %v362_v42  ;;  %4237 = vtanh.f32 %v677_v41  ;;  %v3937_v41 = vunpack.c.l.bf16 %v4599_v8 }
 0x15d   :  { %923 = vmatpush.bf16.msra.mxu1 %v3685_v38  ;;  %944 = vmatpush.bf16.msrb.mxu2 %v3685_v38 }
 0x15e   :  { %v4626_v45 = vpack.c.bf16 %v363_v44, %v361_v43  ;;  %v3938_v43 = vunpack.c.h.bf16 %v4599_v8  ;;  %v3923_v8 = vunpack.c.l.bf16 %v4595_v2 }
 0x161   :  { %924 = vmatpush.bf16.msra.mxu1 %v3684_v39  ;;  %945 = vmatpush.bf16.msrb.mxu2 %v3684_v39 }
 0x162   :  { %v4238_v47 = vpop.eup %4237 }
 0x163   :  { %v365_v48 = vpop.f32.mrf.mxu0  ;;  %v3928_v49 = vpack.c.bf16 %v4238_v47, %v4236_v46 }
 0x164   :  { %v366_v51 = vadd.f32 %v4581_v36, %v365_v48 }
 0x165   :  { %3929 = vst [vmem:[#allocation2 + $0x58] sm:$0xff] %v3928_v49   ;;  %798 = vmatmul.bf16.vlgmr.msra.gmra.mxu2 %v3928_v49  ;;  %925 = vmatpush.bf16.msra.mxu1 %v3683_v54 }
 0x166   :  { %946 = vmatpush.bf16.msrb.mxu2 %v3683_v54 }
 0x16b   :  { %v367_v50 = vpop.f32.mrf.mxu0 }
 0x16c   :  { %v368_v52 = vadd.f32 %v4581_v36, %v367_v50  ;;  %v3698_v50 = vld [vmem:[#allocation10 + $0x38] sm:$0xff] }
 0x16d   :  { %1046 = vmatpush.bf16.msra.mxu3 %v3698_v50 }
 0x16e   :  { %v4630_v53 = vpack.c.bf16 %v368_v52, %v366_v51  ;;  %v3697_v51 = vld [vmem:[#allocation10 + $0x30] sm:$0xff]  ;;  %v3696_v52 = vld [vmem:[#allocation10 + $0x28] sm:$0xff] }
 0x171   :  { %1047 = vmatpush.bf16.msra.mxu3 %v3697_v51 }
 0x173   :  { %v370_v55 = vpop.f32.mrf.mxu0 }
 0x174   :  { %v371_v57 = vadd.f32 %v4581_v36, %v370_v55 }
 0x175   :  { %1048 = vmatpush.bf16.msra.mxu3 %v3696_v52 }
 0x17b   :  { %v372_v56 = vpop.f32.mrf.mxu0 }
 0x17c   :  { %v373_v58 = vadd.f32 %v4581_v36, %v372_v56 }
 0x17e   :  { %v4634_v59 = vpack.c.bf16 %v373_v58, %v371_v57  ;;  %v3924_v57 = vunpack.c.h.bf16 %v4595_v2  ;;  %v3691_v2 = vld [vmem:[#allocation10] sm:$0xff] }
 0x183   :  { %v375_v60 = vpop.f32.mrf.mxu0 }
 0x184   :  { %v376_v62 = vadd.f32 %v4581_v36, %v375_v60 }
 0x18b   :  { %v377_v61 = vpop.f32.mrf.mxu0 }
 0x18c   :  { %v378_v63 = vadd.f32 %v4581_v36, %v377_v61 }
 0x18e   :  { %v4638_v0 = vpack.c.bf16 %v378_v63, %v376_v62 }
 0x193   :  { %v380_v1 = vpop.f32.mrf.mxu0 }
 0x194   :  { %v381_v4 = vadd.f32 %v4581_v36, %v380_v1  ;;  %v3695_v1 = vld [vmem:[#allocation10 + $0x20] sm:$0xff] }
 0x195   :  { %1049 = vmatpush.bf16.msra.mxu3 %v3695_v1 }
 0x19b   :  { %v382_v3 = vpop.f32.mrf.mxu0 }
 0x19c   :  { %v383_v5 = vadd.f32 %v4581_v36, %v382_v3  ;;  %v3694_v3 = vld [vmem:[#allocation10 + $0x18] sm:$0xff] }
 0x19d   :  { %1050 = vmatpush.bf16.msra.mxu3 %v3694_v3 }
 0x19e   :  { %v4642_v6 = vpack.c.bf16 %v383_v5, %v381_v4  ;;  %v3693_v4 = vld [vmem:[#allocation10 + $0x10] sm:$0xff]  ;;  %v3692_v5 = vld [vmem:[#allocation10 + $0x8] sm:$0xff] }
 0x1a1   :  { %1051 = vmatpush.bf16.msra.mxu3 %v3693_v4 }
 0x1a3   :  { %v385_v7 = vpop.f32.mrf.mxu0 }
 0x1a4   :  { %v386_v18 = vadd.f32 %v4581_v36, %v385_v7  ;;  %v343_v7 = vadd.f32 %v4581_v36, %v4607_v14  ;;  %v3705_v14 = vld [vmem:[#allocation10 + $0x30] sm:$0xff] }
 0x1a5   :  { %1052 = vmatpush.bf16.msra.mxu3 %v3692_v5 }
 0x1a6   :  { %v3852_v12 = vpack.c.bf16 %v343_v7, %v341_v9 }
 0x1a8   :  { %v3956_v21 = vunpack.c.h.bf16 %v3852_v12 }
 0x1a9   :  { %1053 = vmatpush.bf16.msra.mxu3 %v3691_v2 }
 0x1ab   :  { %v387_v15 = vpop.f32.mrf.mxu0 }
 0x1ac   :  { %v388_v19 = vadd.f32 %v4581_v36, %v387_v15 }
 0x1ae   :  { %v3897_v22 = vpack.c.bf16 %v388_v19, %v386_v18  ;;  %v3955_v18 = vunpack.c.l.bf16 %v3852_v12 }
 0x1b0   :  { %4201 = vst [vmem:[#allocation2 + $0x28] sm:$0xff] %v3897_v22  }
 0x1b3   :  { %v564_v24 = vpop.f32.mrf.mxu0 }
 0x1b4   :  { %v569_v27 = vadd.f32 %v3905_v25, %v564_v24 }
 0x1b6   :  { %4239 = vtanh.f32 %v569_v27 }
 0x1bb   :  { %v566_v29 = vpop.f32.mrf.mxu0 }
 0x1bc   :  { %v570_v30 = vadd.f32 %v3906_v28, %v566_v29  ;;  %v4240_v31 = vpop.eup %4239  ;;  %v3706_v29 = vld [vmem:[#allocation10 + $0x38] sm:$0xff] }
 0x1bd   :  { %1174 = vmatpush.bf16.msra.mxu2 %v3706_v29 }
 0x1be   :  { %4241 = vtanh.f32 %v570_v30  ;;  %v338_v30 = vadd.f32 %v4581_v36, %v4603_v11  ;;  %v3703_v11 = vld [vmem:[#allocation10 + $0x20] sm:$0xff] }
 0x1c1   :  { %1175 = vmatpush.bf16.msra.mxu2 %v3705_v14 }
 0x1c4   :  { %v4242_v32 = vpop.eup %4241 }
 0x1c5   :  { %v3915_v34 = vpack.c.bf16 %v4242_v32, %v4240_v31  ;;  %v336_v31 = vadd.f32 %v4581_v36, %v4601_v10  ;;  %1176 = vmatpush.bf16.msra.mxu2 %v3704_v13  ;;  %v3702_v10 = vld [vmem:[#allocation10 + $0x18] sm:$0xff] }
 0x1c7   :  { %3916 = vst [vmem:[#allocation2] sm:$0xff] %v3915_v34   ;;  %691 = vmatmul.bf16.vlgmr.msrb.gmra.mxu1 %v3915_v34  ;;  %v3847_v32 = vpack.c.bf16 %v338_v30, %v336_v31  ;;  %v3722_v31 = vld [vmem:[#allocation10 + $0x38] sm:$0xff] }
 0x1c8   :  { %1067 = vmatpush.bf16.msrb.mxu1 %v3698_v50 }
 0x1c9   :  { %v3941_v35 = vunpack.c.l.bf16 %v3847_v32  ;;  %v3942_v38 = vunpack.c.h.bf16 %v3847_v32  ;;  %1177 = vmatpush.bf16.msra.mxu2 %v3703_v11  ;;  %v3721_v32 = vld [vmem:[#allocation10 + $0x30] sm:$0xff] }
 0x1cc   :  { %1068 = vmatpush.bf16.msrb.mxu1 %v3697_v51 }
 0x1cd   :  { %1178 = vmatpush.bf16.msra.mxu2 %v3702_v10 }
 0x1d0   :  { %1069 = vmatpush.bf16.msrb.mxu1 %v3696_v52 }
 0x1d4   :  { %1070 = vmatpush.bf16.msrb.mxu1 %v3695_v1 }
 0x1d8   :  { %1071 = vmatpush.bf16.msrb.mxu1 %v3694_v3 }
 0x1dc   :  { %1072 = vmatpush.bf16.msrb.mxu1 %v3693_v4 }
 0x1e0   :  { %1073 = vmatpush.bf16.msrb.mxu1 %v3692_v5 }
 0x1e4   :  { %1074 = vmatpush.bf16.msrb.mxu1 %v3691_v2 }
 0x1e8   :  { %v799_v40 = vpop.f32.mrf.mxu2 }
 0x1e9   :  { %v804_v42 = vadd.f32 %v3937_v41, %v799_v40 }
 0x1eb   :  { %4243 = vtanh.f32 %v804_v42 }
 0x1f0   :  { %v801_v44 = vpop.f32.mrf.mxu2 }
 0x1f1   :  { %v805_v46 = vadd.f32 %v3938_v43, %v801_v44  ;;  %v4244_v47 = vpop.eup %4243  ;;  %v3701_v43 = vld [vmem:[#allocation10 + $0x10] sm:$0xff]  ;;  %v3700_v44 = vld [vmem:[#allocation10 + $0x8] sm:$0xff] }
 0x1f2   :  { %1179 = vmatpush.bf16.msra.mxu2 %v3701_v43 }
 0x1f3   :  { %4245 = vtanh.f32 %v805_v46  ;;  %v3699_v46 = vld [vmem:[#allocation10] sm:$0xff] }
 0x1f6   :  { %1180 = vmatpush.bf16.msra.mxu2 %v3700_v44 }
 0x1f9   :  { %v4246_v48 = vpop.eup %4245 }
 0x1fa   :  { %v3946_v49 = vpack.c.bf16 %v4246_v48, %v4244_v47  ;;  %1181 = vmatpush.bf16.msra.mxu2 %v3699_v46  ;;  %v353_v47 = vadd.f32 %v4581_v36, %v4616_v26  ;;  %v351_v48 = vadd.f32 %v4581_v36, %v4613_v23  ;;  %v3713_v26 = vld [vmem:[#allocation10 + $0x30] sm:$0xff]  ;;  %v3712_v23 = vld [vmem:[#allocation10 + $0x28] sm:$0xff] }
 0x1fc   :  { %3947 = vst [vmem:[#allocation2 + $0x50] sm:$0xff] %v3946_v49   ;;  %926 = vmatmul.bf16.vlgmr.msra.gmra.mxu1 %v3946_v49  ;;  %v3862_v49 = vpack.c.bf16 %v353_v47, %v351_v48  ;;  %v4009_v47 = vunpack.c.l.bf16 %v4634_v59 }
 0x1fe   :  { %v3973_v51 = vunpack.c.l.bf16 %v3862_v49 }
 0x244   :  { %v692_v55 = vpop.f32.mrf.mxu1 }
 0x245   :  { %v697_v56 = vadd.f32 %v3923_v8, %v692_v55  ;;  %v3974_v55 = vunpack.c.h.bf16 %v3862_v49  ;;  %v4010_v49 = vunpack.c.h.bf16 %v4634_v59  ;;  %v3753_v59 = vld [vmem:[#allocation10 + $0x70] sm:$0xff] }
 0x247   :  { %4247 = vtanh.f32 %v697_v56 }
 0x24c   :  { %v694_v58 = vpop.f32.mrf.mxu1 }
 0x24d   :  { %v698_v60 = vadd.f32 %v3924_v57, %v694_v58  ;;  %v4248_v61 = vpop.eup %4247 }
 0x24f   :  { %4249 = vtanh.f32 %v698_v60 }
 0x255   :  { %v4250_v62 = vpop.eup %4249 }
 0x256   :  { %v3933_v63 = vpack.c.bf16 %v4250_v62, %v4248_v61  ;;  %v3714_v61 = vld [vmem:[#allocation10 + $0x38] sm:$0xff]  ;;  %v348_v62 = vadd.f32 %v4581_v36, %v4611_v20  ;;  %v3711_v20 = vld [vmem:[#allocation10 + $0x20] sm:$0xff] }
 0x257   :  { %1302 = vmatpush.bf16.msra.mxu1 %v3714_v61 }
 0x258   :  { %3934 = vst [vmem:[#allocation2 + $0x18] sm:$0xff] %v3933_v63   ;;  %819 = vmatmul.bf16.vlgmr.msrb.gmra.mxu3 %v3933_v63  ;;  %v346_v63 = vadd.f32 %v4581_v36, %v4609_v16  ;;  %v3710_v36 = vld [vmem:[#allocation10 + $0x18] sm:$0xff]  ;;  %v3709_v16 = vld [vmem:[#allocation10 + $0x10] sm:$0xff] }
 0x259   :  { %1195 = vmatpush.bf16.msrb.mxu3 %v3706_v29 }
 0x25a   :  { %v3857_v1 = vpack.c.bf16 %v348_v62, %v346_v63  ;;  %v3751_v62 = vld [vmem:[#allocation10 + $0x60] sm:$0xff]  ;;  %v3741_v63 = vld [vmem:[#allocation9 + $0x10] sm:$0xff] }
 0x25b   :  { %1303 = vmatpush.bf16.msra.mxu1 %v3713_v26 }
 0x25c   :  { %v3959_v4 = vunpack.c.l.bf16 %v3857_v1  ;;  %v3960_v2 = vunpack.c.h.bf16 %v3857_v1  ;;  %v3750_v1 = vld [vmem:[#allocation10 + $0x58] sm:$0xff] }
 0x25d   :  { %1196 = vmatpush.bf16.msrb.mxu3 %v3705_v14 }
 0x25f   :  { %1304 = vmatpush.bf16.msra.mxu1 %v3712_v23 }
 0x261   :  { %1197 = vmatpush.bf16.msrb.mxu3 %v3704_v13 }
 0x263   :  { %1305 = vmatpush.bf16.msra.mxu1 %v3711_v20 }
 0x265   :  { %1198 = vmatpush.bf16.msrb.mxu3 %v3703_v11  ;;  %v3719_v11 = vld [vmem:[#allocation10 + $0x20] sm:$0xff] }
 0x267   :  { %1306 = vmatpush.bf16.msra.mxu1 %v3710_v36 }
 0x269   :  { %1199 = vmatpush.bf16.msrb.mxu3 %v3702_v10  ;;  %v3718_v10 = vld [vmem:[#allocation10 + $0x18] sm:$0xff] }
 0x26b   :  { %1307 = vmatpush.bf16.msra.mxu1 %v3709_v16 }
 0x26d   :  { %1200 = vmatpush.bf16.msrb.mxu3 %v3701_v43  ;;  %v3717_v43 = vld [vmem:[#allocation10 + $0x10] sm:$0xff] }
 0x271   :  { %1201 = vmatpush.bf16.msrb.mxu3 %v3700_v44  ;;  %v3716_v44 = vld [vmem:[#allocation10 + $0x8] sm:$0xff] }
 0x275   :  { %1202 = vmatpush.bf16.msrb.mxu3 %v3699_v46 }
 0x279   :  { %v927_v15 = vpop.f32.mrf.mxu1 }
 0x27a   :  { %v932_v19 = vadd.f32 %v3955_v18, %v927_v15 }
 0x27c   :  { %4251 = vtanh.f32 %v932_v19  ;;  %v3708_v19 = vld [vmem:[#allocation10 + $0x8] sm:$0xff] }
 0x27d   :  { %1308 = vmatpush.bf16.msra.mxu1 %v3708_v19 }
 0x281   :  { %v929_v22 = vpop.f32.mrf.mxu1 }
 0x282   :  { %v933_v24 = vadd.f32 %v3956_v21, %v929_v22  ;;  %v4252_v25 = vpop.eup %4251  ;;  %v3707_v21 = vld [vmem:[#allocation10] sm:$0xff] }
 0x283   :  { %1309 = vmatpush.bf16.msra.mxu1 %v3707_v21 }
 0x284   :  { %4253 = vtanh.f32 %v933_v24  ;;  %v3991_v24 = vunpack.c.l.bf16 %v4626_v45 }
 0x28a   :  { %v4254_v27 = vpop.eup %4253 }
 0x28b   :  { %v3964_v28 = vpack.c.bf16 %v4254_v27, %v4252_v25  ;;  %v3992_v27 = vunpack.c.h.bf16 %v4626_v45  ;;  %v3977_v45 = vunpack.c.l.bf16 %v4620_v33 }
 0x28d   :  { %3965 = vst [vmem:[#allocation2 + $0x8] sm:$0xff] %v3964_v28   ;;  %1054 = vmatmul.bf16.vlgmr.msra.gmra.mxu3 %v3964_v28 }
 0x28e   :  { %1430 = vmatpush.bf16.msra.mxu3 %v3722_v31 }
 0x292   :  { %1431 = vmatpush.bf16.msra.mxu3 %v3721_v32 }
 0x2db   :  { %v820_v34 = vpop.f32.mrf.mxu3 }
 0x2dc   :  { %v825_v37 = vadd.f32 %v3941_v35, %v820_v34  ;;  %v3720_v34 = vld [vmem:[#allocation10 + $0x28] sm:$0xff] }
 0x2dd   :  { %1432 = vmatpush.bf16.msra.mxu3 %v3720_v34 }
 0x2de   :  { %4255 = vtanh.f32 %v825_v37 }
 0x2e1   :  { %1433 = vmatpush.bf16.msra.mxu3 %v3719_v11 }
 0x2e3   :  { %v822_v39 = vpop.f32.mrf.mxu3 }
 0x2e4   :  { %v826_v54 = vadd.f32 %v3942_v38, %v822_v39  ;;  %v4256_v40 = vpop.eup %4255  ;;  %v3978_v38 = vunpack.c.h.bf16 %v4620_v33  ;;  %v3715_v33 = vld [vmem:[#allocation10] sm:$0xff] }
 0x2e5   :  { %1434 = vmatpush.bf16.msra.mxu3 %v3718_v10 }
 0x2e6   :  { %4257 = vtanh.f32 %v826_v54 }
 0x2e9   :  { %1435 = vmatpush.bf16.msra.mxu3 %v3717_v43 }
 0x2ec   :  { %v4258_v41 = vpop.eup %4257 }
 0x2ed   :  { %v3951_v42 = vpack.c.bf16 %v4258_v41, %v4256_v40  ;;  %1436 = vmatpush.bf16.msra.mxu3 %v3716_v44 }
 0x2ef   :  { %3952 = vst [vmem:[#allocation2 + $0x68] sm:$0xff] %v3951_v42   ;;  %947 = vmatmul.bf16.vlgmr.msrb.gmra.mxu2 %v3951_v42 }
 0x2f0   :  { %1323 = vmatpush.bf16.msrb.mxu2 %v3714_v61  ;;  %v3743_v61 = vld [vmem:[#allocation9 + $0x20] sm:$0xff] }
 0x2f1   :  { %1437 = vmatpush.bf16.msra.mxu3 %v3715_v33 }
 0x2f4   :  { %1324 = vmatpush.bf16.msrb.mxu2 %v3713_v26  ;;  %v3752_v26 = vld [vmem:[#allocation10 + $0x68] sm:$0xff] }
 0x2f8   :  { %1325 = vmatpush.bf16.msrb.mxu2 %v3712_v23  ;;  %v3742_v23 = vld [vmem:[#allocation9 + $0x18] sm:$0xff] }
 0x2fc   :  { %1326 = vmatpush.bf16.msrb.mxu2 %v3711_v20 }
 0x300   :  { %1327 = vmatpush.bf16.msrb.mxu2 %v3710_v36 }
 0x304   :  { %1328 = vmatpush.bf16.msrb.mxu2 %v3709_v16 }
 0x308   :  { %1329 = vmatpush.bf16.msrb.mxu2 %v3708_v19 }
 0x30c   :  { %1330 = vmatpush.bf16.msrb.mxu2 %v3707_v21 }
 0x310   :  { %v1055_v50 = vpop.f32.mrf.mxu3 }
 0x311   :  { %v1060_v52 = vadd.f32 %v3973_v51, %v1055_v50 }
 0x313   :  { %4259 = vtanh.f32 %v1060_v52 }
 0x318   :  { %v1057_v8 = vpop.f32.mrf.mxu3 }
 0x319   :  { %v1061_v56 = vadd.f32 %v3974_v55, %v1057_v8  ;;  %v4260_v57 = vpop.eup %4259 }
 0x31b   :  { %4261 = vtanh.f32 %v1061_v56  ;;  %v3746_v56 = vld [vmem:[#allocation9 + $0x38] sm:$0xff] }
 0x321   :  { %v4262_v58 = vpop.eup %4261 }
 0x322   :  { %v3982_v60 = vpack.c.bf16 %v4262_v58, %v4260_v57  ;;  %v3745_v57 = vld [vmem:[#allocation9 + $0x30] sm:$0xff]  ;;  %v3754_v58 = vld [vmem:[#allocation10 + $0x78] sm:$0xff] }
 0x324   :  { %3983 = vst [vmem:[#allocation2 + $0x40] sm:$0xff] %v3982_v60   ;;  %1182 = vmatmul.bf16.vlgmr.msra.gmra.mxu2 %v3982_v60  ;;  %v3744_v60 = vld [vmem:[#allocation9 + $0x28] sm:$0xff] }
 0x325   :  { %1678 = vmatpush.bf16.msra.mxu2 %v3746_v56  ;;  %v4684_v56 = vld [vmem:[%s4804_s4 + $0x1] ss:$0 sm:$0xff] }
 0x329   :  { %1679 = vmatpush.bf16.msra.mxu2 %v3745_v57 }
 0x32d   :  { %1680 = vmatpush.bf16.msra.mxu2 %v3744_v60 }
 0x331   :  { %1681 = vmatpush.bf16.msra.mxu2 %v3743_v61 }
 0x335   :  { %1682 = vmatpush.bf16.msra.mxu2 %v3742_v23 }
 0x339   :  { %1683 = vmatpush.bf16.msra.mxu2 %v3741_v63 }
 0x372   :  { %v948_v3 = vpop.f32.mrf.mxu2 }
 0x373   :  { %v953_v5 = vadd.f32 %v3959_v4, %v948_v3  ;;  %v3740_v3 = vld [vmem:[#allocation9 + $0x8] sm:$0xff]  ;;  %v3739_v4 = vld [vmem:[#allocation9] sm:$0xff] }
 0x374   :  { %1684 = vmatpush.bf16.msra.mxu2 %v3740_v3 }
 0x375   :  { %4263 = vtanh.f32 %v953_v5  ;;  %v3749_v5 = vld [vmem:[#allocation10 + $0x50] sm:$0xff] }
 0x378   :  { %1685 = vmatpush.bf16.msra.mxu2 %v3739_v4 }
 0x37a   :  { %v950_v7 = vpop.f32.mrf.mxu2 }
 0x37b   :  { %v954_v9 = vadd.f32 %v3960_v2, %v950_v7  ;;  %v4264_v12 = vpop.eup %4263  ;;  %v3748_v7 = vld [vmem:[#allocation10 + $0x48] sm:$0xff] }
 0x37d   :  { %4265 = vtanh.f32 %v954_v9  ;;  %v3995_v9 = vunpack.c.l.bf16 %v4630_v53 }
 0x383   :  { %v4266_v15 = vpop.eup %4265 }
 0x384   :  { %v3969_v18 = vpack.c.bf16 %v4266_v15, %v4264_v12  ;;  %v3747_v12 = vld [vmem:[#allocation10 + $0x40] sm:$0xff] }
 0x386   :  { %3970 = vst [vmem:[#allocation2 + $0x48] sm:$0xff] %v3969_v18   ;;  %1075 = vmatmul.bf16.vlgmr.msrb.gmra.mxu1 %v3969_v18  ;;  %v3996_v18 = vunpack.c.h.bf16 %v4630_v53  ;;  %v4027_v53 = vunpack.c.l.bf16 %v4642_v6 }
 0x387   :  { %1451 = vmatpush.bf16.msrb.mxu1 %v3722_v31 }
 0x38b   :  { %1452 = vmatpush.bf16.msrb.mxu1 %v3721_v32 }
 0x38f   :  { %1453 = vmatpush.bf16.msrb.mxu1 %v3720_v34  ;;  %v3726_v34 = vld [vmem:[#allocation2 + $0x18] sm:$0xff] }
 0x393   :  { %1454 = vmatpush.bf16.msrb.mxu1 %v3719_v11 }
 0x397   :  { %1455 = vmatpush.bf16.msrb.mxu1 %v3718_v10  ;;  %v3756_v10 = vld [vmem:[#allocation10 + $0x48] sm:$0xff] }
 0x39b   :  { %1456 = vmatpush.bf16.msrb.mxu1 %v3717_v43  ;;  %v4013_v43 = vunpack.c.l.bf16 %v4638_v0 }
 0x39f   :  { %1457 = vmatpush.bf16.msrb.mxu1 %v3716_v44 }
 0x3a3   :  { %1458 = vmatpush.bf16.msrb.mxu1 %v3715_v33  ;;  %v3755_v33 = vld [vmem:[#allocation10 + $0x40] sm:$0xff] }
 0x3a7   :  { %v1183_v22 = vpop.f32.mrf.mxu2 }
 0x3a8   :  { %v1188_v25 = vadd.f32 %v3991_v24, %v1183_v22  ;;  %v3723_v22 = vld [vmem:[#allocation2 + $0x30] sm:$0xff]  ;;  %v3724_v24 = vld [vmem:[#allocation2] sm:$0xff] }
 0x3aa   :  { %4267 = vtanh.f32 %v1188_v25 }
 0x3af   :  { %v1185_v28 = vpop.f32.mrf.mxu2 }
 0x3b0   :  { %v1189_v29 = vadd.f32 %v3992_v27, %v1185_v28  ;;  %v4268_v14 = vpop.eup %4267  ;;  %v4028_v28 = vunpack.c.h.bf16 %v4642_v6  ;;  %v3761_v6 = vld [vmem:[#allocation10 + $0x70] sm:$0xff] }
 0x3b2   :  { %4269 = vtanh.f32 %v1189_v29 }
 0x3b8   :  { %v4270_v13 = vpop.eup %4269 }
 0x3b9   :  { %v4000_v30 = vpack.c.bf16 %v4270_v13, %v4268_v14  ;;  %v3725_v13 = vld [vmem:[#allocation2 + $0x58] sm:$0xff] }
 0x3bb   :  { %4001 = vst [vmem:[#allocation2 + $0x10] sm:$0xff] %v4000_v30   ;;  %1310 = vmatmul.bf16.vlgmr.msra.gmra.mxu1 %v4000_v30 }
 0x3bc   :  { %1932 = vmatpush.bf16.msra.mxu1 %v3754_v58 }
 0x3c0   :  { %1933 = vmatpush.bf16.msra.mxu1 %v3753_v59 }
 0x3c4   :  { %1934 = vmatpush.bf16.msra.mxu1 %v3752_v26 }
 0x3c8   :  { %1935 = vmatpush.bf16.msra.mxu1 %v3751_v62 }
 0x3cc   :  { %1936 = vmatpush.bf16.msra.mxu1 %v3750_v1 }
 0x3d0   :  { %1937 = vmatpush.bf16.msra.mxu1 %v3749_v5 }
 0x3d4   :  { %1938 = vmatpush.bf16.msra.mxu1 %v3748_v7 }
 0x3d8   :  { %1939 = vmatpush.bf16.msra.mxu1 %v3747_v12 }
 0x403   :  { %v1076_v35 = vpop.f32.mrf.mxu1 }
 0x404   :  { %v1081_v37 = vadd.f32 %v3977_v45, %v1076_v35  ;;  %v3727_v35 = vld [vmem:[#allocation2 + $0x50] sm:$0xff]  ;;  %v3728_v45 = vld [vmem:[#allocation2 + $0x68] sm:$0xff] }
 0x406   :  { %4271 = vtanh.f32 %v1081_v37  ;;  %v3762_v37 = vld [vmem:[#allocation10 + $0x78] sm:$0xff] }
 0x40b   :  { %v1078_v39 = vpop.f32.mrf.mxu1 }
 0x40c   :  { %v1082_v54 = vadd.f32 %v3978_v38, %v1078_v39  ;;  %v4272_v40 = vpop.eup %4271  ;;  %v3729_v38 = vld [vmem:[#allocation2 + $0x8] sm:$0xff] }
 0x40d   :  { %v3760_v39 = vld [vmem:[#allocation10 + $0x68] sm:$0xff] }
 0x40e   :  { %4273 = vtanh.f32 %v1082_v54  ;;  %v3759_v54 = vld [vmem:[#allocation10 + $0x60] sm:$0xff] }
 0x414   :  { %v4274_v41 = vpop.eup %4273 }
 0x415   :  { %v3987_v42 = vpack.c.bf16 %v4274_v41, %v4272_v40  ;;  %v3758_v40 = vld [vmem:[#allocation10 + $0x58] sm:$0xff]  ;;  %v3730_v41 = vld [vmem:[#allocation2 + $0x48] sm:$0xff] }
 0x417   :  { %3988 = vst [vmem:[#allocation2 + $0x20] sm:$0xff] %v3987_v42   ;;  %1203 = vmatmul.bf16.vlgmr.msrb.gmra.mxu3 %v3987_v42  ;;  %v3757_v42 = vld [vmem:[#allocation10 + $0x50] sm:$0xff] }
 0x418   :  { %1911 = vmatpush.bf16.msrb.mxu3 %v3754_v58 }
 0x41c   :  { %1912 = vmatpush.bf16.msrb.mxu3 %v3753_v59 }
 0x41e   :  { %v3732_v61 = vld [vmem:[#allocation2 + $0x20] sm:$0xff] }
 0x420   :  { %1913 = vmatpush.bf16.msrb.mxu3 %v3752_v26 }
 0x424   :  { %1914 = vmatpush.bf16.msrb.mxu3 %v3751_v62 }
 0x428   :  { %1915 = vmatpush.bf16.msrb.mxu3 %v3750_v1 }
 0x42c   :  { %1916 = vmatpush.bf16.msrb.mxu3 %v3749_v5 }
 0x430   :  { %1917 = vmatpush.bf16.msrb.mxu3 %v3748_v7 }
 0x434   :  { %1918 = vmatpush.bf16.msrb.mxu3 %v3747_v12 }
 0x438   :  { %v1311_v46 = vpop.f32.mrf.mxu1 }
 0x439   :  { %v1316_v48 = vadd.f32 %v4009_v47, %v1311_v46  ;;  %v4014_v46 = vunpack.c.h.bf16 %v4638_v0 }
 0x43b   :  { %4275 = vtanh.f32 %v1316_v48 }
 0x440   :  { %v1313_v50 = vpop.f32.mrf.mxu1 }
 0x441   :  { %v1317_v51 = vadd.f32 %v4010_v49, %v1313_v50  ;;  %v4276_v52 = vpop.eup %4275  ;;  %v3731_v49 = vld [vmem:[#allocation2 + $0x40] sm:$0xff] }
 0x443   :  { %4277 = vtanh.f32 %v1317_v51 }
 0x449   :  { %v4278_v55 = vpop.eup %4277 }
 0x44a   :  { %v4018_v8 = vpack.c.bf16 %v4278_v55, %v4276_v52 }
 0x44c   :  { %4019 = vst [vmem:[#allocation2 + $0x60] sm:$0xff] %v4018_v8   ;;  %1438 = vmatmul.bf16.vlgmr.msra.gmra.mxu3 %v4018_v8 }
 0x44d   :  { %2029 = vmatpush.bf16.msra.mxu3 %v3762_v37 }
 0x451   :  { %2030 = vmatpush.bf16.msra.mxu3 %v3761_v6 }
 0x455   :  { %2031 = vmatpush.bf16.msra.mxu3 %v3760_v39 }
 0x459   :  { %2032 = vmatpush.bf16.msra.mxu3 %v3759_v54 }
 0x45c   :  { %1919 = vmatmul.bf16.vlgmr.msrb.gmra.mxu3 %v4518_v17 }
 0x45d   :  { %2033 = vmatpush.bf16.msra.mxu3 %v3758_v40 }
 0x461   :  { %2034 = vmatpush.bf16.msra.mxu3 %v3757_v42 }
 0x465   :  { %2035 = vmatpush.bf16.msra.mxu3 %v3756_v10 }
 0x469   :  { %2036 = vmatpush.bf16.msra.mxu3 %v3755_v33 }
 0x49a   :  { %v1204_v2 = vpop.f32.mrf.mxu3 }
 0x49b   :  { %v1209_v15 = vadd.f32 %v3995_v9, %v1204_v2 }
 0x49d   :  { %4279 = vtanh.f32 %v1209_v15  ;;  %v3733_v15 = vld [vmem:[#allocation2 + $0x10] sm:$0xff] }
 0x4a2   :  { %v1206_v20 = vpop.f32.mrf.mxu3 }
 0x4a3   :  { %v1210_v36 = vadd.f32 %v3996_v18, %v1206_v20  ;;  %v4280_v16 = vpop.eup %4279 }
 0x4a5   :  { %4281 = vtanh.f32 %v1210_v36 }
 0x4ab   :  { %v4282_v19 = vpop.eup %4281 }
 0x4ac   :  { %v4005_v21 = vpack.c.bf16 %v4282_v19, %v4280_v16 }
 0x4ae   :  { %4006 = vst [vmem:[#allocation2 + $0x38] sm:$0xff] %v4005_v21   ;;  %1331 = vmatmul.bf16.vlgmr.msrb.gmra.mxu2 %v4005_v21 }
 0x4b5   :  { %v3734_v19 = vld [vmem:[#allocation2 + $0x38] sm:$0xff] }
 0x4be   :  { %1686 = vmatmul.bf16.vlgmr.msra.gmra.mxu2 %v3723_v22 }
 0x4ce   :  { %1691 = vmatmul.bf16.gmra.mxu2 %v3724_v24 }
 0x4cf   :  { %v1439_v25 = vpop.f32.mrf.mxu3 }
 0x4d0   :  { %v1444_v27 = vadd.f32 %v4027_v53, %v1439_v25 }
 0x4d2   :  { %4283 = vtanh.f32 %v1444_v27  ;;  %v3735_v27 = vld [vmem:[#allocation2 + $0x60] sm:$0xff] }
 0x4d7   :  { %v1441_v29 = vpop.f32.mrf.mxu3 }
 0x4d8   :  { %v1445_v14 = vadd.f32 %v4028_v28, %v1441_v29  ;;  %v4284_v30 = vpop.eup %4283 }
 0x4da   :  { %4285 = vtanh.f32 %v1445_v14 }
 0x4de   :  { %1696 = vmatmul.bf16.gmra.mxu2 %v3725_v13 }
 0x4df   :  { %v1920_v8 = vpop.f32.mrf.mxu3 }
 0x4e0   :  { %v4286_v31 = vpop.eup %4285 }
 0x4e1   :  { %v4036_v32 = vpack.c.bf16 %v4286_v31, %v4284_v30 }
 0x4e3   :  { %4037 = vst [vmem:[#allocation2 + $0x78] sm:$0xff] %v4036_v32  }
 0x4e7   :  { %v1922_v59 = vpop.f32.mrf.mxu3 }
 0x4ee   :  { %1701 = vmatmul.bf16.gmra.mxu2 %v3726_v34 }
 0x4fe   :  { %1706 = vmatmul.bf16.gmra.mxu2 %v3727_v35 }
 0x50e   :  { %1711 = vmatmul.bf16.gmra.mxu2 %v3728_v45 }
 0x51e   :  { %1716 = vmatmul.bf16.gmra.mxu2 %v3729_v38  ;;  %v3737_v38 = vld [vmem:[#allocation2 + $0x78] sm:$0xff] }
 0x52e   :  { %1721 = vmatmul.bf16.gmra.mxu2 %v3730_v41 }
 0x531   :  { %v1332_v11 = vpop.f32.mrf.mxu2 }
 0x532   :  { %v1337_v44 = vadd.f32 %v4013_v43, %v1332_v11  ;;  %v3770_v11 = vld [vmem:[#allocation10 + $0x78] sm:$0xff] }
 0x533   :  { %2147 = vmatpush.bf16.msrb.mxu3 %v3770_v11  ;;  %2168 = vmatpush.bf16.msra.mxu0 %v3770_v11 }
 0x534   :  { %4287 = vtanh.f32 %v1337_v44 }
 0x539   :  { %v1334_v47 = vpop.f32.mrf.mxu2 }
 0x53a   :  { %v1338_v48 = vadd.f32 %v4014_v46, %v1334_v47  ;;  %v4288_v50 = vpop.eup %4287  ;;  %v3768_v46 = vld [vmem:[#allocation10 + $0x68] sm:$0xff] }
 0x53c   :  { %4289 = vtanh.f32 %v1338_v48  ;;  %v3767_v48 = vld [vmem:[#allocation10 + $0x60] sm:$0xff] }
 0x53e   :  { %1726 = vmatmul.bf16.gmra.mxu2 %v3731_v49 }
 0x541   :  { %v1687_v51 = vpop.f32.mrf.mxu2 }
 0x542   :  { %v4290_v52 = vpop.eup %4289  ;;  %v1688_v57 = vadd.f32 %v4684_v56, %v1687_v51  ;;  %v3766_v51 = vld [vmem:[#allocation10 + $0x58] sm:$0xff] }
 0x543   :  { %v4023_v55 = vpack.c.bf16 %v4290_v52, %v4288_v50  ;;  %v4030_v52 = vld [vmem:[#allocation2 + $0x28] sm:$0xff]  }
 0x545   :  { %4024 = vst [vmem:[#allocation2 + $0x70] sm:$0xff] %v4023_v55   ;;  %1459 = vmatmul.bf16.vlgmr.msrb.gmra.mxu1 %v4023_v55  ;;  %v4031_v55 = vunpack.c.l.bf16 %v4030_v52 }
 0x546   :  { %2050 = vmatpush.bf16.msrb.mxu1 %v3762_v37 }
 0x549   :  { %v1689_v0 = vpop.f32.mrf.mxu2 }
 0x54a   :  { %v1690_v58 = vadd.f32 %v4684_v56, %v1689_v0  ;;  %2051 = vmatpush.bf16.msrb.mxu1 %v3761_v6 }
 0x54c   :  { %v4046_v60 = vpack.c.bf16 %v1690_v58, %v1688_v57  ;;  %v3736_v31 = vld [vmem:[#allocation2 + $0x70] sm:$0xff]  ;;  %v4032_v58 = vunpack.c.h.bf16 %v4030_v52 }
 0x54e   :  { %4047 = vst [vmem:[#allocation2 + $0x30] sm:$0xff] %v4046_v60   ;;  %1731 = vmatmul.bf16.gmra.mxu2 %v3732_v61  ;;  %v4125_v26 = vunpack.c.l.bf16 %v4046_v60  ;;  %v4126_v23 = vunpack.c.h.bf16 %v4046_v60  ;;  %2052 = vmatpush.bf16.msrb.mxu1 %v3760_v39 }
 0x550   :  { %v1925_v62 = vadd.f32 %v4125_v26, %v1920_v8  ;;  %v1926_v63 = vadd.f32 %v4126_v23, %v1922_v59  ;;  %v3765_v8 = vld [vmem:[#allocation10 + $0x50] sm:$0xff]  ;;  %v3764_v26 = vld [vmem:[#allocation10 + $0x48] sm:$0xff] }
 0x551   :  { %v1692_v1 = vpop.f32.mrf.mxu2 }
 0x552   :  { %4291 = vtanh.f32 %v1925_v62  ;;  %2053 = vmatpush.bf16.msrb.mxu1 %v3759_v54  ;;  %v1693_v2 = vadd.f32 %v4684_v56, %v1692_v1 }
 0x553   :  { %4293 = vtanh.f32 %v1926_v63  ;;  %v3763_v63 = vld [vmem:[#allocation10 + $0x40] sm:$0xff] }
 0x555   :  { %1940 = vmatmul.bf16.vlgmr.msra.gmra.mxu1 %v4518_v17 }
 0x556   :  { %2054 = vmatpush.bf16.msrb.mxu1 %v3758_v40 }
 0x558   :  { %v4292_v3 = vpop.eup %4291 }
 0x559   :  { %v4294_v4 = vpop.eup %4293  ;;  %v1694_v5 = vpop.f32.mrf.mxu2 }
 0x55a   :  { %v1695_v7 = vadd.f32 %v4684_v56, %v1694_v5  ;;  %v1964_v9 = vpack.c.bf16 %v4294_v4, %v4292_v3  ;;  %2055 = vmatpush.bf16.msrb.mxu1 %v3757_v42 }
 0x55c   :  { %v4691_v12 = vpack.c.bf16 %v1695_v7, %v1693_v2  ;;  %2037 = vmatmul.bf16.vlgmr.msra.gmra.mxu3 %v1964_v9 }
 0x55e   :  { %4202 = vst [vmem:[#allocation2] sm:$0xff] %v4691_v12   ;;  %1736 = vmatmul.bf16.gmra.mxu2 %v3733_v15  ;;  %2056 = vmatpush.bf16.msrb.mxu1 %v3756_v10  ;;  %v3769_v10 = vld [vmem:[#allocation10 + $0x70] sm:$0xff]  ;;  %v4129_v7 = vunpack.c.l.bf16 %v4691_v12 }
 0x55f   :  { %2148 = vmatpush.bf16.msrb.mxu3 %v3769_v10  ;;  %2169 = vmatpush.bf16.msra.mxu0 %v3769_v10 }
 0x561   :  { %v1697_v18 = vpop.f32.mrf.mxu2 }
 0x562   :  { %2057 = vmatpush.bf16.msrb.mxu1 %v3755_v33  ;;  %v1698_v20 = vadd.f32 %v4684_v56, %v1697_v18  ;;  %v4130_v18 = vunpack.c.h.bf16 %v4691_v12 }
 0x563   :  { %2149 = vmatpush.bf16.msrb.mxu3 %v3768_v46  ;;  %2170 = vmatpush.bf16.msra.mxu0 %v3768_v46 }
 0x567   :  { %2150 = vmatpush.bf16.msrb.mxu3 %v3767_v48  ;;  %2171 = vmatpush.bf16.msra.mxu0 %v3767_v48 }
 0x569   :  { %v1699_v17 = vpop.f32.mrf.mxu2 }
 0x56a   :  { %v1700_v36 = vadd.f32 %v4684_v56, %v1699_v17 }
 0x56b   :  { %2151 = vmatpush.bf16.msrb.mxu3 %v3766_v51  ;;  %2172 = vmatpush.bf16.msra.mxu0 %v3766_v51 }
 0x56c   :  { %v4696_v16 = vpack.c.bf16 %v1700_v36, %v1698_v20 }
 0x56e   :  { %4203 = vst [vmem:[#allocation2 + $0x58] sm:$0xff] %v4696_v16   ;;  %1741 = vmatmul.bf16.gmra.mxu2 %v3734_v19  ;;  %v4133_v12 = vunpack.c.l.bf16 %v4696_v16 }
 0x56f   :  { %2152 = vmatpush.bf16.msrb.mxu3 %v3765_v8  ;;  %2173 = vmatpush.bf16.msra.mxu0 %v3765_v8 }
 0x571   :  { %v1702_v21 = vpop.f32.mrf.mxu2 }
 0x572   :  { %v1703_v24 = vadd.f32 %v4684_v56, %v1702_v21 }
 0x573   :  { %2153 = vmatpush.bf16.msrb.mxu3 %v3764_v26  ;;  %2174 = vmatpush.bf16.msra.mxu0 %v3764_v26  ;;  %v3776_v26 = vld [vmem:[#allocation10 + $0x68] sm:$0xff] }
 0x577   :  { %2154 = vmatpush.bf16.msrb.mxu3 %v3763_v63  ;;  %2175 = vmatpush.bf16.msra.mxu0 %v3763_v63  ;;  %v3774_v63 = vld [vmem:[#allocation10 + $0x58] sm:$0xff] }
 0x579   :  { %v1704_v22 = vpop.f32.mrf.mxu2 }
 0x57a   :  { %v1705_v25 = vadd.f32 %v4684_v56, %v1704_v22 }
 0x57c   :  { %v4701_v53 = vpack.c.bf16 %v1705_v25, %v1703_v24 }
 0x57e   :  { %4204 = vst [vmem:[#allocation2 + $0x18] sm:$0xff] %v4701_v53   ;;  %1746 = vmatmul.bf16.gmra.mxu2 %v3735_v27 }
 0x581   :  { %v1707_v28 = vpop.f32.mrf.mxu2 }
 0x582   :  { %v1708_v14 = vadd.f32 %v4684_v56, %v1707_v28 }
 0x589   :  { %v1709_v29 = vpop.f32.mrf.mxu2 }
 0x58a   :  { %v1710_v13 = vadd.f32 %v4684_v56, %v1709_v29 }
 0x58c   :  { %v4706_v30 = vpack.c.bf16 %v1710_v13, %v1708_v14  ;;  %v4134_v13 = vunpack.c.h.bf16 %v4696_v16 }
 0x58e   :  { %4205 = vst [vmem:[#allocation2 + $0x50] sm:$0xff] %v4706_v30   ;;  %1751 = vmatmul.bf16.gmra.mxu2 %v3736_v31 }
 0x591   :  { %v1712_v32 = vpop.f32.mrf.mxu2 }
 0x592   :  { %v1713_v35 = vadd.f32 %v4684_v56, %v1712_v32 }
 0x599   :  { %v1714_v34 = vpop.f32.mrf.mxu2 }
 0x59a   :  { %v1715_v45 = vadd.f32 %v4684_v56, %v1714_v34 }
 0x59c   :  { %v4711_v37 = vpack.c.bf16 %v1715_v45, %v1713_v35 }
 0x59e   :  { %4206 = vst [vmem:[#allocation2 + $0x68] sm:$0xff] %v4711_v37   ;;  %1756 = vmatmul.bf16.gmra.mxu2 %v3737_v38 }
 0x5a1   :  { %v1717_v6 = vpop.f32.mrf.mxu2 }
 0x5a2   :  { %v1718_v54 = vadd.f32 %v4684_v56, %v1717_v6 }
 0x5a9   :  { %v1719_v39 = vpop.f32.mrf.mxu2 }
 0x5aa   :  { %v1720_v40 = vadd.f32 %v4684_v56, %v1719_v39 }
 0x5ac   :  { %v4716_v41 = vpack.c.bf16 %v1720_v40, %v1718_v54 }
 0x5ae   :  { %4207 = vst [vmem:[#allocation2 + $0x8] sm:$0xff] %v4716_v41  }
 0x5b1   :  { %v1722_v42 = vpop.f32.mrf.mxu2 }
 0x5b2   :  { %v1723_v44 = vadd.f32 %v4684_v56, %v1722_v42 }
 0x5b9   :  { %v1724_v43 = vpop.f32.mrf.mxu2 }
 0x5ba   :  { %v1725_v33 = vadd.f32 %v4684_v56, %v1724_v43 }
 0x5bc   :  { %v4721_v47 = vpack.c.bf16 %v1725_v33, %v1723_v44 }
 0x5be   :  { %4208 = vst [vmem:[#allocation2 + $0x48] sm:$0xff] %v4721_v47  }
 0x5c1   :  { %v1727_v49 = vpop.f32.mrf.mxu2 }
 0x5c2   :  { %v1460_v50 = vpop.f32.mrf.mxu1  ;;  %v1728_v60 = vadd.f32 %v4684_v56, %v1727_v49 }
 0x5c3   :  { %v1465_v0 = vadd.f32 %v4031_v55, %v1460_v50 }
 0x5c5   :  { %4295 = vtanh.f32 %v1465_v0 }
 0x5c9   :  { %v1729_v57 = vpop.f32.mrf.mxu2 }
 0x5ca   :  { %v1730_v61 = vadd.f32 %v4684_v56, %v1729_v57  ;;  %v1462_v59 = vpop.f32.mrf.mxu1 }
 0x5cb   :  { %v1466_v23 = vadd.f32 %v4032_v58, %v1462_v59  ;;  %v4296_v3 = vpop.eup %4295  ;;  %v3777_v59 = vld [vmem:[#allocation10 + $0x70] sm:$0xff] }
 0x5cc   :  { %v4726_v62 = vpack.c.bf16 %v1730_v61, %v1728_v60  ;;  %v3778_v61 = vld [vmem:[#allocation10 + $0x78] sm:$0xff] }
 0x5cd   :  { %4297 = vtanh.f32 %v1466_v23  ;;  %2265 = vmatpush.bf16.msra.mxu1 %v3778_v61  ;;  %2286 = vmatpush.bf16.msra.mxu3 %v3778_v61  ;;  %v3775_v23 = vld [vmem:[#allocation10 + $0x60] sm:$0xff] }
 0x5ce   :  { %4209 = vst [vmem:[#allocation2 + $0x40] sm:$0xff] %v4726_v62  }
 0x5d1   :  { %v1732_v1 = vpop.f32.mrf.mxu2  ;;  %2266 = vmatpush.bf16.msra.mxu1 %v3777_v59  ;;  %2287 = vmatpush.bf16.msra.mxu3 %v3777_v59 }
 0x5d2   :  { %v1941_v4 = vpop.f32.mrf.mxu1  ;;  %v1733_v17 = vadd.f32 %v4684_v56, %v1732_v1  ;;  %v3773_v1 = vld [vmem:[#allocation10 + $0x50] sm:$0xff] }
 0x5d3   :  { %v4298_v5 = vpop.eup %4297  ;;  %v1946_v9 = vadd.f32 %v4129_v7, %v1941_v4  ;;  %v4137_v7 = vunpack.c.l.bf16 %v4701_v53 }
 0x5d4   :  { %v4041_v2 = vpack.c.bf16 %v4298_v5, %v4296_v3  ;;  %v3772_v3 = vld [vmem:[#allocation10 + $0x48] sm:$0xff] }
 0x5d5   :  { %4299 = vtanh.f32 %v1946_v9  ;;  %2267 = vmatpush.bf16.msra.mxu1 %v3776_v26  ;;  %2288 = vmatpush.bf16.msra.mxu3 %v3776_v26  ;;  %v3794_v26 = vld [vmem:[#allocation10 + $0x78] sm:$0xff] }
 0x5d6   :  { %4042 = vst [vmem:[#allocation2 + $0x28] sm:$0xff] %v4041_v2   ;;  %v3771_v2 = vld [vmem:[#allocation10 + $0x40] sm:$0xff] }
 0x5d9   :  { %v1734_v15 = vpop.f32.mrf.mxu2  ;;  %2268 = vmatpush.bf16.msra.mxu1 %v3775_v23  ;;  %2289 = vmatpush.bf16.msra.mxu3 %v3775_v23  ;;  %v3793_v23 = vld [vmem:[#allocation10 + $0x70] sm:$0xff] }
 0x5da   :  { %v1735_v20 = vadd.f32 %v4684_v56, %v1734_v15  ;;  %v1943_v36 = vpop.f32.mrf.mxu1 }
 0x5db   :  { %v1947_v19 = vadd.f32 %v4130_v18, %v1943_v36  ;;  %v4300_v27 = vpop.eup %4299  ;;  %v4138_v18 = vunpack.c.h.bf16 %v4701_v53 }
 0x5dc   :  { %v4733_v21 = vpack.c.bf16 %v1735_v20, %v1733_v17 }
 0x5dd   :  { %4301 = vtanh.f32 %v1947_v19  ;;  %v3738_v22 = vld [vmem:[#allocation2 + $0x28] sm:$0xff]  ;;  %2269 = vmatpush.bf16.msra.mxu1 %v3774_v63  ;;  %2290 = vmatpush.bf16.msra.mxu3 %v3774_v63 }
 0x5de   :  { %4210 = vst [vmem:[#allocation2 + $0x20] sm:$0xff] %v4733_v21   ;;  %1761 = vmatmul.bf16.gmra.mxu2 %v3738_v22  ;;  %v3792_v63 = vld [vmem:[#allocation10 + $0x68] sm:$0xff] }
 0x5df   :  { %v2038_v24 = vpop.f32.mrf.mxu3 }
 0x5e0   :  { %v2043_v14 = vadd.f32 %v4133_v12, %v2038_v24  ;;  %v4141_v12 = vunpack.c.l.bf16 %v4706_v30 }
 0x5e1   :  { %v1737_v25 = vpop.f32.mrf.mxu2  ;;  %2270 = vmatpush.bf16.msra.mxu1 %v3773_v1  ;;  %2291 = vmatpush.bf16.msra.mxu3 %v3773_v1  ;;  %v3791_v1 = vld [vmem:[#allocation10 + $0x60] sm:$0xff] }
 0x5e2   :  { %4303 = vtanh.f32 %v2043_v14  ;;  %v1738_v35 = vadd.f32 %v4684_v56, %v1737_v25 }
 0x5e3   :  { %v4302_v28 = vpop.eup %4301 }
 0x5e4   :  { %v2049_v29 = vpack.c.bf16 %v4302_v28, %v4300_v27 }
 0x5e5   :  { %2271 = vmatpush.bf16.msra.mxu1 %v3772_v3  ;;  %2292 = vmatpush.bf16.msra.mxu3 %v3772_v3  ;;  %v3789_v3 = vld [vmem:[#allocation10 + $0x50] sm:$0xff] }
 0x5e6   :  { %2058 = vmatmul.bf16.vlgmr.msrb.gmra.mxu1 %v2049_v29  ;;  %v4142_v29 = vunpack.c.h.bf16 %v4706_v30  ;;  %v3782_v30 = vld [vmem:[#allocation10 + $0x58] sm:$0xff] }
 0x5e7   :  { %v2040_v31 = vpop.f32.mrf.mxu3 }
 0x5e8   :  { %v2044_v32 = vadd.f32 %v4134_v13, %v2040_v31  ;;  %v4304_v6 = vpop.eup %4303 }
 0x5e9   :  { %v1739_v34 = vpop.f32.mrf.mxu2  ;;  %2272 = vmatpush.bf16.msra.mxu1 %v3771_v2  ;;  %2293 = vmatpush.bf16.msra.mxu3 %v3771_v2 }
 0x5ea   :  { %v1740_v45 = vadd.f32 %v4684_v56, %v1739_v34  ;;  %4305 = vtanh.f32 %v2044_v32  ;;  %v3786_v34 = vld [vmem:[#allocation10 + $0x78] sm:$0xff] }
 0x5eb   :  { %2383 = vmatpush.bf16.msrb.mxu0 %v3786_v34 }
 0x5ec   :  { %v4740_v38 = vpack.c.bf16 %v1740_v45, %v1738_v35  ;;  %v3785_v35 = vld [vmem:[#allocation10 + $0x70] sm:$0xff]  ;;  %v3784_v45 = vld [vmem:[#allocation10 + $0x68] sm:$0xff] }
 0x5ed   :  { %2404 = vmatpush.bf16.msrb.mxu1 %v3786_v34  ;;  %v3797_v34 = vld [vmem:[#allocation10 + $0x50] sm:$0xff] }
 0x5ee   :  { %4211 = vst [vmem:[#allocation2 + $0x10] sm:$0xff] %v4740_v38  }
 0x5ef   :  { %2384 = vmatpush.bf16.msrb.mxu0 %v3785_v35 }
 0x5f0   :  { %v4306_v39 = vpop.eup %4305 }
 0x5f1   :  { %v1742_v54 = vpop.f32.mrf.mxu2  ;;  %v2082_v40 = vpack.c.bf16 %v4306_v39, %v4304_v6  ;;  %2405 = vmatpush.bf16.msrb.mxu1 %v3785_v35  ;;  %v3783_v6 = vld [vmem:[#allocation10 + $0x60] sm:$0xff]  ;;  %v3781_v39 = vld [vmem:[#allocation10 + $0x50] sm:$0xff]  ;;  %v3796_v35 = vld [vmem:[#allocation10 + $0x48] sm:$0xff] }
 0x5f2   :  { %v1743_v16 = vadd.f32 %v4684_v56, %v1742_v54  ;;  %v3780_v54 = vld [vmem:[#allocation10 + $0x48] sm:$0xff] }
 0x5f3   :  { %2155 = vmatmul.bf16.vlgmr.msrb.gmra.mxu3 %v2082_v40  ;;  %2385 = vmatpush.bf16.msrb.mxu0 %v3784_v45 }
 0x5f4   :  { %2501 = vmatpush.bf16.msrb.mxu3 %v3794_v26 }
 0x5f5   :  { %2406 = vmatpush.bf16.msrb.mxu1 %v3784_v45 }
 0x5f7   :  { %2386 = vmatpush.bf16.msrb.mxu0 %v3783_v6 }
 0x5f8   :  { %2502 = vmatpush.bf16.msrb.mxu3 %v3793_v23 }
 0x5f9   :  { %v1744_v42 = vpop.f32.mrf.mxu2  ;;  %2407 = vmatpush.bf16.msrb.mxu1 %v3783_v6  ;;  %v3795_v6 = vld [vmem:[#allocation10 + $0x40] sm:$0xff] }
 0x5fa   :  { %v1745_v11 = vadd.f32 %v4684_v56, %v1744_v42  ;;  %v3779_v42 = vld [vmem:[#allocation10 + $0x40] sm:$0xff] }
 0x5fb   :  { %2387 = vmatpush.bf16.msrb.mxu0 %v3782_v30 }
 0x5fc   :  { %v4745_v10 = vpack.c.bf16 %v1745_v11, %v1743_v16  ;;  %v4145_v16 = vunpack.c.l.bf16 %v4711_v37  ;;  %2503 = vmatpush.bf16.msrb.mxu3 %v3792_v63 }
 0x5fd   :  { %2408 = vmatpush.bf16.msrb.mxu1 %v3782_v30  ;;  %v4161_v30 = vunpack.c.l.bf16 %v4733_v21 }
 0x5fe   :  { %4212 = vst [vmem:[#allocation2 + $0x38] sm:$0xff] %v4745_v10  }
 0x5ff   :  { %2388 = vmatpush.bf16.msrb.mxu0 %v3781_v39 }
 0x600   :  { %2504 = vmatpush.bf16.msrb.mxu3 %v3791_v1 }
 0x601   :  { %v1747_v43 = vpop.f32.mrf.mxu2  ;;  %2409 = vmatpush.bf16.msrb.mxu1 %v3781_v39 }
 0x602   :  { %v1748_v33 = vadd.f32 %v4684_v56, %v1747_v43  ;;  %v4146_v43 = vunpack.c.h.bf16 %v4711_v37 }
 0x603   :  { %2389 = vmatpush.bf16.msrb.mxu0 %v3780_v54 }
 0x605   :  { %2410 = vmatpush.bf16.msrb.mxu1 %v3780_v54  ;;  %v4162_v54 = vunpack.c.h.bf16 %v4733_v21 }
 0x607   :  { %2390 = vmatpush.bf16.msrb.mxu0 %v3779_v42 }
 0x609   :  { %v1749_v44 = vpop.f32.mrf.mxu2  ;;  %2411 = vmatpush.bf16.msrb.mxu1 %v3779_v42 }
 0x60a   :  { %v1750_v46 = vadd.f32 %v4684_v56, %v1749_v44 }
 0x60c   :  { %v4750_v48 = vpack.c.bf16 %v1750_v46, %v1748_v33 }
 0x60e   :  { %4213 = vst [vmem:[#allocation2 + $0x60] sm:$0xff] %v4750_v48  }
 0x611   :  { %v1752_v49 = vpop.f32.mrf.mxu2 }
 0x612   :  { %v1753_v51 = vadd.f32 %v4684_v56, %v1752_v49 }
 0x619   :  { %v1754_v50 = vpop.f32.mrf.mxu2 }
 0x61a   :  { %v1755_v52 = vadd.f32 %v4684_v56, %v1754_v50 }
 0x61c   :  { %v4755_v55 = vpack.c.bf16 %v1755_v52, %v1753_v51  ;;  %v4149_v52 = vunpack.c.l.bf16 %v4716_v41 }
 0x61e   :  { %4214 = vst [vmem:[#allocation2 + $0x70] sm:$0xff] %v4755_v55  }
 0x621   :  { %v1757_v8 = vpop.f32.mrf.mxu2 }
 0x622   :  { %v1758_v57 = vadd.f32 %v4684_v56, %v1757_v8 }
 0x629   :  { %v1759_v0 = vpop.f32.mrf.mxu2 }
 0x62a   :  { %v1760_v58 = vadd.f32 %v4684_v56, %v1759_v0  ;;  %v4150_v0 = vunpack.c.h.bf16 %v4716_v41  ;;  %v3790_v41 = vld [vmem:[#allocation10 + $0x58] sm:$0xff] }
 0x62b   :  { %2505 = vmatpush.bf16.msrb.mxu3 %v3790_v41 }
 0x62c   :  { %v4760_v60 = vpack.c.bf16 %v1760_v58, %v1758_v57 }
 0x62e   :  { %4215 = vst [vmem:[#allocation2 + $0x78] sm:$0xff] %v4760_v60  }
 0x62f   :  { %2506 = vmatpush.bf16.msrb.mxu3 %v3789_v3 }
 0x661   :  { %v1762_v4 = vpop.f32.mrf.mxu2 }
 0x662   :  { %v1763_v17 = vadd.f32 %v4684_v56, %v1762_v4  ;;  %v3788_v4 = vld [vmem:[#allocation10 + $0x48] sm:$0xff] }
 0x663   :  { %v2059_v5 = vpop.f32.mrf.mxu1  ;;  %2507 = vmatpush.bf16.msrb.mxu3 %v3788_v4 }
 0x664   :  { %v2064_v9 = vadd.f32 %v4137_v7, %v2059_v5  ;;  %v3787_v5 = vld [vmem:[#allocation10 + $0x40] sm:$0xff]  ;;  %v4153_v7 = vunpack.c.l.bf16 %v4721_v47 }
 0x666   :  { %4307 = vtanh.f32 %v2064_v9 }
 0x667   :  { %2508 = vmatpush.bf16.msrb.mxu3 %v3787_v5 }
 0x669   :  { %v1764_v15 = vpop.f32.mrf.mxu2 }
 0x66a   :  { %v1765_v20 = vadd.f32 %v4684_v56, %v1764_v15  ;;  %v4154_v15 = vunpack.c.h.bf16 %v4721_v47 }
 0x66b   :  { %v2061_v36 = vpop.f32.mrf.mxu1 }
 0x66c   :  { %v2065_v19 = vadd.f32 %v4138_v18, %v2061_v36  ;;  %v4767_v22 = vpack.c.bf16 %v1765_v20, %v1763_v17  ;;  %v4308_v24 = vpop.eup %4307 }
 0x66e   :  { %4309 = vtanh.f32 %v2065_v19  ;;  %4216 = vst [vmem:[#allocation2 + $0x28] sm:$0xff] %v4767_v22  }
 0x674   :  { %v4310_v25 = vpop.eup %4309 }
 0x675   :  { %v2167_v27 = vpack.c.bf16 %v4310_v25, %v4308_v24  ;;  %v4157_v24 = vunpack.c.l.bf16 %v4726_v62 }
 0x676   :  { %v2156_v28 = vpop.f32.mrf.mxu3 }
 0x677   :  { %2176 = vmatmul.bf16.vlgmr.msra.gmra.mxu0 %v2167_v27  ;;  %v2161_v53 = vadd.f32 %v4141_v12, %v2156_v28  ;;  %v4158_v28 = vunpack.c.h.bf16 %v4726_v62  ;;  %v3798_v62 = vld [vmem:[#allocation10 + $0x58] sm:$0xff] }
 0x678   :  { %2522 = vmatpush.bf16.msra.mxu0 %v3794_v26 }
 0x679   :  { %4311 = vtanh.f32 %v2161_v53 }
 0x67c   :  { %2523 = vmatpush.bf16.msra.mxu0 %v3793_v23  ;;  %v3803_v23 = vld [vmem:[#allocation10 + $0x40] sm:$0xff] }
 0x67e   :  { %v2158_v14 = vpop.f32.mrf.mxu3 }
 0x67f   :  { %v2162_v56 = vadd.f32 %v4142_v29, %v2158_v14  ;;  %v4312_v13 = vpop.eup %4311 }
 0x680   :  { %2524 = vmatpush.bf16.msra.mxu0 %v3792_v63  ;;  %v4169_v63 = vunpack.c.l.bf16 %v4745_v10 }
 0x681   :  { %4313 = vtanh.f32 %v2162_v56  ;;  %v3802_v56 = vld [vmem:[#allocation10 + $0x78] sm:$0xff] }
 0x684   :  { %2525 = vmatpush.bf16.msra.mxu0 %v3791_v1 }
 0x687   :  { %v4314_v31 = vpop.eup %4313 }
 0x688   :  { %v2200_v32 = vpack.c.bf16 %v4314_v31, %v4312_v13  ;;  %2526 = vmatpush.bf16.msra.mxu0 %v3790_v41  ;;  %v3801_v13 = vld [vmem:[#allocation10 + $0x70] sm:$0xff]  ;;  %v3800_v31 = vld [vmem:[#allocation10 + $0x68] sm:$0xff]  ;;  %v4170_v41 = vunpack.c.h.bf16 %v4745_v10 }
 0x68a   :  { %2273 = vmatmul.bf16.vlgmr.msra.gmra.mxu1 %v2200_v32  ;;  %v3799_v32 = vld [vmem:[#allocation10 + $0x60] sm:$0xff] }
 0x68b   :  { %2619 = vmatpush.bf16.msra.mxu1 %v3802_v56 }
 0x68c   :  { %2527 = vmatpush.bf16.msra.mxu0 %v3789_v3 }
 0x68f   :  { %2620 = vmatpush.bf16.msra.mxu1 %v3801_v13 }
 0x690   :  { %2528 = vmatpush.bf16.msra.mxu0 %v3788_v4 }
 0x693   :  { %2621 = vmatpush.bf16.msra.mxu1 %v3800_v31 }
 0x694   :  { %2529 = vmatpush.bf16.msra.mxu0 %v3787_v5 }
 0x697   :  { %2622 = vmatpush.bf16.msra.mxu1 %v3799_v32 }
 0x69b   :  { %2623 = vmatpush.bf16.msra.mxu1 %v3798_v62 }
 0x69f   :  { %2624 = vmatpush.bf16.msra.mxu1 %v3797_v34 }
 0x6a3   :  { %2625 = vmatpush.bf16.msra.mxu1 %v3796_v35 }
 0x6a7   :  { %2626 = vmatpush.bf16.msra.mxu1 %v3795_v6 }
 0x6f4   :  { %v2177_v40 = vpop.f32.mrf.mxu0 }
 0x6f5   :  { %v2182_v11 = vadd.f32 %v4145_v16, %v2177_v40 }
 0x6f7   :  { %4315 = vtanh.f32 %v2182_v11 }
 0x6fc   :  { %v2179_v44 = vpop.f32.mrf.mxu0 }
 0x6fd   :  { %v2183_v33 = vadd.f32 %v4146_v43, %v2179_v44  ;;  %v4316_v46 = vpop.eup %4315 }
 0x6ff   :  { %4317 = vtanh.f32 %v2183_v33  ;;  %v4165_v33 = vunpack.c.l.bf16 %v4740_v38 }
 0x705   :  { %v4318_v49 = vpop.eup %4317 }
 0x706   :  { %v2285_v50 = vpack.c.bf16 %v4318_v49, %v4316_v46  ;;  %v4166_v49 = vunpack.c.h.bf16 %v4740_v38  ;;  %v3806_v38 = vld [vmem:[#allocation10 + $0x58] sm:$0xff] }
 0x707   :  { %v2274_v51 = vpop.f32.mrf.mxu1 }
 0x708   :  { %2294 = vmatmul.bf16.vlgmr.msra.gmra.mxu3 %v2285_v50  ;;  %v2279_v8 = vadd.f32 %v4149_v52, %v2274_v51 }
 0x709   :  { %2640 = vmatpush.bf16.msra.mxu3 %v3802_v56  ;;  %v4177_v56 = vunpack.c.l.bf16 %v4755_v55 }
 0x70a   :  { %4319 = vtanh.f32 %v2279_v8 }
 0x70d   :  { %2641 = vmatpush.bf16.msra.mxu3 %v3801_v13 }
 0x70f   :  { %v2276_v57 = vpop.f32.mrf.mxu1 }
 0x710   :  { %v2280_v58 = vadd.f32 %v4150_v0, %v2276_v57  ;;  %v4320_v61 = vpop.eup %4319  ;;  %v3810_v0 = vld [vmem:[#allocation10 + $0x78] sm:$0xff]  ;;  %v3809_v57 = vld [vmem:[#allocation10 + $0x70] sm:$0xff] }
 0x711   :  { %2642 = vmatpush.bf16.msra.mxu3 %v3800_v31  ;;  %v4178_v31 = vunpack.c.h.bf16 %v4755_v55 }
 0x712   :  { %4321 = vtanh.f32 %v2280_v58  ;;  %v3808_v58 = vld [vmem:[#allocation10 + $0x68] sm:$0xff] }
 0x715   :  { %2643 = vmatpush.bf16.msra.mxu3 %v3799_v32 }
 0x718   :  { %v4322_v37 = vpop.eup %4321 }
 0x719   :  { %v2318_v59 = vpack.c.bf16 %v4322_v37, %v4320_v61  ;;  %2644 = vmatpush.bf16.msra.mxu3 %v3798_v62  ;;  %v3807_v61 = vld [vmem:[#allocation10 + $0x60] sm:$0xff]  ;;  %v3805_v37 = vld [vmem:[#allocation10 + $0x50] sm:$0xff] }
 0x71b   :  { %2391 = vmatmul.bf16.vlgmr.msrb.gmra.mxu0 %v2318_v59  ;;  %v3804_v59 = vld [vmem:[#allocation10 + $0x48] sm:$0xff] }
 0x71c   :  { %2737 = vmatpush.bf16.msrb.mxu0 %v3810_v0 }
 0x71d   :  { %2645 = vmatpush.bf16.msra.mxu3 %v3797_v34 }
 0x720   :  { %2738 = vmatpush.bf16.msrb.mxu0 %v3809_v57 }
 0x721   :  { %2646 = vmatpush.bf16.msra.mxu3 %v3796_v35 }
 0x724   :  { %2739 = vmatpush.bf16.msrb.mxu0 %v3808_v58 }
 0x725   :  { %2647 = vmatpush.bf16.msra.mxu3 %v3795_v6  ;;  %v4181_v6 = vunpack.c.l.bf16 %v4760_v60 }
 0x728   :  { %2740 = vmatpush.bf16.msrb.mxu0 %v3807_v61 }
 0x72c   :  { %2741 = vmatpush.bf16.msrb.mxu0 %v3806_v38 }
 0x730   :  { %2742 = vmatpush.bf16.msrb.mxu0 %v3805_v37 }
 0x734   :  { %2743 = vmatpush.bf16.msrb.mxu0 %v3804_v59 }
 0x738   :  { %2744 = vmatpush.bf16.msrb.mxu0 %v3803_v23 }
 0x78b   :  { %v2295_v2 = vpop.f32.mrf.mxu3 }
 0x78c   :  { %v2300_v9 = vadd.f32 %v4153_v7, %v2295_v2 }
 0x78e   :  { %4323 = vtanh.f32 %v2300_v9 }
 0x793   :  { %v2297_v18 = vpop.f32.mrf.mxu3 }
 0x794   :  { %v2301_v17 = vadd.f32 %v4154_v15, %v2297_v18  ;;  %v4324_v36 = vpop.eup %4323  ;;  %v4173_v15 = vunpack.c.l.bf16 %v4750_v48 }
 0x796   :  { %4325 = vtanh.f32 %v2301_v17  ;;  %v4174_v17 = vunpack.c.h.bf16 %v4750_v48  ;;  %v3812_v48 = vld [vmem:[#allocation12 + $0x8] sm:$0xff] }
 0x798   :  { %v2392_v20 = vpop.f32.mrf.mxu0 }
 0x799   :  { %v2397_v27 = vadd.f32 %v4157_v24, %v2392_v20 }
 0x79b   :  { %4327 = vtanh.f32 %v2397_v27  ;;  %v3817_v27 = vld [vmem:[#allocation12 + $0x30] sm:$0xff] }
 0x79c   :  { %v4326_v19 = vpop.eup %4325 }
 0x79d   :  { %v2403_v25 = vpack.c.bf16 %v4326_v19, %v4324_v36 }
 0x79f   :  { %2412 = vmatmul.bf16.vlgmr.msrb.gmra.mxu1 %v2403_v25  ;;  %v3818_v25 = vld [vmem:[#allocation12 + $0x38] sm:$0xff] }
 0x7a0   :  { %v2394_v12 = vpop.f32.mrf.mxu0  ;;  %2758 = vmatpush.bf16.msrb.mxu1 %v3810_v0 }
 0x7a1   :  { %v2398_v53 = vadd.f32 %v4158_v28, %v2394_v12  ;;  %v4328_v29 = vpop.eup %4327  ;;  %v3816_v28 = vld [vmem:[#allocation12 + $0x28] sm:$0xff]  ;;  %v3815_v12 = vld [vmem:[#allocation12 + $0x20] sm:$0xff] }
 0x7a3   :  { %4329 = vtanh.f32 %v2398_v53  ;;  %v3814_v53 = vld [vmem:[#allocation12 + $0x18] sm:$0xff] }
 0x7a4   :  { %2759 = vmatpush.bf16.msrb.mxu1 %v3809_v57 }
 0x7a8   :  { %2760 = vmatpush.bf16.msrb.mxu1 %v3808_v58 }
 0x7a9   :  { %v4330_v47 = vpop.eup %4329 }
 0x7aa   :  { %v2436_v14 = vpack.c.bf16 %v4330_v47, %v4328_v29  ;;  %v3813_v29 = vld [vmem:[#allocation12 + $0x10] sm:$0xff]  ;;  %v3811_v47 = vld [vmem:[#allocation12] sm:$0xff] }
 0x7ac   :  { %2509 = vmatmul.bf16.vlgmr.msrb.gmra.mxu3 %v2436_v14  ;;  %2761 = vmatpush.bf16.msrb.mxu1 %v3807_v61 }
 0x7ad   :  { %2854 = vmatpush.bf16.msrb.mxu3 %v3818_v25 }
 0x7b0   :  { %2762 = vmatpush.bf16.msrb.mxu1 %v3806_v38 }
 0x7b1   :  { %2855 = vmatpush.bf16.msrb.mxu3 %v3817_v27 }
 0x7b4   :  { %2763 = vmatpush.bf16.msrb.mxu1 %v3805_v37 }
 0x7b5   :  { %2856 = vmatpush.bf16.msrb.mxu3 %v3816_v28 }
 0x7b8   :  { %2764 = vmatpush.bf16.msrb.mxu1 %v3804_v59 }
 0x7b9   :  { %2857 = vmatpush.bf16.msrb.mxu3 %v3815_v12 }
 0x7bc   :  { %2765 = vmatpush.bf16.msrb.mxu1 %v3803_v23 }
 0x7bd   :  { %2858 = vmatpush.bf16.msrb.mxu3 %v3814_v53 }
 0x7c1   :  { %2859 = vmatpush.bf16.msrb.mxu3 %v3813_v29 }
 0x7c5   :  { %2860 = vmatpush.bf16.msrb.mxu3 %v3812_v48 }
 0x7c9   :  { %2861 = vmatpush.bf16.msrb.mxu3 %v3811_v47 }
 0x81c   :  { %v2413_v45 = vpop.f32.mrf.mxu1 }
 0x81d   :  { %v2418_v39 = vadd.f32 %v4161_v30, %v2413_v45 }
 0x81f   :  { %4331 = vtanh.f32 %v2418_v39 }
 0x824   :  { %v2415_v40 = vpop.f32.mrf.mxu1 }
 0x825   :  { %v2419_v42 = vadd.f32 %v4162_v54, %v2415_v40  ;;  %v4332_v16 = vpop.eup %4331  ;;  %v4182_v54 = vunpack.c.h.bf16 %v4760_v60  ;;  %v4230_v60 = vld [vmem:[%s4806_s6] ss:$0 sm:$0xff]  ;;  %s4520_s6 = smov 128  }
 0x827   :  { %4333 = vtanh.f32 %v2419_v42 }
 0x82d   :  { %v4334_v11 = vpop.eup %4333 }
 0x82e   :  { %v2521_v43 = vpack.c.bf16 %v4334_v11, %v4332_v16 }
 0x82f   :  { %v2510_v44 = vpop.f32.mrf.mxu3 }
 0x830   :  { %2530 = vmatmul.bf16.vlgmr.msra.gmra.mxu0 %v2521_v43  ;;  %v2515_v46 = vadd.f32 %v4165_v33, %v2510_v44  ;;  %v4185_v44 = vunpack.c.l.bf16 %v4767_v22 }
 0x832   :  { %4335 = vtanh.f32 %v2515_v46  ;;  %v4186_v46 = vunpack.c.h.bf16 %v4767_v22 }
 0x837   :  { %v2512_v50 = vpop.f32.mrf.mxu3 }
 0x838   :  { %v2516_v51 = vadd.f32 %v4166_v49, %v2512_v50  ;;  %v4336_v52 = vpop.eup %4335 }
 0x83a   :  { %4337 = vtanh.f32 %v2516_v51 }
 0x840   :  { %v4338_v21 = vpop.eup %4337 }
 0x841   :  { %v2554_v8 = vpack.c.bf16 %v4338_v21, %v4336_v52 }
 0x843   :  { %2627 = vmatmul.bf16.vlgmr.msra.gmra.mxu1 %v2554_v8 }
 0x8ad   :  { %v2531_v26 = vpop.f32.mrf.mxu0 }
 0x8ae   :  { %v2536_v1 = vadd.f32 %v4169_v63, %v2531_v26 }
 0x8b0   :  { %4339 = vtanh.f32 %v2536_v1 }
 0x8b5   :  { %v2533_v3 = vpop.f32.mrf.mxu0 }
 0x8b6   :  { %v2537_v4 = vadd.f32 %v4170_v41, %v2533_v3  ;;  %v4340_v5 = vpop.eup %4339 }
 0x8b8   :  { %4341 = vtanh.f32 %v2537_v4 }
 0x8be   :  { %v4342_v2 = vpop.eup %4341 }
 0x8bf   :  { %v2639_v7 = vpack.c.bf16 %v4342_v2, %v4340_v5 }
 0x8c0   :  { %v2628_v9 = vpop.f32.mrf.mxu1 }
 0x8c1   :  { %2648 = vmatmul.bf16.vlgmr.msra.gmra.mxu3 %v2639_v7  ;;  %v2633_v18 = vadd.f32 %v4173_v15, %v2628_v9 }
 0x8c3   :  { %4343 = vtanh.f32 %v2633_v18 }
 0x8c8   :  { %v2630_v20 = vpop.f32.mrf.mxu1 }
 0x8c9   :  { %v2634_v36 = vadd.f32 %v4174_v17, %v2630_v20  ;;  %v4344_v19 = vpop.eup %4343 }
 0x8cb   :  { %4345 = vtanh.f32 %v2634_v36 }
 0x8d1   :  { %v4346_v10 = vpop.eup %4345 }
 0x8d2   :  { %v2672_v24 = vpack.c.bf16 %v4346_v10, %v4344_v19 }
 0x8d4   :  { %2745 = vmatmul.bf16.vlgmr.msrb.gmra.mxu0 %v2672_v24 }
 0x944   :  { %v2649_v14 = vpop.f32.mrf.mxu3 }
 0x945   :  { %v2654_v13 = vadd.f32 %v4177_v56, %v2649_v14 }
 0x947   :  { %4347 = vtanh.f32 %v2654_v13 }
 0x94c   :  { %v2651_v32 = vpop.f32.mrf.mxu3 }
 0x94d   :  { %v2655_v62 = vadd.f32 %v4178_v31, %v2651_v32  ;;  %v4348_v35 = vpop.eup %4347 }
 0x94f   :  { %4349 = vtanh.f32 %v2655_v62 }
 0x951   :  { %v2746_v34 = vpop.f32.mrf.mxu0 }
 0x952   :  { %v2751_v39 = vadd.f32 %v4181_v6, %v2746_v34 }
 0x954   :  { %4351 = vtanh.f32 %v2751_v39 }
 0x955   :  { %v4350_v45 = vpop.eup %4349 }
 0x956   :  { %v2757_v30 = vpack.c.bf16 %v4350_v45, %v4348_v35 }
 0x958   :  { %2766 = vmatmul.bf16.vlgmr.msrb.gmra.mxu1 %v2757_v30 }
 0x959   :  { %v2748_v40 = vpop.f32.mrf.mxu0 }
 0x95a   :  { %v2752_v42 = vadd.f32 %v4182_v54, %v2748_v40  ;;  %v4352_v16 = vpop.eup %4351 }
 0x95c   :  { %4353 = vtanh.f32 %v2752_v42 }
 0x962   :  { %v4354_v55 = vpop.eup %4353 }
 0x963   :  { %v2784_v11 = vpack.c.bf16 %v4354_v55, %v4352_v16 }
 0x965   :  { %2862 = vmatmul.bf16.vlgmr.msrb.gmra.mxu3 %v2784_v11 }
 0x9d5   :  { %v2767_v43 = vpop.f32.mrf.mxu1 }
 0x9d6   :  { %v2772_v33 = vadd.f32 %v4185_v44, %v2767_v43 }
 0x9d8   :  { %4355 = vtanh.f32 %v2772_v33 }
 0x9dd   :  { %v2769_v49 = vpop.f32.mrf.mxu1 }
 0x9de   :  { %v2773_v50 = vadd.f32 %v4186_v46, %v2769_v49  ;;  %v4356_v51 = vpop.eup %4355 }
 0x9e0   :  { %4357 = vtanh.f32 %v2773_v50 }
 0x9e6   :  { %v4358_v52 = vpop.eup %4357 }
 0x9e7   :  { %v2785_v21 = vpack.c.bf16 %v4358_v52, %v4356_v51 }
 0x9e8   :  { %v2863_v8 = vpop.f32.mrf.mxu3 }
 0x9e9   :  { %2867 = vmatmul.bf16.gmra.mxu3 %v2785_v21  ;;  %v2864_v0 = vadd.f32 %v4230_v60, %v2863_v8 }
 0x9eb   :  { %2873 = vst [vmem:[#allocation13] sm:$0xff] %v2864_v0 }
 0x9f0   :  { %v2865_v57 = vpop.f32.mrf.mxu3 }
 0x9f1   :  { %v2866_v58 = vadd.f32 %v4230_v60, %v2865_v57 }
 0x9f3   :  { %2874 = vst [vmem:[#allocation13 + $0x8] sm:$0xff] %v2866_v58 }
 0xa6c   :  { %v2868_v61 = vpop.f32.mrf.mxu3 }
 0xa6d   :  { %v2869_v22 = vadd.f32 %v4230_v60, %v2868_v61 }
 0xa6f   :  { %2875 = vst [vmem:[#allocation13 + $0x10] sm:$0xff] %v2869_v22 }
 0xa74   :  { %v2870_v38 = vpop.f32.mrf.mxu3 }
 0xa75   :  { %v2871_v37 = vadd.f32 %v4230_v60, %v2870_v38 }
 0xa77   :  { %2876 = vst [vmem:[#allocation13 + $0x18] sm:$0xff] %v2871_v37 }
 0xa78   :  { %2889 = dma.vmem_to_hbm [thread:$0]  %s2882_s29, 512, %s2884_s9, [#allocation6], %s4520_s6, %s4520_s6, %s4521_s10  }
 0xa79   :  { %4509 = dma.done.wait [#allocation6], 512  }
 0xa7a   :  { %4510 = vsyncadd [#allocation6], 4294966784 }
 0xa7b   :  { %2894 = vsyncpa [#allocation5], 1 }
 0xa7c   :  { %2895 = vsyncpa [#allocation8], 1 }
 0xa7d   :  { %2896 = vsyncpa [#allocation11], 1 }
 0xa7e   :  { %2897 = vsyncpa [#allocation6], 1 }

</bundles_post_ra>
